<compile_context>
chip_gen: v6e
topology: v6e:2x2x1
jax: 0.10.0
libtpu: 0.0.40
codegen_flags: <defaults>
</compile_context>

<pallas_src>
import functools

import jax
import jax.numpy as jnp
from jax.experimental import pallas as pl
from jax.experimental.pallas import tpu as pltpu


# Encoder: 784 -> 256 -> 128 -> 64 -> 32   (LeakyReLU(0.2) after each)
# Decoder: 32 -> 64 -> 128 -> 256 -> 784   (LeakyReLU(0.2) x3, Tanh on last)
LAYER_DIMS = [(784, 256), (256, 128), (128, 64), (64, 32),
              (32, 64), (64, 128), (128, 256), (256, 784)]
N_LAYERS = len(LAYER_DIMS)
IN_DIM = LAYER_DIMS[0][0]
OUT_DIM = LAYER_DIMS[-1][1]


def _pad_dim(d):
    # Lane-dense intermediates: pad any feature dim below 128 up to 128.
    return 128 if d < 128 else d


PADDED_DIMS = [(_pad_dim(din), _pad_dim(dout)) for (din, dout) in LAYER_DIMS]
TOTAL_MACS_PADDED = sum(d * o for d, o in PADDED_DIMS)   # per-row MACs on MXU


def _leaky_relu(x, slope=0.2):
    return jnp.where(x > 0, x, slope * x)


def vae_kernel(x_ref, *refs):
    """refs = (w1, b1, ..., w8, b8, o_ref). Full MLP chain on one batch tile."""
    o_ref = refs[-1]
    param_refs = refs[:-1]

    # In-kernel cast: f32 HBM tile -> bf16 MXU operand (no wrapper cast pass).
    h = x_ref[...].astype(jnp.bfloat16)                 # (tile_b, 784)
    for li in range(N_LAYERS):
        w = param_refs[2 * li][...]                     # bf16 (din_p, dout_p)
        b = param_refs[2 * li + 1][...]                 # f32  (1, dout_p)
        # bf16 MXU inputs, f32 accumulation.
        acc = jnp.dot(h, w, preferred_element_type=jnp.float32) + b
        if li < N_LAYERS - 1:
            h = _leaky_relu(acc).astype(jnp.bfloat16)   # LeakyReLU(0.2), back to bf16
        else:
            h = jnp.tanh(acc)                           # final decoder activation
        # Dropout(0.3) -> identity in eval mode.
    o_ref[...] = h.astype(o_ref.dtype)                  # bf16 store (halved writeback)


def init_params(key):
    """PyTorch-style Linear init: U(-1/sqrt(fan_in), 1/sqrt(fan_in)). f32, true shapes."""
    params = []
    for (din, dout) in LAYER_DIMS:
        key, kw, kb = jax.random.split(key, 3)
        bound = 1.0 / jnp.sqrt(jnp.float32(din))
        w = jax.random.uniform(kw, (din, dout), jnp.float32, -bound, bound)
        b = jax.random.uniform(kb, (1, dout), jnp.float32, -bound, bound)
        params.append((w, b))
    return params


def pad_params_for_kernel(params):
    """Zero-pad narrow (32/64-wide) dims to 128 and cast weights to bf16.

    Zero weight rows/cols + zero bias entries keep the padded lanes exactly 0
    through LeakyReLU, so the padding is mathematically inert.
    """
    flat = []
    for li, (w, b) in enumerate(params):
        din, dout = LAYER_DIMS[li]
        din_p, dout_p = PADDED_DIMS[li]
        w_p = jnp.zeros((din_p, dout_p), jnp.bfloat16)
        w_p = w_p.at[:din, :dout].set(w.astype(jnp.bfloat16))
        b_p = jnp.zeros((1, dout_p), jnp.float32)
        b_p = b_p.at[:, :dout].set(b)
        flat.extend([w_p, b_p])
    return flat


@functools.partial(jax.jit, static_argnames=("batch_tile",))
def vae_forward(x, params_flat, batch_tile=128):
    """batch_tile: multiple of 8 (f32 sublanes); 128-512 is a good range."""
    B, F = x.shape
    assert F == IN_DIM

    # Pad batch to a multiple of the tile (no-op when B already divides).
    b_pad = ((B + batch_tile - 1) // batch_tile) * batch_tile
    x_in = x
    if b_pad != B:
        x_in = jnp.pad(x_in, ((0, b_pad - B), (0, 0)))
    grid = (b_pad // batch_tile,)

    # x tile: (batch_tile, 784) f32; every weight/bias passed whole with a
    # constant index_map -> fetched once, resident in VMEM across all steps.
    in_specs = [pl.BlockSpec((batch_tile, IN_DIM), lambda i: (i, 0))]
    for (din_p, dout_p) in PADDED_DIMS:
        in_specs.append(pl.BlockSpec((din_p, dout_p), lambda i: (0, 0)))
        in_specs.append(pl.BlockSpec((1, dout_p), lambda i: (0, 0)))
    out_spec = pl.BlockSpec((batch_tile, OUT_DIM), lambda i: (i, 0))

    weight_bytes = sum(d * o * 2 + o * 4 for d, o in PADDED_DIMS)
    cost = pl.CostEstimate(
        flops=2 * b_pad * TOTAL_MACS_PADDED,
        transcendentals=b_pad * OUT_DIM,                          # final tanh
        bytes_accessed=(b_pad * IN_DIM * 4                        # f32 x in
                        + b_pad * OUT_DIM * 2                     # bf16 out
                        + weight_bytes),
    )

    out = pl.pallas_call(
        vae_kernel,
        out_shape=jax.ShapeDtypeStruct((b_pad, OUT_DIM), jnp.bfloat16),
        grid_spec=pltpu.PrefetchScalarGridSpec(
            num_scalar_prefetch=0,
            grid=grid,
            in_specs=in_specs,
            out_specs=out_spec,
        ),
        compiler_params=pltpu.CompilerParams(
            dimension_semantics=("parallel",),   # batch tiles shard across TCs (v7x)
        ),
        cost_estimate=cost,
    )(x_in, *params_flat)

    return out[:B] if b_pad != B else out


def vae_reference(x, params):
    """Pure-JAX reference with the same bf16-in / f32-accumulate numerics."""
    h = x.astype(jnp.bfloat16)
    for li, (w, b) in enumerate(params):
        acc = jnp.dot(h, w.astype(jnp.bfloat16),
                      preferred_element_type=jnp.float32) + b
        if li < N_LAYERS - 1:
            h = _leaky_relu(acc).astype(jnp.bfloat16)
        else:
            h = jnp.tanh(acc)
    return h


if __name__ == "__main__":
    key = jax.random.PRNGKey(0)
    kx, kp = jax.random.split(key)

    # 4 grid steps at batch_tile=128 -> >=2 steps per TensorCore on v7x,
    # so BlockSpec double-buffering reaches steady state.
    B = 512
    x = jax.random.normal(kx, (B, IN_DIM), jnp.float32)

    params = init_params(kp)
    params_flat = pad_params_for_kernel(params)

    out = jax.block_until_ready(vae_forward(x, params_flat, batch_tile=128))

    ref = vae_reference(x, params)
    assert out.shape == (B, OUT_DIM)
    # bf16 matmul inputs + bf16 output -> relaxed tolerance vs a pure-f32 check.
    assert jnp.allclose(out.astype(jnp.float32), ref, atol=3e-2, rtol=3e-2), \
        "mismatch vs reference"

    print("KERNEL_OK")
</pallas_src>

<mosaic_0001>
module attributes {stable_mosaic.version = 11 : i64} {
  func.func @vae_kernel(%arg0: i32, %arg1: memref<128x784xf32, #tpu.memory_space<vmem>>, %arg2: memref<784x256xbf16, #tpu.memory_space<vmem>>, %arg3: memref<1x256xf32, #tpu.memory_space<vmem>>, %arg4: memref<256x128xbf16, #tpu.memory_space<vmem>>, %arg5: memref<1x128xf32, #tpu.memory_space<vmem>>, %arg6: memref<128x128xbf16, #tpu.memory_space<vmem>>, %arg7: memref<1x128xf32, #tpu.memory_space<vmem>>, %arg8: memref<128x128xbf16, #tpu.memory_space<vmem>>, %arg9: memref<1x128xf32, #tpu.memory_space<vmem>>, %arg10: memref<128x128xbf16, #tpu.memory_space<vmem>>, %arg11: memref<1x128xf32, #tpu.memory_space<vmem>>, %arg12: memref<128x128xbf16, #tpu.memory_space<vmem>>, %arg13: memref<1x128xf32, #tpu.memory_space<vmem>>, %arg14: memref<128x256xbf16, #tpu.memory_space<vmem>>, %arg15: memref<1x256xf32, #tpu.memory_space<vmem>>, %arg16: memref<256x784xbf16, #tpu.memory_space<vmem>>, %arg17: memref<1x784xf32, #tpu.memory_space<vmem>>, %arg18: memref<128x784xbf16, #tpu.memory_space<vmem>>) attributes {dimension_semantics = [#tpu.dimension_semantics<parallel>], iteration_bounds = array<i64: 4>, scalar_prefetch = 0 : i64, scratch_operands = 0 : i64, tpu.core_type = #tpu.core_type<tc>, window_params = [{transform_indices = @transform_0, window_bounds = array<i64: 128, 784>}, {pipeline_mode = #tpu.pipeline_mode<synchronous>, transform_indices = @transform_1, window_bounds = array<i64: 784, 256>}, {pipeline_mode = #tpu.pipeline_mode<synchronous>, transform_indices = @transform_2, window_bounds = array<i64: 1, 256>}, {pipeline_mode = #tpu.pipeline_mode<synchronous>, transform_indices = @transform_3, window_bounds = array<i64: 256, 128>}, {pipeline_mode = #tpu.pipeline_mode<synchronous>, transform_indices = @transform_4, window_bounds = array<i64: 1, 128>}, {pipeline_mode = #tpu.pipeline_mode<synchronous>, transform_indices = @transform_5, window_bounds = array<i64: 128, 128>}, {pipeline_mode = #tpu.pipeline_mode<synchronous>, transform_indices = @transform_6, window_bounds = array<i64: 1, 128>}, {pipeline_mode = #tpu.pipeline_mode<synchronous>, transform_indices = @transform_7, window_bounds = array<i64: 128, 128>}, {pipeline_mode = #tpu.pipeline_mode<synchronous>, transform_indices = @transform_8, window_bounds = array<i64: 1, 128>}, {pipeline_mode = #tpu.pipeline_mode<synchronous>, transform_indices = @transform_9, window_bounds = array<i64: 128, 128>}, {pipeline_mode = #tpu.pipeline_mode<synchronous>, transform_indices = @transform_10, window_bounds = array<i64: 1, 128>}, {pipeline_mode = #tpu.pipeline_mode<synchronous>, transform_indices = @transform_11, window_bounds = array<i64: 128, 128>}, {pipeline_mode = #tpu.pipeline_mode<synchronous>, transform_indices = @transform_12, window_bounds = array<i64: 1, 128>}, {pipeline_mode = #tpu.pipeline_mode<synchronous>, transform_indices = @transform_13, window_bounds = array<i64: 128, 256>}, {pipeline_mode = #tpu.pipeline_mode<synchronous>, transform_indices = @transform_14, window_bounds = array<i64: 1, 256>}, {pipeline_mode = #tpu.pipeline_mode<synchronous>, transform_indices = @transform_15, window_bounds = array<i64: 256, 784>}, {pipeline_mode = #tpu.pipeline_mode<synchronous>, transform_indices = @transform_16, window_bounds = array<i64: 1, 784>}, {transform_indices = @transform_17, window_bounds = array<i64: 128, 784>}]} {
    %c0 = arith.constant 0 : index
    %c0_0 = arith.constant 0 : index
    %0 = vector.load %arg1[%c0, %c0_0] : memref<128x784xf32, #tpu.memory_space<vmem>>, vector<128x784xf32>
    %1 = arith.truncf %0 : vector<128x784xf32> to vector<128x784xbf16>
    %c0_1 = arith.constant 0 : index
    %c0_2 = arith.constant 0 : index
    %2 = vector.load %arg2[%c0_1, %c0_2] : memref<784x256xbf16, #tpu.memory_space<vmem>>, vector<784x256xbf16>
    %c0_3 = arith.constant 0 : index
    %c0_4 = arith.constant 0 : index
    %3 = vector.load %arg3[%c0_3, %c0_4] : memref<1x256xf32, #tpu.memory_space<vmem>>, vector<1x256xf32>
    %cst = arith.constant dense<0.000000e+00> : vector<128x256xf32>
    %4 = tpu.matmul %1, %2, %cst {dimension_numbers = #tpu.dot_dimension_numbers<[1], [0], [0], [1], [0, 0, 1, 1], [], []>} : vector<128x784xbf16>, vector<784x256xbf16>, vector<128x256xf32> -> vector<128x256xf32>
    %5 = vector.broadcast %3 : vector<1x256xf32> to vector<128x256xf32>
    %6 = arith.addf %4, %5 : vector<128x256xf32>
    %cst_5 = arith.constant 0.000000e+00 : f32
    %7 = vector.broadcast %cst_5 : f32 to vector<128x256xf32>
    %8 = arith.cmpf ogt, %6, %7 : vector<128x256xf32>
    %cst_6 = arith.constant 2.000000e-01 : f32
    %9 = vector.broadcast %cst_6 : f32 to vector<128x256xf32>
    %10 = arith.mulf %9, %6 : vector<128x256xf32>
    %11 = arith.select %8, %6, %10 : vector<128x256xi1>, vector<128x256xf32>
    %12 = arith.truncf %11 : vector<128x256xf32> to vector<128x256xbf16>
    %c0_7 = arith.constant 0 : index
    %c0_8 = arith.constant 0 : index
    %13 = vector.load %arg4[%c0_7, %c0_8] : memref<256x128xbf16, #tpu.memory_space<vmem>>, vector<256x128xbf16>
    %c0_9 = arith.constant 0 : index
    %c0_10 = arith.constant 0 : index
    %14 = vector.load %arg5[%c0_9, %c0_10] : memref<1x128xf32, #tpu.memory_space<vmem>>, vector<1x128xf32>
    %cst_11 = arith.constant dense<0.000000e+00> : vector<128x128xf32>
    %15 = tpu.matmul %12, %13, %cst_11 {dimension_numbers = #tpu.dot_dimension_numbers<[1], [0], [0], [1], [0, 0, 1, 1], [], []>} : vector<128x256xbf16>, vector<256x128xbf16>, vector<128x128xf32> -> vector<128x128xf32>
    %16 = vector.broadcast %14 : vector<1x128xf32> to vector<128x128xf32>
    %17 = arith.addf %15, %16 : vector<128x128xf32>
    %cst_12 = arith.constant 0.000000e+00 : f32
    %18 = vector.broadcast %cst_12 : f32 to vector<128x128xf32>
    %19 = arith.cmpf ogt, %17, %18 : vector<128x128xf32>
    %cst_13 = arith.constant 2.000000e-01 : f32
    %20 = vector.broadcast %cst_13 : f32 to vector<128x128xf32>
    %21 = arith.mulf %20, %17 : vector<128x128xf32>
    %22 = arith.select %19, %17, %21 : vector<128x128xi1>, vector<128x128xf32>
    %23 = arith.truncf %22 : vector<128x128xf32> to vector<128x128xbf16>
    %c0_14 = arith.constant 0 : index
    %c0_15 = arith.constant 0 : index
    %24 = vector.load %arg6[%c0_14, %c0_15] : memref<128x128xbf16, #tpu.memory_space<vmem>>, vector<128x128xbf16>
    %c0_16 = arith.constant 0 : index
    %c0_17 = arith.constant 0 : index
    %25 = vector.load %arg7[%c0_16, %c0_17] : memref<1x128xf32, #tpu.memory_space<vmem>>, vector<1x128xf32>
    %cst_18 = arith.constant dense<0.000000e+00> : vector<128x128xf32>
    %26 = tpu.matmul %23, %24, %cst_18 {dimension_numbers = #tpu.dot_dimension_numbers<[1], [0], [0], [1], [0, 0, 1, 1], [], []>} : vector<128x128xbf16>, vector<128x128xbf16>, vector<128x128xf32> -> vector<128x128xf32>
    %27 = vector.broadcast %25 : vector<1x128xf32> to vector<128x128xf32>
    %28 = arith.addf %26, %27 : vector<128x128xf32>
    %cst_19 = arith.constant 0.000000e+00 : f32
    %29 = vector.broadcast %cst_19 : f32 to vector<128x128xf32>
    %30 = arith.cmpf ogt, %28, %29 : vector<128x128xf32>
    %cst_20 = arith.constant 2.000000e-01 : f32
    %31 = vector.broadcast %cst_20 : f32 to vector<128x128xf32>
    %32 = arith.mulf %31, %28 : vector<128x128xf32>
    %33 = arith.select %30, %28, %32 : vector<128x128xi1>, vector<128x128xf32>
    %34 = arith.truncf %33 : vector<128x128xf32> to vector<128x128xbf16>
    %c0_21 = arith.constant 0 : index
    %c0_22 = arith.constant 0 : index
    %35 = vector.load %arg8[%c0_21, %c0_22] : memref<128x128xbf16, #tpu.memory_space<vmem>>, vector<128x128xbf16>
    %c0_23 = arith.constant 0 : index
    %c0_24 = arith.constant 0 : index
    %36 = vector.load %arg9[%c0_23, %c0_24] : memref<1x128xf32, #tpu.memory_space<vmem>>, vector<1x128xf32>
    %cst_25 = arith.constant dense<0.000000e+00> : vector<128x128xf32>
    %37 = tpu.matmul %34, %35, %cst_25 {dimension_numbers = #tpu.dot_dimension_numbers<[1], [0], [0], [1], [0, 0, 1, 1], [], []>} : vector<128x128xbf16>, vector<128x128xbf16>, vector<128x128xf32> -> vector<128x128xf32>
    %38 = vector.broadcast %36 : vector<1x128xf32> to vector<128x128xf32>
    %39 = arith.addf %37, %38 : vector<128x128xf32>
    %cst_26 = arith.constant 0.000000e+00 : f32
    %40 = vector.broadcast %cst_26 : f32 to vector<128x128xf32>
    %41 = arith.cmpf ogt, %39, %40 : vector<128x128xf32>
    %cst_27 = arith.constant 2.000000e-01 : f32
    %42 = vector.broadcast %cst_27 : f32 to vector<128x128xf32>
    %43 = arith.mulf %42, %39 : vector<128x128xf32>
    %44 = arith.select %41, %39, %43 : vector<128x128xi1>, vector<128x128xf32>
    %45 = arith.truncf %44 : vector<128x128xf32> to vector<128x128xbf16>
    %c0_28 = arith.constant 0 : index
    %c0_29 = arith.constant 0 : index
    %46 = vector.load %arg10[%c0_28, %c0_29] : memref<128x128xbf16, #tpu.memory_space<vmem>>, vector<128x128xbf16>
    %c0_30 = arith.constant 0 : index
    %c0_31 = arith.constant 0 : index
    %47 = vector.load %arg11[%c0_30, %c0_31] : memref<1x128xf32, #tpu.memory_space<vmem>>, vector<1x128xf32>
    %cst_32 = arith.constant dense<0.000000e+00> : vector<128x128xf32>
    %48 = tpu.matmul %45, %46, %cst_32 {dimension_numbers = #tpu.dot_dimension_numbers<[1], [0], [0], [1], [0, 0, 1, 1], [], []>} : vector<128x128xbf16>, vector<128x128xbf16>, vector<128x128xf32> -> vector<128x128xf32>
    %49 = vector.broadcast %47 : vector<1x128xf32> to vector<128x128xf32>
    %50 = arith.addf %48, %49 : vector<128x128xf32>
    %cst_33 = arith.constant 0.000000e+00 : f32
    %51 = vector.broadcast %cst_33 : f32 to vector<128x128xf32>
    %52 = arith.cmpf ogt, %50, %51 : vector<128x128xf32>
    %cst_34 = arith.constant 2.000000e-01 : f32
    %53 = vector.broadcast %cst_34 : f32 to vector<128x128xf32>
    %54 = arith.mulf %53, %50 : vector<128x128xf32>
    %55 = arith.select %52, %50, %54 : vector<128x128xi1>, vector<128x128xf32>
    %56 = arith.truncf %55 : vector<128x128xf32> to vector<128x128xbf16>
    %c0_35 = arith.constant 0 : index
    %c0_36 = arith.constant 0 : index
    %57 = vector.load %arg12[%c0_35, %c0_36] : memref<128x128xbf16, #tpu.memory_space<vmem>>, vector<128x128xbf16>
    %c0_37 = arith.constant 0 : index
    %c0_38 = arith.constant 0 : index
    %58 = vector.load %arg13[%c0_37, %c0_38] : memref<1x128xf32, #tpu.memory_space<vmem>>, vector<1x128xf32>
    %cst_39 = arith.constant dense<0.000000e+00> : vector<128x128xf32>
    %59 = tpu.matmul %56, %57, %cst_39 {dimension_numbers = #tpu.dot_dimension_numbers<[1], [0], [0], [1], [0, 0, 1, 1], [], []>} : vector<128x128xbf16>, vector<128x128xbf16>, vector<128x128xf32> -> vector<128x128xf32>
    %60 = vector.broadcast %58 : vector<1x128xf32> to vector<128x128xf32>
    %61 = arith.addf %59, %60 : vector<128x128xf32>
    %cst_40 = arith.constant 0.000000e+00 : f32
    %62 = vector.broadcast %cst_40 : f32 to vector<128x128xf32>
    %63 = arith.cmpf ogt, %61, %62 : vector<128x128xf32>
    %cst_41 = arith.constant 2.000000e-01 : f32
    %64 = vector.broadcast %cst_41 : f32 to vector<128x128xf32>
    %65 = arith.mulf %64, %61 : vector<128x128xf32>
    %66 = arith.select %63, %61, %65 : vector<128x128xi1>, vector<128x128xf32>
    %67 = arith.truncf %66 : vector<128x128xf32> to vector<128x128xbf16>
    %c0_42 = arith.constant 0 : index
    %c0_43 = arith.constant 0 : index
    %68 = vector.load %arg14[%c0_42, %c0_43] : memref<128x256xbf16, #tpu.memory_space<vmem>>, vector<128x256xbf16>
    %c0_44 = arith.constant 0 : index
    %c0_45 = arith.constant 0 : index
    %69 = vector.load %arg15[%c0_44, %c0_45] : memref<1x256xf32, #tpu.memory_space<vmem>>, vector<1x256xf32>
    %cst_46 = arith.constant dense<0.000000e+00> : vector<128x256xf32>
    %70 = tpu.matmul %67, %68, %cst_46 {dimension_numbers = #tpu.dot_dimension_numbers<[1], [0], [0], [1], [0, 0, 1, 1], [], []>} : vector<128x128xbf16>, vector<128x256xbf16>, vector<128x256xf32> -> vector<128x256xf32>
    %71 = vector.broadcast %69 : vector<1x256xf32> to vector<128x256xf32>
    %72 = arith.addf %70, %71 : vector<128x256xf32>
    %cst_47 = arith.constant 0.000000e+00 : f32
    %73 = vector.broadcast %cst_47 : f32 to vector<128x256xf32>
    %74 = arith.cmpf ogt, %72, %73 : vector<128x256xf32>
    %cst_48 = arith.constant 2.000000e-01 : f32
    %75 = vector.broadcast %cst_48 : f32 to vector<128x256xf32>
    %76 = arith.mulf %75, %72 : vector<128x256xf32>
    %77 = arith.select %74, %72, %76 : vector<128x256xi1>, vector<128x256xf32>
    %78 = arith.truncf %77 : vector<128x256xf32> to vector<128x256xbf16>
    %c0_49 = arith.constant 0 : index
    %c0_50 = arith.constant 0 : index
    %79 = vector.load %arg16[%c0_49, %c0_50] : memref<256x784xbf16, #tpu.memory_space<vmem>>, vector<256x784xbf16>
    %c0_51 = arith.constant 0 : index
    %c0_52 = arith.constant 0 : index
    %80 = vector.load %arg17[%c0_51, %c0_52] : memref<1x784xf32, #tpu.memory_space<vmem>>, vector<1x784xf32>
    %cst_53 = arith.constant dense<0.000000e+00> : vector<128x784xf32>
    %81 = tpu.matmul %78, %79, %cst_53 {dimension_numbers = #tpu.dot_dimension_numbers<[1], [0], [0], [1], [0, 0, 1, 1], [], []>} : vector<128x256xbf16>, vector<256x784xbf16>, vector<128x784xf32> -> vector<128x784xf32>
    %82 = vector.broadcast %80 : vector<1x784xf32> to vector<128x784xf32>
    %83 = arith.addf %81, %82 : vector<128x784xf32>
    %84 = math.tanh %83 : vector<128x784xf32>
    %85 = arith.truncf %84 : vector<128x784xf32> to vector<128x784xbf16>
    %c0_54 = arith.constant 0 : index
    %c0_55 = arith.constant 0 : index
    %86 = vector.load %arg18[%c0_54, %c0_55] : memref<128x784xbf16, #tpu.memory_space<vmem>>, vector<128x784xbf16>
    tpu.vector_store %arg18[%c0_54, %c0_55], %85 {strides = array<i32>} : memref<128x784xbf16, #tpu.memory_space<vmem>>, vector<128x784xbf16>,
    return
  }
  func.func @transform_0(%arg0: i32) -> (i32, i32) {
    %c0_i32 = arith.constant 0 : i32
    %c0_i32_0 = arith.constant 0 : i32
    return %arg0, %c0_i32 : i32, i32
  }
  func.func @transform_1(%arg0: i32) -> (i32, i32) {
    %c0_i32 = arith.constant 0 : i32
    %c0_i32_0 = arith.constant 0 : i32
    %c0_i32_1 = arith.constant 0 : i32
    return %c0_i32, %c0_i32_0 : i32, i32
  }
  func.func @transform_2(%arg0: i32) -> (i32, i32) {
    %c0_i32 = arith.constant 0 : i32
    %c0_i32_0 = arith.constant 0 : i32
    %c0_i32_1 = arith.constant 0 : i32
    return %c0_i32, %c0_i32_0 : i32, i32
  }
  func.func @transform_3(%arg0: i32) -> (i32, i32) {
    %c0_i32 = arith.constant 0 : i32
    %c0_i32_0 = arith.constant 0 : i32
    %c0_i32_1 = arith.constant 0 : i32
    return %c0_i32, %c0_i32_0 : i32, i32
  }
  func.func @transform_4(%arg0: i32) -> (i32, i32) {
    %c0_i32 = arith.constant 0 : i32
    %c0_i32_0 = arith.constant 0 : i32
    %c0_i32_1 = arith.constant 0 : i32
    return %c0_i32, %c0_i32_0 : i32, i32
  }
  func.func @transform_5(%arg0: i32) -> (i32, i32) {
    %c0_i32 = arith.constant 0 : i32
    %c0_i32_0 = arith.constant 0 : i32
    %c0_i32_1 = arith.constant 0 : i32
    return %c0_i32, %c0_i32_0 : i32, i32
  }
  func.func @transform_6(%arg0: i32) -> (i32, i32) {
    %c0_i32 = arith.constant 0 : i32
    %c0_i32_0 = arith.constant 0 : i32
    %c0_i32_1 = arith.constant 0 : i32
    return %c0_i32, %c0_i32_0 : i32, i32
  }
  func.func @transform_7(%arg0: i32) -> (i32, i32) {
    %c0_i32 = arith.constant 0 : i32
    %c0_i32_0 = arith.constant 0 : i32
    %c0_i32_1 = arith.constant 0 : i32
    return %c0_i32, %c0_i32_0 : i32, i32
  }
  func.func @transform_8(%arg0: i32) -> (i32, i32) {
    %c0_i32 = arith.constant 0 : i32
    %c0_i32_0 = arith.constant 0 : i32
    %c0_i32_1 = arith.constant 0 : i32
    return %c0_i32, %c0_i32_0 : i32, i32
  }
  func.func @transform_9(%arg0: i32) -> (i32, i32) {
    %c0_i32 = arith.constant 0 : i32
    %c0_i32_0 = arith.constant 0 : i32
    %c0_i32_1 = arith.constant 0 : i32
    return %c0_i32, %c0_i32_0 : i32, i32
  }
  func.func @transform_10(%arg0: i32) -> (i32, i32) {
    %c0_i32 = arith.constant 0 : i32
    %c0_i32_0 = arith.constant 0 : i32
    %c0_i32_1 = arith.constant 0 : i32
    return %c0_i32, %c0_i32_0 : i32, i32
  }
  func.func @transform_11(%arg0: i32) -> (i32, i32) {
    %c0_i32 = arith.constant 0 : i32
    %c0_i32_0 = arith.constant 0 : i32
    %c0_i32_1 = arith.constant 0 : i32
    return %c0_i32, %c0_i32_0 : i32, i32
  }
  func.func @transform_12(%arg0: i32) -> (i32, i32) {
    %c0_i32 = arith.constant 0 : i32
    %c0_i32_0 = arith.constant 0 : i32
    %c0_i32_1 = arith.constant 0 : i32
    return %c0_i32, %c0_i32_0 : i32, i32
  }
  func.func @transform_13(%arg0: i32) -> (i32, i32) {
    %c0_i32 = arith.constant 0 : i32
    %c0_i32_0 = arith.constant 0 : i32
    %c0_i32_1 = arith.constant 0 : i32
    return %c0_i32, %c0_i32_0 : i32, i32
  }
  func.func @transform_14(%arg0: i32) -> (i32, i32) {
    %c0_i32 = arith.constant 0 : i32
    %c0_i32_0 = arith.constant 0 : i32
    %c0_i32_1 = arith.constant 0 : i32
    return %c0_i32, %c0_i32_0 : i32, i32
  }
  func.func @transform_15(%arg0: i32) -> (i32, i32) {
    %c0_i32 = arith.constant 0 : i32
    %c0_i32_0 = arith.constant 0 : i32
    %c0_i32_1 = arith.constant 0 : i32
    return %c0_i32, %c0_i32_0 : i32, i32
  }
  func.func @transform_16(%arg0: i32) -> (i32, i32) {
    %c0_i32 = arith.constant 0 : i32
    %c0_i32_0 = arith.constant 0 : i32
    %c0_i32_1 = arith.constant 0 : i32
    return %c0_i32, %c0_i32_0 : i32, i32
  }
  func.func @transform_17(%arg0: i32) -> (i32, i32) {
    %c0_i32 = arith.constant 0 : i32
    %c0_i32_0 = arith.constant 0 : i32
    return %arg0, %c0_i32 : i32, i32
  }
}

</mosaic_0001>

<bundles_post_ra>
// kernel: vae_forward.1
= control target key start
LH: loop header
LB: loop body
LE: loop exit
PB: predicated region body
PF: predicated region fallthrough
CT: control target
= control target key end

     0   :  { %s6687_s24 = smov 0   ;;  %s8315_s0 = inlined_call_operand.vmem [shape: f32[512,784], index: 0, kind: input, shape index: {}]   ;;  %s8316_s1 = inlined_call_operand.vmem [shape: bf16[784,256], index: 1, kind: input, shape index: {}]   ;;  %s8317_s2 = inlined_call_operand.vmem [shape: f32[1,256], index: 2, kind: input, shape index: {}]   ;;  %s8318_s3 = inlined_call_operand.vmem [shape: bf16[256,128], index: 3, kind: input, shape index: {}]   ;;  %s8319_s4 = inlined_call_operand.vmem [shape: f32[1,128], index: 4, kind: input, shape index: {}]   ;;  %s8320_s5 = inlined_call_operand.vmem [shape: bf16[128,128], index: 5, kind: input, shape index: {}]   ;;  %s8321_s6 = inlined_call_operand.vmem [shape: f32[1,128], index: 6, kind: input, shape index: {}]   ;;  %s8322_s7 = inlined_call_operand.vmem [shape: bf16[128,128], index: 7, kind: input, shape index: {}]   ;;  %s8323_s8 = inlined_call_operand.vmem [shape: f32[1,128], index: 8, kind: input, shape index: {}]   ;;  %s8324_s9 = inlined_call_operand.vmem [shape: bf16[128,128], index: 9, kind: input, shape index: {}]   ;;  %s8325_s10 = inlined_call_operand.vmem [shape: f32[1,128], index: 10, kind: input, shape index: {}]   ;;  %s8326_s11 = inlined_call_operand.vmem [shape: bf16[128,128], index: 11, kind: input, shape index: {}]   ;;  %s8327_s12 = inlined_call_operand.vmem [shape: f32[1,128], index: 12, kind: input, shape index: {}]   ;;  %s8328_s13 = inlined_call_operand.vmem [shape: bf16[128,256], index: 13, kind: input, shape index: {}]   ;;  %s8329_s14 = inlined_call_operand.vmem [shape: f32[1,256], index: 14, kind: input, shape index: {}]   ;;  %s8330_s15 = inlined_call_operand.vmem [shape: bf16[256,784], index: 15, kind: input, shape index: {}]   ;;  %s8331_s16 = inlined_call_operand.vmem [shape: f32[1,784], index: 16, kind: input, shape index: {}]   ;;  %s8332_s17 = inlined_call_operand.vmem [shape: bf16[512,784], index: 17, kind: output, shape index: {}]  }
   0x1   :  { %8343 = sst [smem:[#allocation14_spill]] %s8315_s0 }
   0x2   :  { %8344 = sst [smem:[#allocation15_spill]] %s8316_s1 }
   0x3 LB: > { %8345 = sst [smem:[#allocation2_spill]] %s6594_s24  ;;  %s5196_s25 = sadd.s32 4294967295, %s6594_s24   ;;  %s6594_s24 = sphi %s6687_s24, %s27_s24  }
   0x4   : > { %p5200_p0 = scmp.ge.s32.totalorder %s6594_s24, 1  ;;  %p489_p1 = scmp.lt.s32.totalorder %s6594_s24, 5 }
   0x6   : > { %p490_p2 = pnand %p5200_p0, %p489_p1 }
   0x8   : > { %493 = sbr.rel (%p490_p2) target bundleno = 1963 (0x7ab), region = 88 }
   0xd   : > { %s8346_s28 = sld [smem:[#allocation15_spill]]  ;;  %s5201_s22 = sshll.u32 %s5196_s25, 4  ;;  %vm1326_vm0 = vcmask 130048  }
   0xe   : > { %p544_p3 = scmp.lt.s32.totalorder %s5201_s22, 63  ;;  %s8347_s20 = sld [smem:[#allocation14_spill]] }
  0x10   : > { %s8373_s22 = smov (!%p544_p3, %s5201_s22), 63 }
  0x11   : > { %s5974_s25 = smul.u32 56, %s8373_s22 }
  0x12   : > { %s5975_s29 = smul.u32 28, %s8373_s22 }
  0x13   : > { %v5985_v0 = vld [vmem:[%s8346_s28 + $0x74] ss:$8 sps:$4 sm:$0xff]   ;;  %v5989_v2 = vld [vmem:[%s8346_s28 + $0x70] ss:$8 sps:$4 sm:$0xff]   ;;  %v5991_v4 = vld [vmem:[%s8346_s28 + $0x64] ss:$8 sps:$4 sm:$0xff]  }
  0x14   : > { %v5987_v1 = vld [vmem:[%s8346_s28 + $0x174] ss:$8 sps:$4 sm:$0xff]   ;;  %1351 = vmatprep.subr.bf16.mxu0 %v5985_v0  ;;  %v5990_v3 = vld [vmem:[%s8346_s28 + $0x170] ss:$8 sps:$4 sm:$0xff]   ;;  %v5993_v5 = vld [vmem:[%s8346_s28 + $0x164] ss:$8 sps:$4 sm:$0xff]   ;;  %s6835_s24 = scalar_lea.vmem %s8347_s20, %s5974_s25  ;;  %s8124_s0 = scalar_lea.vmem %s8332_s17, %s5975_s29 }
  0x15   : > { %1464 = vmatprep.subr.bf16.mxu1 %v5987_v1  ;;  %1352 = vmatpush1.bf16.msra.mxu0 %v5989_v2  ;;  %v5995_v6 = vld [vmem:[%s8346_s28 + $0x60] ss:$8 sps:$4 sm:$0xff]   ;;  %v5997_v8 = vld [vmem:[%s8346_s28 + $0x54] ss:$8 sps:$4 sm:$0xff]   ;;  %v6001_v10 = vld [vmem:[%s8346_s28 + $0x50] ss:$8 sps:$4 sm:$0xff]  }
  0x16   : > { %1465 = vmatpush1.bf16.msra.mxu1 %v5990_v3  ;;  %1353 = vmatprep.subr.bf16.mxu0 %v5991_v4  ;;  %v5996_v7 = vld [vmem:[%s8346_s28 + $0x160] ss:$8 sps:$4 sm:$0xff]   ;;  %v5999_v9 = vld [vmem:[%s8346_s28 + $0x154] ss:$8 sps:$4 sm:$0xff]   ;;  %v6002_v11 = vld [vmem:[%s8346_s28 + $0x150] ss:$8 sps:$4 sm:$0xff]  }
  0x17   : > { %1466 = vmatprep.subr.bf16.mxu1 %v5993_v5  ;;  %v6003_v12 = vld [vmem:[%s8346_s28 + $0x44] ss:$8 sps:$4 sm:$0xff]   ;;  %v6007_v14 = vld [vmem:[%s8346_s28 + $0x40] ss:$8 sps:$4 sm:$0xff]   ;;  %v6009_v16 = vld [vmem:[%s8346_s28 + $0x34] ss:$8 sps:$4 sm:$0xff]  }
  0x18   : > { %v6005_v13 = vld [vmem:[%s8346_s28 + $0x144] ss:$8 sps:$4 sm:$0xff]   ;;  %v6008_v15 = vld [vmem:[%s8346_s28 + $0x140] ss:$8 sps:$4 sm:$0xff]   ;;  %v6011_v17 = vld [vmem:[%s8346_s28 + $0x134] ss:$8 sps:$4 sm:$0xff]  }
  0x19   : > { %1354 = vmatpush1.bf16.msra.mxu0 %v5995_v6  ;;  %v6013_v18 = vld [vmem:[%s8346_s28 + $0x30] ss:$8 sps:$4 sm:$0xff]   ;;  %v6015_v20 = vld [vmem:[%s8346_s28 + $0x24] ss:$8 sps:$4 sm:$0xff]   ;;  %v6019_v22 = vld [vmem:[%s8346_s28 + $0x20] ss:$8 sps:$4 sm:$0xff]  }
  0x1a   : > { %1467 = vmatpush1.bf16.msra.mxu1 %v5996_v7  ;;  %1355 = vmatprep.subr.bf16.mxu0 %v5997_v8  ;;  %v6014_v19 = vld [vmem:[%s8346_s28 + $0x130] ss:$8 sps:$4 sm:$0xff]   ;;  %v6017_v21 = vld [vmem:[%s8346_s28 + $0x124] ss:$8 sps:$4 sm:$0xff]   ;;  %v6020_v23 = vld [vmem:[%s8346_s28 + $0x120] ss:$8 sps:$4 sm:$0xff]  }
  0x1b   : > { %1468 = vmatprep.subr.bf16.mxu1 %v5999_v9  ;;  %v6021_v24 = vld [vmem:[%s8346_s28 + $0x14] ss:$8 sps:$4 sm:$0xff]   ;;  %v6025_v26 = vld [vmem:[%s8346_s28 + $0x10] ss:$8 sps:$4 sm:$0xff]   ;;  %v6027_v28 = vld [vmem:[%s8346_s28 + $0x4] ss:$8 sps:$4 sm:$0xff]  }
  0x1c   : > { %v6023_v25 = vld [vmem:[%s8346_s28 + $0x114] ss:$8 sps:$4 sm:$0xff]   ;;  %v6026_v27 = vld [vmem:[%s8346_s28 + $0x110] ss:$8 sps:$4 sm:$0xff]   ;;  %v6029_v29 = vld [vmem:[%s8346_s28 + $0x104] ss:$8 sps:$4 sm:$0xff]  }
  0x1d   : > { %1356 = vmatpush1.bf16.msra.mxu0 %v6001_v10  ;;  %v6031_v30 = vld [vmem:[%s8346_s28] ss:$8 sps:$4 sm:$0xff]   ;;  %v6033_v32 = vld [vmem:[%s8346_s28 + $0xf4] ss:$8 sps:$4 sm:$0xff]   ;;  %v6037_v34 = vld [vmem:[%s8346_s28 + $0xf0] ss:$8 sps:$4 sm:$0xff]  }
  0x1e   : > { %1469 = vmatpush1.bf16.msra.mxu1 %v6002_v11  ;;  %1357 = vmatprep.subr.bf16.mxu0 %v6003_v12  ;;  %v6032_v31 = vld [vmem:[%s8346_s28 + $0x100] ss:$8 sps:$4 sm:$0xff]   ;;  %v6035_v33 = vld [vmem:[%s8346_s28 + $0x1f4] ss:$8 sps:$4 sm:$0xff]   ;;  %v6038_v35 = vld [vmem:[%s8346_s28 + $0x1f0] ss:$8 sps:$4 sm:$0xff]  }
  0x1f   : > { %1470 = vmatprep.subr.bf16.mxu1 %v6005_v13  ;;  %v6039_v36 = vld [vmem:[%s8346_s28 + $0xe4] ss:$8 sps:$4 sm:$0xff]   ;;  %v6043_v38 = vld [vmem:[%s8346_s28 + $0xe0] ss:$8 sps:$4 sm:$0xff]   ;;  %v6045_v40 = vld [vmem:[%s8346_s28 + $0xd4] ss:$8 sps:$4 sm:$0xff]  }
  0x20   : > { %v6041_v37 = vld [vmem:[%s8346_s28 + $0x1e4] ss:$8 sps:$4 sm:$0xff]   ;;  %v6044_v39 = vld [vmem:[%s8346_s28 + $0x1e0] ss:$8 sps:$4 sm:$0xff]   ;;  %v6047_v41 = vld [vmem:[%s8346_s28 + $0x1d4] ss:$8 sps:$4 sm:$0xff]  }
  0x21   : > { %1358 = vmatpush1.bf16.msra.mxu0 %v6007_v14  ;;  %v6049_v42 = vld [vmem:[%s8346_s28 + $0xd0] ss:$8 sps:$4 sm:$0xff]   ;;  %v6051_v44 = vld [vmem:[%s8346_s28 + $0xc4] ss:$8 sps:$4 sm:$0xff]   ;;  %v6055_v50 = vld [vmem:[%s8346_s28 + $0xc0] ss:$8 sps:$4 sm:$0xff]  }
  0x22   : > { %1471 = vmatpush1.bf16.msra.mxu1 %v6008_v15  ;;  %1359 = vmatprep.subr.bf16.mxu0 %v6009_v16  ;;  %v6050_v43 = vld [vmem:[%s8346_s28 + $0x1d0] ss:$8 sps:$4 sm:$0xff]   ;;  %v6053_v45 = vld [vmem:[%s8346_s28 + $0x1c4] ss:$8 sps:$4 sm:$0xff]   ;;  %v6056_v51 = vld [vmem:[%s8346_s28 + $0x1c0] ss:$8 sps:$4 sm:$0xff]  }
  0x23   : > { %1472 = vmatprep.subr.bf16.mxu1 %v6011_v17  ;;  %v559_v46 = vld [vmem:[%s6835_s24 + $0x8] sm:$0xff]  ;;  %v566_v47 = vld [vmem:[%s6835_s24 + $0x40] sm:$0xff]  ;;  %v561_v48 = vld [vmem:[%s6835_s24 + $0x18] sm:$0xff] }
  0x24   : > { %v568_v49 = vld [vmem:[%s6835_s24 + $0x50] sm:$0xff]  ;;  %v671_v53 = vpack.c.bf16 %v566_v47, %v559_v46  ;;  %v6063_v58 = vld [vmem:[%s8346_s28 + $0xa4] ss:$8 sps:$4 sm:$0xff]   ;;  %v6067_v60 = vld [vmem:[%s8346_s28 + $0xa0] ss:$8 sps:$4 sm:$0xff]  }
  0x25   : > { %1360 = vmatpush1.bf16.msra.mxu0 %v6013_v18  ;;  %v6057_v52 = vld [vmem:[%s8346_s28 + $0xb4] ss:$8 sps:$4 sm:$0xff]   ;;  %v673_v54 = vpack.c.bf16 %v568_v49, %v561_v48  ;;  %v6061_v56 = vld [vmem:[%s8346_s28 + $0xb0] ss:$8 sps:$4 sm:$0xff]   ;;  %v6065_v59 = vld [vmem:[%s8346_s28 + $0x1a4] ss:$8 sps:$4 sm:$0xff]  }
  0x26   : > { %1473 = vmatpush1.bf16.msra.mxu1 %v6014_v19  ;;  %1361 = vmatprep.subr.bf16.mxu0 %v6015_v20  ;;  %v6059_v55 = vld [vmem:[%s8346_s28 + $0x1b4] ss:$8 sps:$4 sm:$0xff]   ;;  %v6062_v57 = vld [vmem:[%s8346_s28 + $0x1b0] ss:$8 sps:$4 sm:$0xff]   ;;  %v6068_v61 = vld [vmem:[%s8346_s28 + $0x1a0] ss:$8 sps:$4 sm:$0xff]  }
  0x27   : > { %1474 = vmatprep.subr.bf16.mxu1 %v6017_v21  ;;  %1383 = vmatprep.mubr.bf16.mxu0 %v671_v53  ;;  %v6069_v62 = vld [vmem:[%s8346_s28 + $0x94] ss:$8 sps:$4 sm:$0xff]   ;;  %v6073_v0 = vld [vmem:[%s8346_s28 + $0x90] ss:$8 sps:$4 sm:$0xff]   ;;  %v6075_v2 = vld [vmem:[%s8346_s28 + $0x84] ss:$8 sps:$4 sm:$0xff]  }
  0x28   : > { %1496 = vmatprep.mubr.bf16.mxu1 %v673_v54  ;;  %v6071_v63 = vld [vmem:[%s8346_s28 + $0x194] ss:$8 sps:$4 sm:$0xff]   ;;  %v6074_v1 = vld [vmem:[%s8346_s28 + $0x190] ss:$8 sps:$4 sm:$0xff]   ;;  %v6077_v3 = vld [vmem:[%s8346_s28 + $0x184] ss:$8 sps:$4 sm:$0xff]  }
  0x29   : > { %1362 = vmatpush1.bf16.msra.mxu0 %v6019_v22  ;;  %v6079_v4 = vld [vmem:[%s8346_s28 + $0x80] ss:$8 sps:$4 sm:$0xff]   ;;  %v565_v7 = vld [vmem:[%s6835_s24 + $0x38] sm:$0xff]  ;;  %v560_v8 = vld [vmem:[%s6835_s24 + $0x10] sm:$0xff] }
  0x2a   : > { %1475 = vmatpush1.bf16.msra.mxu1 %v6020_v23  ;;  %1363 = vmatprep.subr.bf16.mxu0 %v6021_v24  ;;  %v6080_v5 = vld [vmem:[%s8346_s28 + $0x180] ss:$8 sps:$4 sm:$0xff]   ;;  %v6083_v10 = vld [vmem:[%s8346_s28 + $0x274] ss:$8 sps:$4 sm:$0xff]   ;;  %v6081_v17 = vld [vmem:[%s8346_s28 + $0x270] ss:$8 sps:$4 sm:$0xff]  }
  0x2b   : > { %1476 = vmatprep.subr.bf16.mxu1 %v6023_v25  ;;  %v558_v6 = vld [vmem:[%s6835_s24] sm:$0xff]  ;;  %v567_v9 = vld [vmem:[%s6835_s24 + $0x48] sm:$0xff]  ;;  %v573_v11 = vld [vmem:[%s6835_s24 + $0x78] sm:$0xff] }
  0x2c   : > { %v580_v12 = vld [vmem:[%s6835_s24 + $0xb0] sm:$0xff]  ;;  %v670_v13 = vpack.c.bf16 %v565_v7, %v558_v6  ;;  %v672_v14 = vpack.c.bf16 %v567_v9, %v560_v8  ;;  %v575_v15 = vld [vmem:[%s6835_s24 + $0x88] sm:$0xff]  ;;  %v582_v16 = vld [vmem:[%s6835_s24 + $0xc0] sm:$0xff] }
  0x2d   : > { %1364 = vmatpush1.bf16.msra.mxu0 %v6025_v26  ;;  %v6086_v18 = vld [vmem:[%s8346_s28 + $0x264] ss:$8 sps:$4 sm:$0xff]   ;;  %v6084_v19 = vld [vmem:[%s8346_s28 + $0x260] ss:$8 sps:$4 sm:$0xff]   ;;  %v678_v20 = vpack.c.bf16 %v580_v12, %v573_v11  ;;  %v680_v21 = vpack.c.bf16 %v582_v16, %v575_v15  ;;  %v572_v22 = vld [vmem:[%s6835_s24 + $0x70] sm:$0xff] }
  0x2e   : > { %1477 = vmatpush1.bf16.msra.mxu1 %v6026_v27  ;;  %1365 = vmatprep.subr.bf16.mxu0 %v6027_v28  ;;  %v579_v23 = vld [vmem:[%s6835_s24 + $0xa8] sm:$0xff]  ;;  %v574_v24 = vld [vmem:[%s6835_s24 + $0x80] sm:$0xff]  ;;  %v581_v25 = vld [vmem:[%s6835_s24 + $0xb8] sm:$0xff] }
  0x2f   : > { %1478 = vmatprep.subr.bf16.mxu1 %v6029_v29  ;;  %v6089_v26 = vld [vmem:[%s8346_s28 + $0x254] ss:$8 sps:$4 sm:$0xff]   ;;  %v587_v27 = vld [vmem:[%s6835_s24 + $0xe8] sm:$0xff]  ;;  %v677_v28 = vpack.c.bf16 %v579_v23, %v572_v22  ;;  %v679_v29 = vpack.c.bf16 %v581_v25, %v574_v24  ;;  %v610_v48 = vld [vmem:[%s6835_s24 + $0x1a0] sm:$0xff] }
  0x30   : > { %v603_v47 = vld [vmem:[%s6835_s24 + $0x168] sm:$0xff]  ;;  %v6093_v49 = vld [vmem:[%s8346_s28 + $0x230] ss:$8 sps:$4 sm:$0xff]   ;;  %v614_v6 = vld [vmem:[%s6835_s24 + $0x1c0] sm:$0xff] }
  0x31   : > { %1366 = vmatpush1.bf16.msra.mxu0 %v6031_v30  ;;  %v594_v30 = vld [vmem:[%s6835_s24 + $0x120] sm:$0xff]  ;;  %v694_v53 = vpack.c.bf16 %v610_v48, %v603_v47  ;;  %v600_v54 = vld [vmem:[%s6835_s24 + $0x150] sm:$0xff]  ;;  %v621_v7 = vld [vmem:[%s6835_s24 + $0x1f8] sm:$0xff] }
  0x32   : > { %1479 = vmatpush1.bf16.msra.mxu1 %v6032_v31  ;;  %1367 = vmatprep.subr.bf16.mxu0 %v6033_v32  ;;  %v589_v31 = vld [vmem:[%s6835_s24 + $0xf8] sm:$0xff]  ;;  %v596_v32 = vld [vmem:[%s6835_s24 + $0x130] sm:$0xff]  ;;  %v623_v9 = vld [vmem:[%s6835_s24 + $0x208] sm:$0xff]  ;;  %v698_v12 = vpack.c.bf16 %v621_v7, %v614_v6 }
  0x33   : > { %1480 = vmatprep.subr.bf16.mxu1 %v6035_v33  ;;  %v6087_v33 = vld [vmem:[%s8346_s28 + $0x250] ss:$8 sps:$4 sm:$0xff]   ;;  %v631_v15 = vld [vmem:[%s6835_s24 + $0x248] sm:$0xff]  ;;  %v638_v16 = vld [vmem:[%s6835_s24 + $0x280] sm:$0xff] }
  0x34   : > { %v616_v8 = vld [vmem:[%s6835_s24 + $0x1d0] sm:$0xff]  ;;  %v629_v11 = vld [vmem:[%s6835_s24 + $0x238] sm:$0xff]  ;;  %v635_v23 = vld [vmem:[%s6835_s24 + $0x268] sm:$0xff] }
  0x35   : > { %1368 = vmatpush2.bf16.msra.mxu0 %v6037_v34  ;;  %v6092_v34 = vld [vmem:[%s8346_s28 + $0x244] ss:$8 sps:$4 sm:$0xff]   ;;  %v628_v22 = vld [vmem:[%s6835_s24 + $0x230] sm:$0xff]  ;;  %v637_v25 = vld [vmem:[%s6835_s24 + $0x278] sm:$0xff] }
  0x36   : > { %1481 = vmatpush2.bf16.msra.mxu1 %v6038_v35  ;;  %1369 = vmatprep.subr.bf16.mxu0 %v6039_v36  ;;  %v685_v35 = vpack.c.bf16 %v594_v30, %v587_v27  ;;  %v687_v36 = vpack.c.bf16 %v596_v32, %v589_v31  ;;  %v630_v24 = vld [vmem:[%s6835_s24 + $0x240] sm:$0xff]  ;;  %v643_v27 = vld [vmem:[%s6835_s24 + $0x2a8] sm:$0xff]  ;;  %v645_v30 = vld [vmem:[%s6835_s24 + $0x2b8] sm:$0xff]  ;;  %v705_v32 = vpack.c.bf16 %v635_v23, %v628_v22 }
  0x37   : > { %1482 = vmatprep.subr.bf16.mxu1 %v6041_v37  ;;  %v6090_v37 = vld [vmem:[%s8346_s28 + $0x240] ss:$8 sps:$4 sm:$0xff]   ;;  %v652_v31 = vld [vmem:[%s6835_s24 + $0x2f0] sm:$0xff]  ;;  %v569_v7 = vld [vmem:[%s6835_s24 + $0x58] sm:$0xff] }
  0x38   : > { %v6117_v47 = vld [vmem:[%s8346_s28 + $0x2b0] ss:$8 sps:$4 sm:$0xff]   ;;  %v562_v6 = vld [vmem:[%s6835_s24 + $0x20] sm:$0xff]  ;;  %v667_v23 = vld [vmem:[%s6835_s24 + $0x368] sm:$0xff] }
  0x39   : > { %1370 = vmatpush2.bf16.msra.mxu0 %v6043_v38  ;;  %v586_v38 = vld [vmem:[%s6835_s24 + $0xe0] sm:$0xff]  ;;  %v660_v22 = vld [vmem:[%s6835_s24 + $0x330] sm:$0xff] }
  0x3a   : > { %1483 = vmatpush2.bf16.msra.mxu1 %v6044_v39  ;;  %1371 = vmatprep.subr.bf16.mxu0 %v6045_v40  ;;  %v593_v39 = vld [vmem:[%s6835_s24 + $0x118] sm:$0xff]  ;;  %v588_v40 = vld [vmem:[%s6835_s24 + $0xf0] sm:$0xff] }
  0x3b   : > { %1484 = vmatprep.subr.bf16.mxu1 %v6047_v41  ;;  %v595_v41 = vld [vmem:[%s6835_s24 + $0x128] sm:$0xff] }
  0x3c   : > { %v686_v46 = vpack.c.bf16 %v595_v41, %v588_v40  ;;  %v644_v40 = vld [vmem:[%s6835_s24 + $0x2b0] sm:$0xff]  ;;  %v651_v41 = vld [vmem:[%s6835_s24 + $0x2e8] sm:$0xff] }
  0x3d   : > { %1372 = vmatpush2.bf16.msra.mxu0 %v6049_v42  ;;  %v6095_v42 = vld [vmem:[%s8346_s28 + $0x234] ss:$8 sps:$4 sm:$0xff]  }
  0x3e   : > { %1485 = vmatpush2.bf16.msra.mxu1 %v6050_v43  ;;  %1373 = vmatprep.subr.bf16.mxu0 %v6051_v44  ;;  %v601_v43 = vld [vmem:[%s6835_s24 + $0x158] sm:$0xff]  ;;  %v608_v44 = vld [vmem:[%s6835_s24 + $0x190] sm:$0xff] }
  0x3f   : > { %1486 = vmatprep.subr.bf16.mxu1 %v6053_v45  ;;  %v684_v45 = vpack.c.bf16 %v593_v39, %v586_v38  ;;  %v642_v38 = vld [vmem:[%s6835_s24 + $0x2a0] sm:$0xff]  ;;  %v649_v39 = vld [vmem:[%s6835_s24 + $0x2d8] sm:$0xff] }
  0x40   : > { %v712_v48 = vpack.c.bf16 %v649_v39, %v642_v38  ;;  %v604_v39 = vld [vmem:[%s6835_s24 + $0x170] sm:$0xff] }
  0x41   : > { %1374 = vmatpush2.bf16.msra.mxu0 %v6055_v50  ;;  %v6098_v50 = vld [vmem:[%s8346_s28 + $0x224] ss:$8 sps:$4 sm:$0xff]  }
  0x42   : > { %1487 = vmatpush2.bf16.msra.mxu1 %v6056_v51  ;;  %1375 = vmatprep.subr.bf16.mxu0 %v6057_v52  ;;  %v6096_v51 = vld [vmem:[%s8346_s28 + $0x220] ss:$8 sps:$4 sm:$0xff]   ;;  %v692_v52 = vpack.c.bf16 %v608_v44, %v601_v43  ;;  %v657_v43 = vld [vmem:[%s6835_s24 + $0x318] sm:$0xff]  ;;  %v664_v44 = vld [vmem:[%s6835_s24 + $0x350] sm:$0xff] }
  0x43   : > { %1488 = vmatprep.subr.bf16.mxu1 %v6059_v55  ;;  %v607_v55 = vld [vmem:[%s6835_s24 + $0x188] sm:$0xff] }
  0x45   : > { %1376 = vmatpush2.bf16.msra.mxu0 %v6061_v56  ;;  %v602_v56 = vld [vmem:[%s6835_s24 + $0x160] sm:$0xff] }
  0x46   : > { %1489 = vmatpush2.bf16.msra.mxu1 %v6062_v57  ;;  %1377 = vmatprep.subr.bf16.mxu0 %v6063_v58  ;;  %v609_v57 = vld [vmem:[%s6835_s24 + $0x198] sm:$0xff] }
  0x47   : > { %1490 = vmatprep.subr.bf16.mxu1 %v6065_v59  ;;  %v6101_v58 = vld [vmem:[%s8346_s28 + $0x214] ss:$8 sps:$4 sm:$0xff]   ;;  %v615_v59 = vld [vmem:[%s6835_s24 + $0x1c8] sm:$0xff] }
  0x49   : > { %1378 = vmatpush2.bf16.msra.mxu0 %v6067_v60  ;;  %v691_v60 = vpack.c.bf16 %v607_v55, %v600_v54  ;;  %v656_v54 = vld [vmem:[%s6835_s24 + $0x310] sm:$0xff]  ;;  %v663_v55 = vld [vmem:[%s6835_s24 + $0x348] sm:$0xff] }
  0x4a   : > { %1491 = vmatpush2.bf16.msra.mxu1 %v6068_v61  ;;  %1379 = vmatprep.subr.bf16.mxu0 %v6069_v62  ;;  %v693_v61 = vpack.c.bf16 %v609_v57, %v602_v56  ;;  %v622_v62 = vld [vmem:[%s6835_s24 + $0x200] sm:$0xff]  ;;  %v665_v57 = vld [vmem:[%s6835_s24 + $0x358] sm:$0xff] }
  0x4b   : > { %1492 = vmatprep.subr.bf16.mxu1 %v6071_v63  ;;  %v617_v63 = vld [vmem:[%s6835_s24 + $0x1d8] sm:$0xff]  ;;  %v658_v56 = vld [vmem:[%s6835_s24 + $0x320] sm:$0xff] }
  0x4d   : > { %1380 = vmatpush2.bf16.msra.mxu0 %v6073_v0  ;;  %v624_v0 = vld [vmem:[%s6835_s24 + $0x210] sm:$0xff] }
  0x4e   : > { %1493 = vmatpush2.bf16.msra.mxu1 %v6074_v1  ;;  %1381 = vmatprep.subr.bf16.mxu0 %v6075_v2  ;;  %v6099_v1 = vld [vmem:[%s8346_s28 + $0x210] ss:$8 sps:$4 sm:$0xff]   ;;  %v6104_v2 = vld [vmem:[%s8346_s28 + $0x204] ss:$8 sps:$4 sm:$0xff]  }
  0x4f   : > { %1494 = vmatprep.subr.bf16.mxu1 %v6077_v3  ;;  %v699_v3 = vpack.c.bf16 %v622_v62, %v615_v59  ;;  %v563_v59 = vld [vmem:[%s6835_s24 + $0x28] sm:$0xff]  ;;  %v654_v62 = vld [vmem:[%s6835_s24 + $0x300] sm:$0xff] }
  0x51   : > { %1382 = vmatpush2.bf16.msra.mxu0 %v6079_v4  ;;  %v701_v4 = vpack.c.bf16 %v624_v0, %v617_v63  ;;  %v6123_v63 = vld [vmem:[%s8346_s28 + $0x290] ss:$8 sps:$4 sm:$0xff]   ;;  %v719_v0 = vpack.c.bf16 %v663_v55, %v656_v54 }
  0x52   : > { %1495 = vmatpush2.bf16.msra.mxu1 %v6080_v5  ;;  %1577 = vmatprep.subr.bf16.mxu0 %v6083_v10  ;;  %v6102_v5 = vld [vmem:[%s8346_s28 + $0x200] ss:$8 sps:$4 sm:$0xff]  }
  0x53   : > { %5942 = vmatprep.subr.bf16.mxu1 %v6083_v10  ;;  %v6107_v10 = vld [vmem:[%s8346_s28 + $0x2f4] ss:$8 sps:$4 sm:$0xff]  }
  0x54   : > { %1384 = vmatmul.mubr.bf16.vlgmr.msra.gmra.mxu0 %v670_v13  ;;  %v700_v13 = vpack.c.bf16 %v623_v9, %v616_v8  ;;  %v646_v8 = vld [vmem:[%s6835_s24 + $0x2c0] sm:$0xff]  ;;  %v653_v9 = vld [vmem:[%s6835_s24 + $0x2f8] sm:$0xff] }
  0x55   : > { %1497 = vmatmul.mubr.bf16.vlgmr.msra.gmra.mxu1 %v672_v14  ;;  %1578 = vmatpush1.bf16.msra.mxu0 %v6081_v17  ;;  %v636_v14 = vld [vmem:[%s6835_s24 + $0x270] sm:$0xff] }
  0x56   : > { %5958 = vmatpush1.bf16.msra.mxu1 %v6081_v17  ;;  %1579 = vmatprep.subr.bf16.mxu0 %v6086_v18  ;;  %v6105_v17 = vld [vmem:[%s8346_s28 + $0x2f0] ss:$8 sps:$4 sm:$0xff]  }
  0x57   : > { %5943 = vmatprep.subr.bf16.mxu1 %v6086_v18  ;;  %1393 = vmatprep.mubr.bf16.mxu0 %v678_v20  ;;  %v6110_v18 = vld [vmem:[%s8346_s28 + $0x2e4] ss:$8 sps:$4 sm:$0xff]   ;;  %v708_v20 = vpack.c.bf16 %v638_v16, %v631_v15  ;;  %v6129_v15 = vld [vmem:[%s8346_s28 + $0x300] ss:$8 sps:$4 sm:$0xff]   ;;  %v674_v16 = vpack.c.bf16 %v569_v7, %v562_v6  ;;  %v6134_v7 = vld [vmem:[%s8318_s3 + $0x70] sm:$0xff]  }
  0x58   : > { %1506 = vmatprep.mubr.bf16.mxu1 %v680_v21  ;;  %v6108_v21 = vld [vmem:[%s8346_s28 + $0x2e0] ss:$8 sps:$4 sm:$0xff]  }
  0x59   : > { %1580 = vmatpush1.bf16.msra.mxu0 %v6084_v19 }
  0x5a   : > { %5959 = vmatpush1.bf16.msra.mxu1 %v6084_v19  ;;  %1581 = vmatprep.subr.bf16.mxu0 %v6089_v26  ;;  %v706_v19 = vpack.c.bf16 %v636_v14, %v629_v11  ;;  %v577_v11 = vld [vmem:[%s6835_s24 + $0x98] sm:$0xff]  ;;  %v668_v14 = vld [vmem:[%s6835_s24 + $0x370] sm:$0xff] }
  0x5b   : > { %5944 = vmatprep.subr.bf16.mxu1 %v6089_v26  ;;  %v6113_v26 = vld [vmem:[%s8346_s28 + $0x2d4] ss:$8 sps:$4 sm:$0xff]  }
  0x5c   : > { %1394 = vmatmul.mubr.bf16.gmra.mxu0 %v677_v28  ;;  %v6111_v28 = vld [vmem:[%s8346_s28 + $0x2d0] ss:$8 sps:$4 sm:$0xff]  }
  0x5d   : > { %1507 = vmatmul.mubr.bf16.gmra.mxu1 %v679_v29  ;;  %1582 = vmatpush1.bf16.msra.mxu0 %v6087_v33  ;;  %v650_v29 = vld [vmem:[%s6835_s24 + $0x2e0] sm:$0xff] }
  0x5e   : > { %5960 = vmatpush1.bf16.msra.mxu1 %v6087_v33  ;;  %1583 = vmatprep.subr.bf16.mxu0 %v6092_v34  ;;  %v707_v33 = vpack.c.bf16 %v637_v25, %v630_v24  ;;  %v591_v24 = vld [vmem:[%s6835_s24 + $0x108] sm:$0xff]  ;;  %v598_v25 = vld [vmem:[%s6835_s24 + $0x140] sm:$0xff] }
  0x5f   : > { %5945 = vmatprep.subr.bf16.mxu1 %v6092_v34  ;;  %1403 = vmatprep.mubr.bf16.mxu0 %v685_v35  ;;  %v6116_v34 = vld [vmem:[%s8346_s28 + $0x2c4] ss:$8 sps:$4 sm:$0xff]   ;;  %v6114_v35 = vld [vmem:[%s8346_s28 + $0x2c0] ss:$8 sps:$4 sm:$0xff]  }
  0x60   : > { %1516 = vmatprep.mubr.bf16.mxu1 %v687_v36  ;;  %v713_v36 = vpack.c.bf16 %v650_v29, %v643_v27  ;;  %v723_v27 = vpack.c.bf16 %v667_v23, %v660_v22  ;;  %v590_v29 = vld [vmem:[%s6835_s24 + $0x100] sm:$0xff]  ;;  %v6143_v22 = vld [vmem:[%s8318_s3 + $0x10] sm:$0xff]   ;;  %v6144_v23 = vld [vmem:[%s8318_s3 + $0x48] sm:$0xff]  }
  0x61   : > { %1584 = vmatpush1.bf16.msra.mxu0 %v6090_v37 }
  0x62   : > { %5961 = vmatpush1.bf16.msra.mxu1 %v6090_v37  ;;  %1585 = vmatprep.subr.bf16.mxu0 %v6095_v42  ;;  %v715_v37 = vpack.c.bf16 %v652_v31, %v645_v30  ;;  %v597_v30 = vld [vmem:[%s6835_s24 + $0x138] sm:$0xff]  ;;  %v564_v31 = vld [vmem:[%s6835_s24 + $0x30] sm:$0xff] }
  0x63   : > { %5946 = vmatprep.subr.bf16.mxu1 %v6095_v42  ;;  %v6119_v42 = vld [vmem:[%s8346_s28 + $0x2b4] ss:$8 sps:$4 sm:$0xff]  }
  0x64   : > { %1404 = vmatmul.mubr.bf16.gmra.mxu0 %v684_v45  ;;  %v659_v45 = vld [vmem:[%s6835_s24 + $0x328] sm:$0xff] }
  0x65   : > { %1517 = vmatmul.mubr.bf16.gmra.mxu1 %v686_v46  ;;  %1586 = vmatpush1.bf16.msra.mxu0 %v6093_v49  ;;  %v666_v46 = vld [vmem:[%s6835_s24 + $0x360] sm:$0xff] }
  0x66   : > { %5962 = vmatpush1.bf16.msra.mxu1 %v6093_v49  ;;  %1587 = vmatprep.subr.bf16.mxu0 %v6098_v50  ;;  %v714_v49 = vpack.c.bf16 %v651_v41, %v644_v40  ;;  %v611_v40 = vld [vmem:[%s6835_s24 + $0x1a8] sm:$0xff]  ;;  %v578_v41 = vld [vmem:[%s6835_s24 + $0xa0] sm:$0xff] }
  0x67   : > { %5947 = vmatprep.subr.bf16.mxu1 %v6098_v50  ;;  %1413 = vmatprep.mubr.bf16.mxu0 %v692_v52  ;;  %v6122_v50 = vld [vmem:[%s8346_s28 + $0x2a4] ss:$8 sps:$4 sm:$0xff]   ;;  %v720_v52 = vpack.c.bf16 %v664_v44, %v657_v43 }
  0x68   : > { %1526 = vmatprep.mubr.bf16.mxu1 %v694_v53  ;;  %v722_v53 = vpack.c.bf16 %v666_v46, %v659_v45  ;;  %v619_v43 = vld [vmem:[%s6835_s24 + $0x1e8] sm:$0xff]  ;;  %v626_v44 = vld [vmem:[%s6835_s24 + $0x220] sm:$0xff]  ;;  %v695_v45 = vpack.c.bf16 %v611_v40, %v604_v39 }
  0x69   : > { %1588 = vmatpush1.bf16.msra.mxu0 %v6096_v51 }
  0x6a   : > { %5963 = vmatpush1.bf16.msra.mxu1 %v6096_v51  ;;  %1589 = vmatprep.subr.bf16.mxu0 %v6101_v58  ;;  %v6120_v51 = vld [vmem:[%s8346_s28 + $0x2a0] ss:$8 sps:$4 sm:$0xff]  }
  0x6b   : > { %5948 = vmatprep.subr.bf16.mxu1 %v6101_v58  ;;  %v6125_v58 = vld [vmem:[%s8346_s28 + $0x294] ss:$8 sps:$4 sm:$0xff]  }
  0x6c   : > { %1414 = vmatmul.mubr.bf16.gmra.mxu0 %v691_v60  ;;  %v570_v60 = vld [vmem:[%s6835_s24 + $0x60] sm:$0xff] }
  0x6d   : > { %1527 = vmatmul.mubr.bf16.gmra.mxu1 %v693_v61  ;;  %1590 = vmatpush1.bf16.msra.mxu0 %v6099_v1  ;;  %v647_v61 = vld [vmem:[%s6835_s24 + $0x2c8] sm:$0xff] }
  0x6e   : > { %5964 = vmatpush1.bf16.msra.mxu1 %v6099_v1  ;;  %1591 = vmatprep.subr.bf16.mxu0 %v6104_v2  ;;  %v721_v1 = vpack.c.bf16 %v665_v57, %v658_v56  ;;  %v632_v57 = vld [vmem:[%s6835_s24 + $0x250] sm:$0xff] }
  0x6f   : > { %5949 = vmatprep.subr.bf16.mxu1 %v6104_v2  ;;  %1423 = vmatprep.mubr.bf16.mxu0 %v699_v3  ;;  %v6128_v2 = vld [vmem:[%s8346_s28 + $0x284] ss:$8 sps:$4 sm:$0xff]   ;;  %v6126_v3 = vld [vmem:[%s8346_s28 + $0x280] ss:$8 sps:$4 sm:$0xff]  }
  0x70   : > { %1536 = vmatprep.mubr.bf16.mxu1 %v701_v4  ;;  %v675_v4 = vpack.c.bf16 %v570_v60, %v563_v59  ;;  %v606_v59 = vld [vmem:[%s6835_s24 + $0x180] sm:$0xff]  ;;  %v613_v60 = vld [vmem:[%s6835_s24 + $0x1b8] sm:$0xff] }
  0x71   : > { %1592 = vmatpush1.bf16.msra.mxu0 %v6102_v5 }
  0x72   : > { %5965 = vmatpush1.bf16.msra.mxu1 %v6102_v5  ;;  %1593 = vmatprep.subr.bf16.mxu0 %v6107_v10  ;;  %v717_v5 = vpack.c.bf16 %v654_v62, %v647_v61  ;;  %v697_v62 = vpack.c.bf16 %v613_v60, %v606_v59 }
  0x73   : > { %5950 = vmatprep.subr.bf16.mxu1 %v6107_v10  ;;  %v6131_v10 = vld [vmem:[%s8346_s28 + $0x304] ss:$8 sps:$4 sm:$0xff]  }
  0x74   : > { %1424 = vmatmul.mubr.bf16.gmra.mxu0 %v698_v12  ;;  %v584_v12 = vld [vmem:[%s6835_s24 + $0xd0] sm:$0xff] }
  0x75   : > { %1537 = vmatmul.mubr.bf16.gmra.mxu1 %v700_v13  ;;  %1594 = vmatpush2.bf16.msra.mxu0 %v6105_v17  ;;  %v661_v13 = vld [vmem:[%s6835_s24 + $0x338] sm:$0xff] }
  0x76   : > { %5966 = vmatpush2.bf16.msra.mxu1 %v6105_v17  ;;  %1595 = vmatprep.subr.bf16.mxu0 %v6110_v18  ;;  %v716_v17 = vpack.c.bf16 %v653_v9, %v646_v8  ;;  %v648_v8 = vld [vmem:[%s6835_s24 + $0x2d0] sm:$0xff]  ;;  %v655_v9 = vld [vmem:[%s6835_s24 + $0x308] sm:$0xff] }
  0x77   : > { %5951 = vmatprep.subr.bf16.mxu1 %v6110_v18  ;;  %1433 = vmatprep.mubr.bf16.mxu0 %v706_v19  ;;  %v682_v18 = vpack.c.bf16 %v584_v12, %v577_v11  ;;  %v724_v19 = vpack.c.bf16 %v668_v14, %v661_v13  ;;  %v718_v11 = vpack.c.bf16 %v655_v9, %v648_v8  ;;  %v6136_v12 = vld [vmem:[%s8318_s3 + $0x68] sm:$0xff]   ;;  %v662_v14 = vld [vmem:[%s6835_s24 + $0x340] sm:$0xff] }
  0x78   : > { %1546 = vmatprep.mubr.bf16.mxu1 %v708_v20  ;;  %v576_v20 = vld [vmem:[%s6835_s24 + $0x90] sm:$0xff]  ;;  %v6137_v13 = vld [vmem:[%s8318_s3 + $0x28] sm:$0xff]  }
  0x79   : > { %1596 = vmatpush2.bf16.msra.mxu0 %v6108_v21 }
  0x7a   : > { %5967 = vmatpush2.bf16.msra.mxu1 %v6108_v21  ;;  %1597 = vmatprep.subr.bf16.mxu0 %v6113_v26  ;;  %v583_v21 = vld [vmem:[%s6835_s24 + $0xc8] sm:$0xff] }
  0x7b   : > { %5952 = vmatprep.subr.bf16.mxu1 %v6113_v26  ;;  %v681_v26 = vpack.c.bf16 %v583_v21, %v576_v20  ;;  %v6141_v20 = vld [vmem:[%s8318_s3 + $0x18] sm:$0xff]   ;;  %v6142_v21 = vld [vmem:[%s8318_s3 + $0x50] sm:$0xff]  }
  0x7c   : > { %1434 = vmatmul.mubr.bf16.gmra.mxu0 %v705_v32  ;;  %v571_v32 = vld [vmem:[%s6835_s24 + $0x68] sm:$0xff] }
  0x7d   : > { %1547 = vmatmul.mubr.bf16.gmra.mxu1 %v707_v33  ;;  %1598 = vmatpush2.bf16.msra.mxu0 %v6111_v28  ;;  %v605_v33 = vld [vmem:[%s6835_s24 + $0x178] sm:$0xff] }
  0x7e   : > { %5968 = vmatpush2.bf16.msra.mxu1 %v6111_v28  ;;  %1599 = vmatprep.subr.bf16.mxu0 %v6116_v34  ;;  %v689_v28 = vpack.c.bf16 %v598_v25, %v591_v24  ;;  %v6145_v24 = vld [vmem:[%s8318_s3 + $0x8] sm:$0xff]   ;;  %v6146_v25 = vld [vmem:[%s8318_s3 + $0x40] sm:$0xff]  }
  0x7f   : > { %5953 = vmatprep.subr.bf16.mxu1 %v6116_v34  ;;  %1443 = vmatprep.mubr.bf16.mxu0 %v713_v36  ;;  %v612_v34 = vld [vmem:[%s6835_s24 + $0x1b0] sm:$0xff]  ;;  %v688_v36 = vpack.c.bf16 %v597_v30, %v590_v29  ;;  %v824_v30 = vld [vmem:[%s8317_s2] sm:$0x3] }
  0x80   : > { %1556 = vmatprep.mubr.bf16.mxu1 %v715_v37  ;;  %v676_v37 = vpack.c.bf16 %v571_v32, %v564_v31  ;;  %v696_v38 = vpack.c.bf16 %v612_v34, %v605_v33 }
  0x81   : > { %1600 = vmatpush2.bf16.msra.mxu0 %v6114_v35 }
  0x82   : > { %5969 = vmatpush2.bf16.msra.mxu1 %v6114_v35  ;;  %1601 = vmatprep.subr.bf16.mxu0 %v6119_v42  ;;  %v8335_v35 = vmov 0  }
  0x83   : > { %5954 = vmatprep.subr.bf16.mxu1 %v6119_v42  ;;  %v585_v42 = vld [vmem:[%s6835_s24 + $0xd8] sm:$0xff] }
  0x84   : > { %1444 = vmatmul.mubr.bf16.gmra.mxu0 %v712_v48  ;;  %v683_v46 = vpack.c.bf16 %v585_v42, %v578_v41  ;;  %v618_v48 = vld [vmem:[%s6835_s24 + $0x1e0] sm:$0xff] }
  0x85   : > { %1557 = vmatmul.mubr.bf16.gmra.mxu1 %v714_v49  ;;  %1602 = vmatpush2.bf16.msra.mxu0 %v6117_v47  ;;  %v625_v49 = vld [vmem:[%s6835_s24 + $0x218] sm:$0xff] }
  0x86   : > { %5970 = vmatpush2.bf16.msra.mxu1 %v6117_v47  ;;  %1603 = vmatprep.subr.bf16.mxu0 %v6122_v50  ;;  %v703_v47 = vpack.c.bf16 %v626_v44, %v619_v43  ;;  %v702_v54 = vpack.c.bf16 %v625_v49, %v618_v48 }
  0x87   : > { %5955 = vmatprep.subr.bf16.mxu1 %v6122_v50  ;;  %1453 = vmatprep.mubr.bf16.mxu0 %v720_v52  ;;  %v592_v50 = vld [vmem:[%s6835_s24 + $0x110] sm:$0xff]  ;;  %v633_v52 = vld [vmem:[%s6835_s24 + $0x258] sm:$0xff] }
  0x88   : > { %1566 = vmatprep.mubr.bf16.mxu1 %v722_v53  ;;  %v640_v53 = vld [vmem:[%s6835_s24 + $0x290] sm:$0xff] }
  0x89   : > { %1604 = vmatpush2.bf16.msra.mxu0 %v6120_v51  ;;  %v710_v56 = vpack.c.bf16 %v640_v53, %v633_v52 }
  0x8a   : > { %5971 = vmatpush2.bf16.msra.mxu1 %v6120_v51  ;;  %1605 = vmatprep.subr.bf16.mxu0 %v6125_v58  ;;  %v599_v51 = vld [vmem:[%s6835_s24 + $0x148] sm:$0xff] }
  0x8b   : > { %5956 = vmatprep.subr.bf16.mxu1 %v6125_v58  ;;  %v690_v55 = vpack.c.bf16 %v599_v51, %v592_v50  ;;  %v639_v58 = vld [vmem:[%s6835_s24 + $0x288] sm:$0xff] }
  0x8c   : > { %1454 = vmatmul.mubr.bf16.gmra.mxu0 %v719_v0  ;;  %v709_v61 = vpack.c.bf16 %v639_v58, %v632_v57  ;;  %v627_v0 = vld [vmem:[%s6835_s24 + $0x228] sm:$0xff] }
  0x8d   : > { %1567 = vmatmul.mubr.bf16.gmra.mxu1 %v721_v1  ;;  %1606 = vmatpush2.bf16.msra.mxu0 %v6123_v63 }
  0x8e   : > { %5972 = vmatpush2.bf16.msra.mxu1 %v6123_v63  ;;  %1607 = vmatprep.subr.bf16.mxu0 %v6128_v2  ;;  %v620_v63 = vld [vmem:[%s6835_s24 + $0x1f0] sm:$0xff] }
  0x8f   : > { %5957 = vmatprep.subr.bf16.mxu1 %v6128_v2  ;;  %1609 = vmatprep.mubr.bf16.mxu0 %v675_v4  ;;  %v704_v1 = vpack.c.bf16 %v627_v0, %v620_v63  ;;  %v634_v2 = vld [vmem:[%s6835_s24 + $0x260] sm:$0xff]  ;;  %v6132_v4 = vld [vmem:[%s8318_s3 + $0x78] sm:$0xff]  }
  0x90   : > { %1669 = vmatprep.mubr.bf16.mxu1 %v717_v5  ;;  %v6133_v5 = vld [vmem:[%s8318_s3 + $0x38] sm:$0xff]  }
  0x91   : > { %1608 = vmatpush2.bf16.msra.mxu0 %v6126_v3 }
  0x92   : > { %5973 = vmatpush2.bf16.msra.mxu1 %v6126_v3  ;;  %v641_v3 = vld [vmem:[%s6835_s24 + $0x298] sm:$0xff]  ;;  %5622 = vmatprep.subr.bf16.mxu0 %v6132_v4 }
  0x93   : > { %1704 = vmatprep.subr.bf16.mxu1 %v6131_v10  ;;  %v711_v6 = vpack.c.bf16 %v641_v3, %v634_v2  ;;  %v6135_v10 = vld [vmem:[%s8318_s3 + $0x30] sm:$0xff]  }
  0x94   : > { %1610 = vmatmul.mubr.bf16.vlgmr.msra.gmra.mxu0 %v674_v16  ;;  %v6138_v16 = vld [vmem:[%s8318_s3 + $0x60] sm:$0xff]  }
  0x95   : > { %1670 = vmatmul.mubr.bf16.vlgmr.msra.gmra.mxu1 %v716_v17  ;;  %1619 = vmatprep.mubr.bf16.mxu0 %v682_v18  ;;  %v6139_v17 = vld [vmem:[%s8318_s3 + $0x20] sm:$0xff]  }
  0x96   : > { %1705 = vmatpush1.bf16.msra.mxu1 %v6129_v15  ;;  %1679 = vmatprep.mubr.bf16.mxu1 %v724_v19  ;;  %v669_v15 = vld [vmem:[%s6835_s24 + $0x378] sm:$0xff] }
  0x97   : > { %5623 = vmatpush3.bf16.msra.mxu0 %v6133_v5  ;;  %v725_v18 = vpack.c.bf16 %v669_v15, %v662_v14  ;;  %v6140_v19 = vld [vmem:[%s8318_s3 + $0x58] sm:$0xff]  }
  0x98   : > { %5624 = vmatprep.subr.bf16.mxu0 %v6134_v7 }
  0x9b   : > { %5625 = vmatpush3.bf16.msra.mxu0 %v6135_v10 }
  0x9c   : > { %1620 = vmatmul.mubr.bf16.gmra.mxu0 %v681_v26  ;;  %5626 = vmatprep.subr.bf16.mxu0 %v6136_v12  ;;  %v6147_v26 = vld [vmem:[%s8318_s3] sm:$0xff]  }
  0x9d   : > { %1680 = vmatmul.mubr.bf16.gmra.mxu1 %v723_v27  ;;  %1629 = vmatprep.mubr.bf16.mxu0 %v689_v28  ;;  %v826_v27 = vlaneseq }
  0x9e   : > { %1722 = vmatprep.mubr.bf16.mxu1 %v8335_v35 }
  0x9f   : > { %5627 = vmatpush3.bf16.msra.mxu0 %v6137_v13  ;;  %v7175_v28 = vshrl.u32 %v826_v27, 7 }
  0xa0   : > { %5628 = vmatprep.subr.bf16.mxu0 %v6138_v16  ;;  %v6148_v16 = vld [vmem:[%s8320_s5 + $0x38] sm:$0xff]  }
  0xa1   : > { %8348 = vst [vmem:[#allocation3_spill] sm:$0xff] %v7175_v28  ;;  %v7178_v29 = vsub.s32 0, %v7175_v28  ;;  %v7184_v31 = vsub.s32 1, %v7175_v28  ;;  %5814 = vmatprep.subr.bf16.mxu1 %v6148_v16 }
  0xa3   : > { %5629 = vmatpush3.bf16.msra.mxu0 %v6139_v17  ;;  %8349 = vst [vmem:[#allocation4_spill] sm:$0xff] %v7178_v29  ;;  %8350 = vst [vmem:[#allocation5_spill] sm:$0xff] %v7184_v31  ;;  %v7187_v32 = vrot.slane %v824_v30, %v7178_v29  ;;  %v7190_v33 = vrot.slane %v824_v30, %v7184_v31  ;;  %v6149_v17 = vld [vmem:[%s8320_s5 + $0x30] sm:$0xff]  }
  0xa4   : > { %1630 = vmatmul.mubr.bf16.gmra.mxu0 %v688_v36  ;;  %5630 = vmatprep.subr.bf16.mxu0 %v6140_v19 }
  0xa5   : > { %5303 = vmatmul.mubr.msk.bf16.vlgmr.msra.gmra.mxu1 %vm1326_vm0, %v676_v37  ;;  %1639 = vmatprep.mubr.bf16.mxu0 %v696_v38 }
  0xa6   : > { %1732 = vmatprep.mubr.bf16.mxu1 %v8335_v35  ;;  %5815 = vmatpush3.bf16.msra.mxu1 %v6148_v16 }
  0xa7   : > { %5631 = vmatpush3.bf16.msra.mxu0 %v6141_v20  ;;  %5816 = vmatprep.subr.bf16.mxu1 %v6149_v17 }
  0xa8   : > { %5632 = vmatprep.subr.bf16.mxu0 %v6142_v21 }
  0xaa   : > { %5817 = vmatpush3.bf16.msra.mxu1 %v6149_v17 }
  0xab   : > { %5633 = vmatpush3.bf16.msra.mxu0 %v6143_v22 }
  0xac   : > { %1640 = vmatmul.mubr.bf16.gmra.mxu0 %v695_v45  ;;  %5634 = vmatprep.subr.bf16.mxu0 %v6144_v23 }
  0xad   : > { %5304 = vmatmul.mubr.msk.bf16.gmra.mxu1 %vm1326_vm0, %v683_v46  ;;  %1649 = vmatprep.mubr.bf16.mxu0 %v703_v47 }
  0xae   : > { %1742 = vmatprep.mubr.bf16.mxu1 %v8335_v35 }
  0xaf   : > { %5635 = vmatpush3.bf16.msra.mxu0 %v6145_v24 }
  0xb0   : > { %5636 = vmatprep.subr.bf16.mxu0 %v6146_v25 }
  0xb3   : > { %5637 = vmatpush3.bf16.msra.mxu0 %v6147_v26  ;;  %v6150_v26 = vld [vmem:[%s8320_s5 + $0x28] sm:$0xff]  }
  0xb4   : > { %1650 = vmatmul.mubr.bf16.gmra.mxu0 %v702_v54  ;;  %5818 = vmatprep.subr.bf16.mxu1 %v6150_v26 }
  0xb5   : > { %5305 = vmatmul.mubr.msk.bf16.gmra.mxu1 %vm1326_vm0, %v690_v55  ;;  %1659 = vmatprep.mubr.bf16.mxu0 %v710_v56 }
  0xb6   : > { %1752 = vmatprep.mubr.bf16.mxu1 %v8335_v35  ;;  %5819 = vmatpush3.bf16.msra.mxu1 %v6150_v26 }
  0xbc   : > { %1660 = vmatmul.mubr.bf16.gmra.mxu0 %v709_v61 }
  0xbd   : > { %5306 = vmatmul.mubr.msk.bf16.gmra.mxu1 %vm1326_vm0, %v697_v62 }
  0xbe   : > { %1762 = vmatprep.mubr.bf16.mxu1 %v8335_v35 }
  0xc5   : > { %5307 = vmatmul.mubr.msk.bf16.gmra.mxu1 %vm1326_vm0, %v704_v1 }
  0xc6   : > { %1772 = vmatprep.mubr.bf16.mxu1 %v8335_v35 }
  0xcd   : > { %5308 = vmatmul.mubr.msk.bf16.gmra.mxu1 %vm1326_vm0, %v711_v6 }
  0xce   : > { %1782 = vmatprep.mubr.bf16.mxu1 %v8335_v35 }
  0xd5   : > { %5309 = vmatmul.mubr.msk.bf16.gmra.mxu1 %vm1326_vm0, %v718_v11 }
  0xd6   : > { %1792 = vmatprep.mubr.bf16.mxu1 %v8335_v35 }
  0xdd   : > { %5310 = vmatmul.mubr.msk.bf16.gmra.mxu1 %vm1326_vm0, %v725_v18 }
 0x114   : > { %v1385_v34 = vpop.f32.mrf.mxu0 }
 0x115   : > { %v1498_v36 = vpop.f32.mrf.mxu1  ;;  %v1386_v37 = vadd.f32 %v1385_v34, %v7187_v32 }
 0x116   : > { %v1387_v38 = vpop.f32.mrf.mxu0 }
 0x117   : > { %v1500_v39 = vpop.f32.mrf.mxu1  ;;  %v7193_v40 = vadd.f32 %v1498_v36, %v1386_v37  ;;  %v1388_v41 = vadd.f32 %v1387_v38, %v7190_v33 }
 0x118   : > { %v1389_v42 = vpop.f32.mrf.mxu0 }
 0x119   : > { %v1502_v43 = vpop.f32.mrf.mxu1  ;;  %v7196_v44 = vadd.f32 %v1500_v39, %v1388_v41  ;;  %v1390_v45 = vadd.f32 %v1389_v42, %v7187_v32  ;;  %v6151_v39 = vld [vmem:[%s8320_s5 + $0x20] sm:$0xff]  }
 0x11a   : > { %v7199_v46 = vpop.f32.mrf.mxu0  ;;  %5820 = vmatprep.subr.bf16.mxu1 %v6151_v39 }
 0x11b   : > { %v7201_v47 = vpop.f32.mrf.mxu1  ;;  %v7203_v48 = vadd.f32 %v1502_v43, %v1390_v45  ;;  %5821 = vmatpush3.bf16.msra.mxu1 %v6151_v39 }
 0x11c   : > { %v1395_v49 = vpop.f32.mrf.mxu0 }
 0x11d   : > { %v1508_v50 = vpop.f32.mrf.mxu1  ;;  %v1396_v51 = vadd.f32 %v1395_v49, %v7187_v32 }
 0x11e   : > { %v1397_v52 = vpop.f32.mrf.mxu0 }
 0x11f   : > { %v1510_v53 = vpop.f32.mrf.mxu1  ;;  %v7206_v54 = vadd.f32 %v1508_v50, %v1396_v51  ;;  %v1398_v55 = vadd.f32 %v1397_v52, %v7190_v33 }
 0x120   : > { %v1399_v56 = vpop.f32.mrf.mxu0 }
 0x121   : > { %v1512_v57 = vpop.f32.mrf.mxu1  ;;  %v7209_v58 = vadd.f32 %v1510_v53, %v1398_v55  ;;  %v1400_v59 = vadd.f32 %v1399_v56, %v7187_v32  ;;  %v6152_v53 = vld [vmem:[%s8320_s5 + $0x18] sm:$0xff]  }
 0x122   : > { %v7212_v60 = vpop.f32.mrf.mxu0  ;;  %5822 = vmatprep.subr.bf16.mxu1 %v6152_v53 }
 0x123   : > { %v7214_v61 = vpop.f32.mrf.mxu1  ;;  %v7216_v62 = vadd.f32 %v1512_v57, %v1400_v59  ;;  %5823 = vmatpush3.bf16.msra.mxu1 %v6152_v53 }
 0x124   : > { %v1405_v63 = vpop.f32.mrf.mxu0 }
 0x125   : > { %v1518_v0 = vpop.f32.mrf.mxu1  ;;  %v1406_v1 = vadd.f32 %v1405_v63, %v7187_v32 }
 0x126   : > { %v1407_v2 = vpop.f32.mrf.mxu0 }
 0x127   : > { %v1520_v3 = vpop.f32.mrf.mxu1  ;;  %v7219_v4 = vadd.f32 %v1518_v0, %v1406_v1  ;;  %v1408_v5 = vadd.f32 %v1407_v2, %v7190_v33 }
 0x128   : > { %v1409_v6 = vpop.f32.mrf.mxu0 }
 0x129   : > { %v1522_v7 = vpop.f32.mrf.mxu1  ;;  %v7222_v8 = vadd.f32 %v1520_v3, %v1408_v5  ;;  %v1410_v9 = vadd.f32 %v1409_v6, %v7187_v32 }
 0x12a   : > { %v7225_v10 = vpop.f32.mrf.mxu0 }
 0x12b   : > { %v7227_v11 = vpop.f32.mrf.mxu1  ;;  %v7229_v12 = vadd.f32 %v1522_v7, %v1410_v9 }
 0x12c   : > { %v1415_v13 = vpop.f32.mrf.mxu0 }
 0x12d   : > { %v1528_v14 = vpop.f32.mrf.mxu1  ;;  %v1416_v15 = vadd.f32 %v1415_v13, %v7187_v32 }
 0x12e   : > { %v1417_v18 = vpop.f32.mrf.mxu0 }
 0x12f   : > { %v1530_v19 = vpop.f32.mrf.mxu1  ;;  %v7238_v20 = vadd.f32 %v1528_v14, %v1416_v15  ;;  %v1418_v21 = vadd.f32 %v1417_v18, %v7190_v33 }
 0x130   : > { %v1419_v22 = vpop.f32.mrf.mxu0 }
 0x131   : > { %v1532_v23 = vpop.f32.mrf.mxu1  ;;  %v7241_v24 = vadd.f32 %v1530_v19, %v1418_v21  ;;  %v1420_v25 = vadd.f32 %v1419_v22, %v7187_v32 }
 0x132   : > { %v7247_v27 = vpop.f32.mrf.mxu0 }
 0x133   : > { %v7249_v30 = vpop.f32.mrf.mxu1  ;;  %v7251_v34 = vadd.f32 %v1532_v23, %v1420_v25 }
 0x134   : > { %v1425_v36 = vpop.f32.mrf.mxu0 }
 0x135   : > { %v1538_v37 = vpop.f32.mrf.mxu1  ;;  %v1426_v38 = vadd.f32 %v1425_v36, %v7187_v32 }
 0x136   : > { %v1427_v41 = vpop.f32.mrf.mxu0 }
 0x137   : > { %v1540_v42 = vpop.f32.mrf.mxu1  ;;  %v7257_v43 = vadd.f32 %v1538_v37, %v1426_v38  ;;  %v1428_v45 = vadd.f32 %v1427_v41, %v7190_v33 }
 0x138   : > { %v1429_v49 = vpop.f32.mrf.mxu0 }
 0x139   : > { %v1542_v50 = vpop.f32.mrf.mxu1  ;;  %v7260_v51 = vadd.f32 %v1540_v42, %v1428_v45  ;;  %v1430_v52 = vadd.f32 %v1429_v49, %v7187_v32 }
 0x13a   : > { %v7266_v55 = vpop.f32.mrf.mxu0 }
 0x13b   : > { %v7268_v56 = vpop.f32.mrf.mxu1  ;;  %v7270_v57 = vadd.f32 %v1542_v50, %v1430_v52 }
 0x13c   : > { %v1435_v59 = vpop.f32.mrf.mxu0 }
 0x13d   : > { %v1548_v63 = vpop.f32.mrf.mxu1  ;;  %v1436_v0 = vadd.f32 %v1435_v59, %v7187_v32 }
 0x13e   : > { %v1437_v1 = vpop.f32.mrf.mxu0 }
 0x13f   : > { %v1550_v2 = vpop.f32.mrf.mxu1  ;;  %v7273_v3 = vadd.f32 %v1548_v63, %v1436_v0  ;;  %v1438_v5 = vadd.f32 %v1437_v1, %v7190_v33 }
 0x140   : > { %v1439_v6 = vpop.f32.mrf.mxu0 }
 0x141   : > { %v1552_v7 = vpop.f32.mrf.mxu1  ;;  %v7276_v9 = vadd.f32 %v1550_v2, %v1438_v5  ;;  %v1440_v13 = vadd.f32 %v1439_v6, %v7187_v32 }
 0x142   : > { %v7279_v14 = vpop.f32.mrf.mxu0 }
 0x143   : > { %v7281_v15 = vpop.f32.mrf.mxu1  ;;  %v7283_v16 = vadd.f32 %v1552_v7, %v1440_v13 }
 0x144   : > { %v1445_v17 = vpop.f32.mrf.mxu0 }
 0x145   : > { %v1558_v18 = vpop.f32.mrf.mxu1  ;;  %v1446_v19 = vadd.f32 %v1445_v17, %v7187_v32 }
 0x146   : > { %v1447_v21 = vpop.f32.mrf.mxu0 }
 0x147   : > { %v1560_v22 = vpop.f32.mrf.mxu1  ;;  %v1559_v23 = vadd.f32 %v1558_v18, %v1446_v19  ;;  %v1448_v25 = vadd.f32 %v1447_v21, %v7190_v33 }
 0x148   : > { %v1449_v26 = vpop.f32.mrf.mxu0 }
 0x149   : > { %v1562_v36 = vpop.f32.mrf.mxu1  ;;  %v1561_v37 = vadd.f32 %v1560_v22, %v1448_v25  ;;  %v1450_v38 = vadd.f32 %v1449_v26, %v7187_v32 }
 0x14a   : > { %v7288_v39 = vpop.f32.mrf.mxu0 }
 0x14b   : > { %v7290_v41 = vpop.f32.mrf.mxu1  ;;  %v1563_v42 = vadd.f32 %v1562_v36, %v1450_v38 }
 0x14c   : > { %v1455_v45 = vpop.f32.mrf.mxu0 }
 0x14d   : > { %v1568_v49 = vpop.f32.mrf.mxu1  ;;  %v1456_v50 = vadd.f32 %v1455_v45, %v7187_v32 }
 0x14e   : > { %v1457_v52 = vpop.f32.mrf.mxu0 }
 0x14f   : > { %v1570_v53 = vpop.f32.mrf.mxu1  ;;  %v1569_v59 = vadd.f32 %v1568_v49, %v1456_v50  ;;  %v1458_v63 = vadd.f32 %v1457_v52, %v7190_v33 }
 0x150   : > { %v1459_v0 = vpop.f32.mrf.mxu0 }
 0x151   : > { %v1572_v1 = vpop.f32.mrf.mxu1  ;;  %v1571_v2 = vadd.f32 %v1570_v53, %v1458_v63  ;;  %v1460_v5 = vadd.f32 %v1459_v0, %v7187_v32 }
 0x152   : > { %v7295_v6 = vpop.f32.mrf.mxu0 }
 0x153   : > { %8351 = vst [vmem:[#allocation6_spill] sm:$0xff] %v7295_v6  ;;  %v7297_v7 = vpop.f32.mrf.mxu1  ;;  %v1573_v13 = vadd.f32 %v1572_v1, %v1460_v5 }
 0x154   : > { %8352 = vst [vmem:[#allocation7_spill] sm:$0xff] %v7297_v7  ;;  %v1611_v17 = vpop.f32.mrf.mxu0 }
 0x155   : > { %v1671_v18 = vpop.f32.mrf.mxu1 }
 0x156   : > { %v7299_v19 = vadd.f32 %v1671_v18, %v1559_v23  ;;  %v1613_v21 = vpop.f32.mrf.mxu0 }
 0x157   : > { %v1673_v22 = vpop.f32.mrf.mxu1 }
 0x158   : > { %v7301_v25 = vadd.f32 %v1673_v22, %v1561_v37  ;;  %v1615_v26 = vpop.f32.mrf.mxu0  ;;  %v1612_v22 = vadd.f32 %v1611_v17, %v7193_v40 }
 0x159   : > { %v1675_v36 = vpop.f32.mrf.mxu1 }
 0x15a   : > { %v7303_v38 = vadd.f32 %v1675_v36, %v1563_v42  ;;  %v1617_v45 = vpop.f32.mrf.mxu0  ;;  %v1392_v42 = vadd.f32 %v7199_v46, %v7190_v33  ;;  %v1402_v46 = vadd.f32 %v7212_v60, %v7190_v33 }
 0x15b   : > { %v7305_v49 = vpop.f32.mrf.mxu1 }
 0x15c   : > { %8353 = vst [vmem:[#allocation8_spill] sm:$0xff] %v7303_v38  ;;  %8354 = vst [vmem:[#allocation9_spill] sm:$0xff] %v7305_v49  ;;  %v1621_v32 = vpop.f32.mrf.mxu0 }
 0x15d   : > { %v1681_v50 = vpop.f32.mrf.mxu1 }
 0x15e   : > { %v7307_v52 = vadd.f32 %v1681_v50, %v1569_v59  ;;  %v1623_v53 = vpop.f32.mrf.mxu0  ;;  %v1614_v59 = vadd.f32 %v1613_v21, %v7196_v44 }
 0x15f   : > { %v1683_v63 = vpop.f32.mrf.mxu1 }
 0x160   : > { %8355 = vst [vmem:[#allocation10_spill] sm:$0xff] %v7307_v52  ;;  %v7309_v0 = vadd.f32 %v1683_v63, %v1571_v2  ;;  %v1625_v23 = vpop.f32.mrf.mxu0  ;;  %v1505_v63 = vadd.f32 %v7201_v47, %v1392_v42 }
 0x161   : > { %v1685_v1 = vpop.f32.mrf.mxu1 }
 0x162   : > { %8356 = vst [vmem:[#allocation11_spill] sm:$0xff] %v7309_v0  ;;  %v7311_v5 = vadd.f32 %v1685_v1, %v1573_v13  ;;  %v1627_v37 = vpop.f32.mrf.mxu0  ;;  %v1616_v13 = vadd.f32 %v1615_v26, %v7203_v48  ;;  %v1622_v48 = vadd.f32 %v1621_v32, %v7206_v54 }
 0x163   : > { %v7313_v18 = vpop.f32.mrf.mxu1 }
 0x164   : > { %8357 = vst [vmem:[#allocation12_spill] sm:$0xff] %v7311_v5  ;;  %8358 = vst [vmem:[#allocation13_spill] sm:$0xff] %v7313_v18  ;;  %v1631_v36 = vpop.f32.mrf.mxu0  ;;  %v1618_v5 = vadd.f32 %v1617_v45, %v1505_v63  ;;  %v1515_v45 = vadd.f32 %v7214_v61, %v1402_v46  ;;  %v1412_v61 = vadd.f32 %v7225_v10, %v7190_v33 }
 0x165   : > { %v1724_v35 = vpop.f32.mrf.mxu1 }
 0x166   : > { %v1725_v50 = vadd.f32 %v1724_v35, %v1612_v22  ;;  %v7319_v28 = vpop.f32.mrf.mxu0  ;;  %v1628_v32 = vadd.f32 %v1627_v37, %v1515_v45 }
 0x167   : > { %v1726_v2 = vpop.f32.mrf.mxu1 }
 0x168   : > { %v1727_v1 = vadd.f32 %v1726_v2, %v1614_v59  ;;  %v1635_v29 = vpop.f32.mrf.mxu0  ;;  %v1835_v40 = vmul.f32 0.2, %v1725_v50  ;;  %vm1803_vm1 = vcmp.gt.f32.partialorder %v1725_v50, 0.0  ;;  %v1624_v2 = vadd.f32 %v1623_v53, %v7209_v58 }
 0x169   : > { %v1728_v31 = vpop.f32.mrf.mxu1 }
 0x16a   : > { %v1729_v17 = vadd.f32 %v1728_v31, %v1616_v13  ;;  %v1637_v18 = vpop.f32.mrf.mxu0  ;;  %v1836_v44 = vmul.f32 0.2, %v1727_v1  ;;  %vm1804_vm3 = vcmp.gt.f32.partialorder %v1727_v1, 0.0  ;;  %v1867_v42 = vsel %vm1803_vm1, %v1725_v50, %v1835_v40 }
 0x16b   : > { %v1730_v0 = vpop.f32.mrf.mxu1 }
 0x16c   : > { %v1731_v35 = vadd.f32 %v1730_v0, %v1618_v5  ;;  %vm1805_vm2 = vcmp.gt.f32.partialorder %v1729_v17, 0.0  ;;  %v1837_v21 = vmul.f32 0.2, %v1729_v17  ;;  %v1641_v22 = vpop.f32.mrf.mxu0  ;;  %v1626_v0 = vadd.f32 %v1625_v23, %v7216_v62 }
 0x16d   : > { %v1734_v47 = vpop.f32.mrf.mxu1  ;;  %v1868_v52 = vsel %vm1804_vm3, %v1727_v1, %v1836_v44  ;;  %v1632_v1 = vadd.f32 %v1631_v36, %v7219_v4  ;;  %v1634_v44 = vadd.f32 %v7319_v28, %v7222_v8 }
 0x16e   : > { %vm1806_vm4 = vcmp.gt.f32.partialorder %v1731_v35, 0.0  ;;  %v1838_v26 = vmul.f32 0.2, %v1731_v35  ;;  %v1869_v60 = vsel %vm1805_vm2, %v1729_v17, %v1837_v21  ;;  %v1643_v59 = vpop.f32.mrf.mxu0  ;;  %v1735_v63 = vadd.f32 %v1734_v47, %v1622_v48 }
 0x16f   : > { %v1736_v31 = vpop.f32.mrf.mxu1  ;;  %v1899_v5 = vpack.c.bf16 %v1869_v60, %v1867_v42  ;;  %v1422_v60 = vadd.f32 %v7247_v27, %v7190_v33 }
 0x170   : > { %v7329_v13 = vpop.f32.mrf.mxu0  ;;  %v1870_v54 = vsel %vm1806_vm4, %v1731_v35, %v1838_v26  ;;  %v1737_v6 = vadd.f32 %v1736_v31, %v1624_v2  ;;  %v1839_v40 = vmul.f32 0.2, %v1735_v63  ;;  %vm1807_vm6 = vcmp.gt.f32.partialorder %v1735_v63, 0.0 }
 0x171   : > { %v1738_v7 = vpop.f32.mrf.mxu1  ;;  %v1900_v49 = vpack.c.bf16 %v1870_v54, %v1868_v52  ;;  %v1525_v52 = vadd.f32 %v7227_v11, %v1412_v61  ;;  %v1535_v54 = vadd.f32 %v7249_v30, %v1422_v60 }
 0x172   : > { %v1739_v38 = vadd.f32 %v1738_v7, %v1626_v0  ;;  %v1647_v50 = vpop.f32.mrf.mxu0  ;;  %v1840_v37 = vmul.f32 0.2, %v1737_v6  ;;  %vm1808_vm8 = vcmp.gt.f32.partialorder %v1737_v6, 0.0  ;;  %v1871_v47 = vsel %vm1807_vm6, %v1735_v63, %v1839_v40 }
 0x173   : > { %v1740_v46 = vpop.f32.mrf.mxu1  ;;  %2082 = vmatprep.mubr.bf16.mxu0 %v1900_v49  ;;  %v1636_v49 = vadd.f32 %v1635_v29, %v7229_v12  ;;  %v1638_v26 = vadd.f32 %v1637_v18, %v1525_v52  ;;  %v1644_v0 = vadd.f32 %v1643_v59, %v7241_v24 }
 0x174   : > { %vm1809_vm5 = vcmp.gt.f32.partialorder %v1739_v38, 0.0  ;;  %v1841_v58 = vmul.f32 0.2, %v1739_v38  ;;  %v1741_v62 = vadd.f32 %v1740_v46, %v1628_v32  ;;  %2083 = vmatmul.mubr.bf16.vlgmr.msra.gmra.mxu0 %v1899_v5  ;;  %v1651_v53 = vpop.f32.mrf.mxu0  ;;  %v1872_v11 = vsel %vm1808_vm8, %v1737_v6, %v1840_v37 }
 0x175   : > { %v1744_v23 = vpop.f32.mrf.mxu1  ;;  %v1646_v32 = vadd.f32 %v7329_v13, %v7251_v34  ;;  %v1432_v37 = vadd.f32 %v7266_v55, %v7190_v33 }
 0x176   : > { %vm1810_vm7 = vcmp.gt.f32.partialorder %v1741_v62, 0.0  ;;  %v1842_v7 = vmul.f32 0.2, %v1741_v62  ;;  %v1653_v10 = vpop.f32.mrf.mxu0  ;;  %v1873_v35 = vsel %vm1809_vm5, %v1739_v38, %v1841_v58  ;;  %v1745_v21 = vadd.f32 %v1744_v23, %v1632_v1 }
 0x177   : > { %v1746_v17 = vpop.f32.mrf.mxu1  ;;  %v1901_v36 = vpack.c.bf16 %v1873_v35, %v1871_v47  ;;  %v1642_v38 = vadd.f32 %v1641_v22, %v7238_v20 }
 0x178   : > { %v1874_v4 = vsel %vm1810_vm7, %v1741_v62, %v1842_v7  ;;  %v1747_v45 = vadd.f32 %v1746_v17, %v1634_v44  ;;  %v1655_v31 = vpop.f32.mrf.mxu0  ;;  %v1843_v8 = vmul.f32 0.2, %v1745_v21  ;;  %vm1811_vm10 = vcmp.gt.f32.partialorder %v1745_v21, 0.0 }
 0x179   : > { %v1748_v48 = vpop.f32.mrf.mxu1  ;;  %v1902_v28 = vpack.c.bf16 %v1874_v4, %v1872_v11  ;;  %v1648_v62 = vadd.f32 %v1647_v50, %v1535_v54  ;;  %v1652_v7 = vadd.f32 %v1651_v53, %v7257_v43  ;;  %v1654_v44 = vadd.f32 %v1653_v10, %v7260_v51 }
 0x17a   : > { %v1749_v42 = vadd.f32 %v1748_v48, %v1636_v49  ;;  %v1844_v5 = vmul.f32 0.2, %v1747_v45  ;;  %vm1812_vm12 = vcmp.gt.f32.partialorder %v1747_v45, 0.0  ;;  %v1657_v27 = vpop.f32.mrf.mxu0  ;;  %v1875_v46 = vsel %vm1811_vm10, %v1745_v21, %v1843_v8 }
 0x17b   : > { %v1750_v2 = vpop.f32.mrf.mxu1  ;;  %2090 = vmatprep.mubr.bf16.mxu0 %v1902_v28  ;;  %v1545_v43 = vadd.f32 %v7268_v56, %v1432_v37 }
 0x17c   : > { %vm1813_vm9 = vcmp.gt.f32.partialorder %v1749_v42, 0.0  ;;  %v1845_v29 = vmul.f32 0.2, %v1749_v42  ;;  %v1751_v12 = vadd.f32 %v1750_v2, %v1638_v26  ;;  %2091 = vmatmul.mubr.bf16.gmra.mxu0 %v1901_v36  ;;  %v1876_v1 = vsel %vm1812_vm12, %v1747_v45, %v1844_v5  ;;  %v1661_v52 = vpop.f32.mrf.mxu0 }
 0x17d   : > { %v1754_v18 = vpop.f32.mrf.mxu1  ;;  %v1656_v36 = vadd.f32 %v1655_v31, %v7270_v57  ;;  %v1658_v60 = vadd.f32 %v1657_v27, %v1545_v43  ;;  %v1442_v2 = vadd.f32 %v7279_v14, %v7190_v33  ;;  %v1662_v28 = vadd.f32 %v1661_v52, %v7273_v3  ;;  %v8360_v43 = vld [vmem:[#allocation8_spill] sm:$0xff] }
 0x17e   : > { %vm1814_vm11 = vcmp.gt.f32.partialorder %v1751_v12, 0.0  ;;  %v1846_v6 = vmul.f32 0.2, %v1751_v12  ;;  %v1755_v63 = vadd.f32 %v1754_v18, %v1642_v38  ;;  %v1877_v22 = vsel %vm1813_vm9, %v1749_v42, %v1845_v29  ;;  %v1663_v53 = vpop.f32.mrf.mxu0 }
 0x17f   : > { %v1756_v20 = vpop.f32.mrf.mxu1  ;;  %v1903_v58 = vpack.c.bf16 %v1877_v22, %v1875_v46  ;;  %v1555_v14 = vadd.f32 %v7281_v15, %v1442_v2  ;;  %v8363_v2 = vld [vmem:[#allocation7_spill] sm:$0xff] }
 0x180   : > { %v1757_v61 = vadd.f32 %v1756_v20, %v1644_v0  ;;  %v1847_v24 = vmul.f32 0.2, %v1755_v63  ;;  %v1878_v40 = vsel %vm1814_vm11, %v1751_v12, %v1846_v6  ;;  %vm1815_vm13 = vcmp.gt.f32.partialorder %v1755_v63, 0.0  ;;  %v1665_v56 = vpop.f32.mrf.mxu0 }
 0x181   : > { %v1758_v59 = vpop.f32.mrf.mxu1  ;;  %v1904_v17 = vpack.c.bf16 %v1878_v40, %v1876_v1  ;;  %v1664_v12 = vadd.f32 %v1663_v53, %v7276_v9  ;;  %v1666_v22 = vadd.f32 %v1665_v56, %v7283_v16 }
 0x182   : > { %v1759_v23 = vadd.f32 %v1758_v59, %v1646_v32  ;;  %v1848_v35 = vmul.f32 0.2, %v1757_v61  ;;  %vm1816_vm15 = vcmp.gt.f32.partialorder %v1757_v61, 0.0  ;;  %v1879_v49 = vsel %vm1815_vm13, %v1755_v63, %v1847_v24  ;;  %v1667_v3 = vpop.f32.mrf.mxu0 }
 0x183   : > { %v1760_v30 = vpop.f32.mrf.mxu1  ;;  %2098 = vmatprep.mubr.bf16.mxu0 %v1904_v17  ;;  %v1668_v59 = vadd.f32 %v1667_v3, %v1555_v14 }
 0x184   : > { %vm1817_vm14 = vcmp.gt.f32.partialorder %v1759_v23, 0.0  ;;  %v1849_v34 = vmul.f32 0.2, %v1759_v23  ;;  %v1761_v13 = vadd.f32 %v1760_v30, %v1648_v62  ;;  %2099 = vmatmul.mubr.bf16.gmra.mxu0 %v1903_v58  ;;  %v1880_v45 = vsel %vm1816_vm15, %v1757_v61, %v1848_v35 }
 0x185   : > { %v1764_v50 = vpop.f32.mrf.mxu1  ;;  %v1452_v58 = vadd.f32 %v7288_v39, %v7190_v33 }
 0x186   : > { %vm1818_vm0 = vcmp.gt.f32.partialorder %v1761_v13, 0.0  ;;  %v1850_v21 = vmul.f32 0.2, %v1761_v13  ;;  %v1765_v55 = vadd.f32 %v1764_v50, %v1652_v7  ;;  %v1881_v47 = vsel %vm1817_vm14, %v1759_v23, %v1849_v34 }
 0x187   : > { %v1766_v48 = vpop.f32.mrf.mxu1  ;;  %v1905_v4 = vpack.c.bf16 %v1881_v47, %v1879_v49  ;;  %v1565_v34 = vadd.f32 %v7290_v41, %v1452_v58  ;;  %v6156_v58 = vld [vmem:[%s8322_s7 + $0x38] sm:$0xff]  }
 0x188   : > { %v1767_v26 = vadd.f32 %v1766_v48, %v1654_v44  ;;  %v1882_v51 = vsel %vm1818_vm0, %v1761_v13, %v1850_v21  ;;  %v1851_v10 = vmul.f32 0.2, %v1765_v55  ;;  %vm1819_vm1 = vcmp.gt.f32.partialorder %v1765_v55, 0.0  ;;  %v8361_v48 = vld [vmem:[#allocation6_spill] sm:$0xff] }
 0x189   : > { %v1768_v42 = vpop.f32.mrf.mxu1  ;;  %v1906_v11 = vpack.c.bf16 %v1882_v51, %v1880_v45 }
 0x18a   : > { %v1769_v38 = vadd.f32 %v1768_v42, %v1656_v36  ;;  %v1852_v29 = vmul.f32 0.2, %v1767_v26  ;;  %vm1820_vm3 = vcmp.gt.f32.partialorder %v1767_v26, 0.0  ;;  %v1883_v18 = vsel %vm1819_vm1, %v1765_v55, %v1851_v10  ;;  %v8359_v55 = vld [vmem:[#allocation9_spill] sm:$0xff]  ;;  %v8362_v10 = vld [vmem:[#allocation10_spill] sm:$0xff] }
 0x18b   : > { %v1770_v8 = vpop.f32.mrf.mxu1  ;;  %2106 = vmatprep.mubr.bf16.mxu0 %v1906_v11  ;;  %v1678_v47 = vadd.f32 %v8359_v55, %v1565_v34 }
 0x18c   : > { %vm1821_vm2 = vcmp.gt.f32.partialorder %v1769_v38, 0.0  ;;  %v1853_v57 = vmul.f32 0.2, %v1769_v38  ;;  %v1771_v31 = vadd.f32 %v1770_v8, %v1658_v60  ;;  %2107 = vmatmul.mubr.bf16.gmra.mxu0 %v1905_v4  ;;  %v1884_v32 = vsel %vm1820_vm3, %v1767_v26, %v1852_v29 }
 0x18d   : > { %v1774_v0 = vpop.f32.mrf.mxu1 }
 0x18e   : > { %vm1822_vm4 = vcmp.gt.f32.partialorder %v1771_v31, 0.0  ;;  %v1854_v5 = vmul.f32 0.2, %v1771_v31  ;;  %v1775_v6 = vadd.f32 %v1774_v0, %v1662_v28  ;;  %v1885_v63 = vsel %vm1821_vm2, %v1769_v38, %v1853_v57 }
 0x18f   : > { %v1776_v27 = vpop.f32.mrf.mxu1  ;;  %v1907_v20 = vpack.c.bf16 %v1885_v63, %v1883_v18 }
 0x190   : > { %v1777_v54 = vadd.f32 %v1776_v27, %v1664_v12  ;;  %v1886_v61 = vsel %vm1822_vm4, %v1771_v31, %v1854_v5  ;;  %v1855_v46 = vmul.f32 0.2, %v1775_v6  ;;  %vm1823_vm5 = vcmp.gt.f32.partialorder %v1775_v6, 0.0  ;;  %v8365_v12 = vld [vmem:[#allocation13_spill] sm:$0xff]  ;;  %v8366_v5 = vld [vmem:[#allocation12_spill] sm:$0xff] }
 0x191   : > { %v1778_v9 = vpop.f32.mrf.mxu1  ;;  %v1908_v24 = vpack.c.bf16 %v1886_v61, %v1884_v32 }
 0x192   : > { %v1779_v40 = vadd.f32 %v1778_v9, %v1666_v22  ;;  %v1856_v15 = vmul.f32 0.2, %v1777_v54  ;;  %vm1824_vm7 = vcmp.gt.f32.partialorder %v1777_v54, 0.0  ;;  %v1887_v37 = vsel %vm1823_vm5, %v1775_v6, %v1855_v46 }
 0x193   : > { %v1780_v62 = vpop.f32.mrf.mxu1  ;;  %2114 = vmatprep.mubr.bf16.mxu0 %v1908_v24  ;;  %v6153_v24 = vld [vmem:[%s8320_s5 + $0x10] sm:$0xff]  }
 0x194   : > { %vm1825_vm6 = vcmp.gt.f32.partialorder %v1779_v40, 0.0  ;;  %v1857_v23 = vmul.f32 0.2, %v1779_v40  ;;  %v1781_v1 = vadd.f32 %v1780_v62, %v1668_v59  ;;  %2115 = vmatmul.mubr.bf16.gmra.mxu0 %v1907_v20  ;;  %v1888_v13 = vsel %vm1824_vm7, %v1777_v54, %v1856_v15  ;;  %5824 = vmatprep.subr.bf16.mxu1 %v6153_v24  ;;  %v6154_v59 = vld [vmem:[%s8320_s5 + $0x8] sm:$0xff]   ;;  %v7389_v15 = vld [vmem:[%s8319_s4] ss:$0 sm:$0xff] }
 0x195   : > { %v1784_v16 = vpop.f32.mrf.mxu1  ;;  %5825 = vmatpush3.bf16.msra.mxu1 %v6153_v24 }
 0x196   : > { %vm1826_vm8 = vcmp.gt.f32.partialorder %v1781_v1, 0.0  ;;  %v1858_v7 = vmul.f32 0.2, %v1781_v1  ;;  %v1785_v52 = vadd.f32 %v1784_v16, %v7299_v19  ;;  %v1889_v30 = vsel %vm1825_vm6, %v1779_v40, %v1857_v23  ;;  %5826 = vmatprep.subr.bf16.mxu1 %v6154_v59  ;;  %v6155_v40 = vld [vmem:[%s8320_s5] sm:$0xff]  }
 0x197   : > { %v1786_v17 = vpop.f32.mrf.mxu1  ;;  %v1909_v35 = vpack.c.bf16 %v1889_v30, %v1887_v37  ;;  %v1462_v19 = vadd.f32 %v8361_v48, %v7190_v33  ;;  %v8364_v33 = vld [vmem:[#allocation11_spill] sm:$0xff] }
 0x198   : > { %v1787_v39 = vadd.f32 %v1786_v17, %v7301_v25  ;;  %v1890_v44 = vsel %vm1826_vm8, %v1781_v1, %v1858_v7  ;;  %v1859_v50 = vmul.f32 0.2, %v1785_v52  ;;  %vm1827_vm9 = vcmp.gt.f32.partialorder %v1785_v52, 0.0 }
 0x199   : > { %v1788_v49 = vpop.f32.mrf.mxu1  ;;  %v1910_v21 = vpack.c.bf16 %v1890_v44, %v1888_v13  ;;  %v1575_v28 = vadd.f32 %v8363_v2, %v1462_v19  ;;  %5827 = vmatpush3.bf16.msra.mxu1 %v6154_v59 }
 0x19a   : > { %v1789_v53 = vadd.f32 %v1788_v49, %v8360_v43  ;;  %v1860_v36 = vmul.f32 0.2, %v1787_v39  ;;  %vm1828_vm11 = vcmp.gt.f32.partialorder %v1787_v39, 0.0  ;;  %v1891_v45 = vsel %vm1827_vm9, %v1785_v52, %v1859_v50  ;;  %5828 = vmatprep.subr.bf16.mxu1 %v6155_v40 }
 0x19b   : > { %v1790_v4 = vpop.f32.mrf.mxu1  ;;  %2122 = vmatprep.mubr.bf16.mxu0 %v1910_v21  ;;  %v1688_v0 = vadd.f32 %v8365_v12, %v1575_v28 }
 0x19c   : > { %vm1829_vm10 = vcmp.gt.f32.partialorder %v1789_v53, 0.0  ;;  %v1861_v41 = vmul.f32 0.2, %v1789_v53  ;;  %v1791_v26 = vadd.f32 %v1790_v4, %v1678_v47  ;;  %2123 = vmatmul.mubr.bf16.gmra.mxu0 %v1909_v35  ;;  %v1892_v8 = vsel %vm1828_vm11, %v1787_v39, %v1860_v36 }
 0x19d   : > { %v1794_v25 = vpop.f32.mrf.mxu1  ;;  %5829 = vmatpush3.bf16.msra.mxu1 %v6155_v40 }
 0x19e   : > { %vm1830_vm12 = vcmp.gt.f32.partialorder %v1791_v26, 0.0  ;;  %v1862_v51 = vmul.f32 0.2, %v1791_v26  ;;  %v1795_v42 = vadd.f32 %v1794_v25, %v8362_v10  ;;  %v1893_v11 = vsel %vm1829_vm10, %v1789_v53, %v1861_v41  ;;  %5846 = vmatprep.subr.bf16.mxu1 %v6156_v58 }
 0x19f   : > { %v1796_v60 = vpop.f32.mrf.mxu1  ;;  %v1911_v38 = vpack.c.bf16 %v1893_v11, %v1891_v45  ;;  %v6157_v11 = vld [vmem:[%s8322_s7 + $0x30] sm:$0xff]  }
 0x1a0   : > { %v1797_v56 = vadd.f32 %v1796_v60, %v8364_v33  ;;  %v1894_v29 = vsel %vm1830_vm12, %v1791_v26, %v1862_v51  ;;  %v1863_v18 = vmul.f32 0.2, %v1795_v42  ;;  %vm1831_vm13 = vcmp.gt.f32.partialorder %v1795_v42, 0.0 }
 0x1a1   : > { %v1798_v57 = vpop.f32.mrf.mxu1  ;;  %v1912_v31 = vpack.c.bf16 %v1894_v29, %v1892_v8 }
 0x1a2   : > { %v1799_v6 = vadd.f32 %v1798_v57, %v8366_v5  ;;  %v1864_v14 = vmul.f32 0.2, %v1797_v56  ;;  %vm1832_vm15 = vcmp.gt.f32.partialorder %v1797_v56, 0.0  ;;  %v1895_v22 = vsel %vm1831_vm13, %v1795_v42, %v1863_v18 }
 0x1a3   : > { %v1800_v63 = vpop.f32.mrf.mxu1  ;;  %2130 = vmatprep.mubr.bf16.mxu0 %v1912_v31 }
 0x1a4   : > { %vm1833_vm14 = vcmp.gt.f32.partialorder %v1799_v6, 0.0  ;;  %v1865_v3 = vmul.f32 0.2, %v1799_v6  ;;  %v1801_v27 = vadd.f32 %v1800_v63, %v1688_v0  ;;  %2131 = vmatmul.mubr.bf16.gmra.mxu0 %v1911_v38  ;;  %v1896_v61 = vsel %vm1832_vm15, %v1797_v56, %v1864_v14  ;;  %v6158_v56 = vld [vmem:[%s8322_s7 + $0x28] sm:$0xff]  }
 0x1a6   : > { %vm1834_vm0 = vcmp.gt.f32.partialorder %v1801_v27, 0.0  ;;  %v1866_v20 = vmul.f32 0.2, %v1801_v27  ;;  %v1897_v54 = vsel %vm1833_vm14, %v1799_v6, %v1865_v3  ;;  %v6159_v6 = vld [vmem:[%s8322_s7 + $0x20] sm:$0xff]  }
 0x1a7   : > { %v1913_v32 = vpack.c.bf16 %v1897_v54, %v1895_v22  ;;  %v6160_v22 = vld [vmem:[%s8322_s7 + $0x18] sm:$0xff]  }
 0x1a8   : > { %v1898_v46 = vsel %vm1834_vm0, %v1801_v27, %v1866_v20 }
 0x1a9   : > { %v1914_v9 = vpack.c.bf16 %v1898_v46, %v1896_v61 }
 0x1ab   : > { %2138 = vmatprep.mubr.bf16.mxu0 %v1914_v9 }
 0x1ac   : > { %2139 = vmatmul.mubr.bf16.gmra.mxu0 %v1913_v32 }
 0x234   : > { %v5638_v62 = vpop.f32.mrf.mxu0 }
 0x236   : > { %v5639_v23 = vpop.f32.mrf.mxu0 }
 0x237   : > { %v5640_v1 = vadd.f32 %v5639_v23, %v5638_v62 }
 0x238   : > { %v5641_v16 = vpop.f32.mrf.mxu0 }
 0x239   : > { %v2085_v37 = vadd.f32 %v5640_v1, %v7389_v15 }
 0x23a   : > { %v5642_v7 = vpop.f32.mrf.mxu0 }
 0x23b   : > { %v5643_v52 = vadd.f32 %v5642_v7, %v5641_v16  ;;  %v2163_v30 = vmul.f32 0.2, %v2085_v37  ;;  %vm2147_vm1 = vcmp.gt.f32.partialorder %v2085_v37, 0.0 }
 0x23c   : > { %v5644_v35 = vpop.f32.mrf.mxu0 }
 0x23d   : > { %v2088_v17 = vadd.f32 %v5643_v52, %v7389_v15  ;;  %v2179_v50 = vsel %vm2147_vm1, %v2085_v37, %v2163_v30 }
 0x23e   : > { %v5645_v39 = vpop.f32.mrf.mxu0 }
 0x23f   : > { %v2164_v34 = vmul.f32 0.2, %v2088_v17  ;;  %vm2148_vm2 = vcmp.gt.f32.partialorder %v2088_v17, 0.0  ;;  %v5646_v13 = vadd.f32 %v5645_v39, %v5644_v35 }
 0x240   : > { %v5647_v44 = vpop.f32.mrf.mxu0 }
 0x241   : > { %v2180_v49 = vsel %vm2148_vm2, %v2088_v17, %v2164_v34  ;;  %v2093_v21 = vadd.f32 %v5646_v13, %v7389_v15 }
 0x242   : > { %v2195_v55 = vpack.c.bf16 %v2180_v49, %v2179_v50  ;;  %v5648_v47 = vpop.f32.mrf.mxu0 }
 0x243   : > { %v5649_v43 = vadd.f32 %v5648_v47, %v5647_v44  ;;  %v2165_v48 = vmul.f32 0.2, %v2093_v21  ;;  %vm2149_vm3 = vcmp.gt.f32.partialorder %v2093_v21, 0.0 }
 0x244   : > { %5830 = vmatprep.mubr.bf16.mxu1 %v2195_v55  ;;  %v5650_v53 = vpop.f32.mrf.mxu0 }
 0x245   : > { %v2096_v19 = vadd.f32 %v5649_v43, %v7389_v15  ;;  %v2181_v25 = vsel %vm2149_vm3, %v2093_v21, %v2165_v48 }
 0x246   : > { %v5651_v4 = vpop.f32.mrf.mxu0 }
 0x247   : > { %vm2150_vm4 = vcmp.gt.f32.partialorder %v2096_v19, 0.0  ;;  %v2166_v36 = vmul.f32 0.2, %v2096_v19  ;;  %v5652_v41 = vadd.f32 %v5651_v4, %v5650_v53 }
 0x248   : > { %v5653_v26 = vpop.f32.mrf.mxu0 }
 0x249   : > { %v2182_v45 = vsel %vm2150_vm4, %v2096_v19, %v2166_v36  ;;  %v2101_v51 = vadd.f32 %v5652_v41, %v7389_v15 }
 0x24a   : > { %v2196_v10 = vpack.c.bf16 %v2182_v45, %v2181_v25  ;;  %v5654_v42 = vpop.f32.mrf.mxu0 }
 0x24b   : > { %v5655_v60 = vadd.f32 %v5654_v42, %v5653_v26  ;;  %v2167_v2 = vmul.f32 0.2, %v2101_v51  ;;  %vm2151_vm5 = vcmp.gt.f32.partialorder %v2101_v51, 0.0 }
 0x24c   : > { %v5656_v38 = vpop.f32.mrf.mxu0  ;;  %5831 = vmatmul.mubr.bf16.vlgmr.msra.gmra.mxu1 %v2196_v10 }
 0x24d   : > { %v2104_v28 = vadd.f32 %v5655_v60, %v7389_v15  ;;  %5847 = vmatpush3.bf16.msra.mxu1 %v6156_v58  ;;  %v2183_v12 = vsel %vm2151_vm5, %v2101_v51, %v2167_v2 }
 0x24e   : > { %v5657_v33 = vpop.f32.mrf.mxu0  ;;  %5848 = vmatprep.subr.bf16.mxu1 %v6157_v11 }
 0x24f   : > { %v2168_v8 = vmul.f32 0.2, %v2104_v28  ;;  %v5658_v29 = vadd.f32 %v5657_v33, %v5656_v38  ;;  %vm2152_vm6 = vcmp.gt.f32.partialorder %v2104_v28, 0.0 }
 0x250   : > { %v5659_v57 = vpop.f32.mrf.mxu0 }
 0x251   : > { %v2109_v31 = vadd.f32 %v5658_v29, %v7389_v15  ;;  %v2184_v0 = vsel %vm2152_vm6, %v2104_v28, %v2168_v8  ;;  %5849 = vmatpush3.bf16.msra.mxu1 %v6157_v11 }
 0x252   : > { %v5660_v18 = vpop.f32.mrf.mxu0  ;;  %v2197_v5 = vpack.c.bf16 %v2184_v0, %v2183_v12  ;;  %5850 = vmatprep.subr.bf16.mxu1 %v6158_v56 }
 0x253   : > { %v5661_v63 = vadd.f32 %v5660_v18, %v5659_v57  ;;  %v2169_v3 = vmul.f32 0.2, %v2109_v31  ;;  %vm2153_vm7 = vcmp.gt.f32.partialorder %v2109_v31, 0.0  ;;  %v6161_v18 = vld [vmem:[%s8322_s7 + $0x10] sm:$0xff]  }
 0x254   : > { %v5662_v14 = vpop.f32.mrf.mxu0  ;;  %5834 = vmatprep.mubr.bf16.mxu1 %v2197_v5  ;;  %v6162_v5 = vld [vmem:[%s8322_s7 + $0x8] sm:$0xff]  }
 0x255   : > { %v2112_v27 = vadd.f32 %v5661_v63, %v7389_v15  ;;  %5851 = vmatpush3.bf16.msra.mxu1 %v6158_v56  ;;  %v2185_v9 = vsel %vm2153_vm7, %v2109_v31, %v2169_v3  ;;  %v6165_v63 = vld [vmem:[%s8324_s9 + $0x30] sm:$0xff]   ;;  %v6167_v3 = vld [vmem:[%s8324_s9 + $0x20] sm:$0xff]  }
 0x256   : > { %v5663_v20 = vpop.f32.mrf.mxu0  ;;  %5852 = vmatprep.subr.bf16.mxu1 %v6159_v6 }
 0x257   : > { %v2170_v54 = vmul.f32 0.2, %v2112_v27  ;;  %v5664_v32 = vadd.f32 %v5663_v20, %v5662_v14  ;;  %vm2154_vm8 = vcmp.gt.f32.partialorder %v2112_v27, 0.0  ;;  %v6166_v14 = vld [vmem:[%s8324_s9 + $0x28] sm:$0xff]   ;;  %v6169_v20 = vld [vmem:[%s8324_s9 + $0x10] sm:$0xff]  }
 0x258   : > { %v5665_v61 = vpop.f32.mrf.mxu0 }
 0x259   : > { %v2117_v46 = vadd.f32 %v5664_v32, %v7389_v15  ;;  %v2186_v24 = vsel %vm2154_vm8, %v2112_v27, %v2170_v54  ;;  %5853 = vmatpush3.bf16.msra.mxu1 %v6159_v6  ;;  %v6164_v6 = vld [vmem:[%s8324_s9 + $0x38] sm:$0xff]   ;;  %v7452_v32 = vld [vmem:[%s8321_s6] ss:$0 sm:$0xff] }
 0x25a   : > { %v5666_v59 = vpop.f32.mrf.mxu0  ;;  %v2198_v40 = vpack.c.bf16 %v2186_v24, %v2185_v9  ;;  %5854 = vmatprep.subr.bf16.mxu1 %v6160_v22  ;;  %5878 = vmatprep.subr.bf16.mxu0 %v6164_v6  ;;  %v6168_v27 = vld [vmem:[%s8324_s9 + $0x18] sm:$0xff]  }
 0x25b   : > { %v5667_v58 = vadd.f32 %v5666_v59, %v5665_v61  ;;  %v2171_v23 = vmul.f32 0.2, %v2117_v46  ;;  %vm2155_vm9 = vcmp.gt.f32.partialorder %v2117_v46, 0.0  ;;  %5879 = vmatpush3.bf16.msra.mxu0 %v6164_v6 }
 0x25c   : > { %v5668_v62 = vpop.f32.mrf.mxu0  ;;  %5835 = vmatmul.mubr.bf16.gmra.mxu1 %v2198_v40  ;;  %5880 = vmatprep.subr.bf16.mxu0 %v6165_v63 }
 0x25d   : > { %v2120_v1 = vadd.f32 %v5667_v58, %v7389_v15  ;;  %5855 = vmatpush3.bf16.msra.mxu1 %v6160_v22  ;;  %v2187_v17 = vsel %vm2155_vm9, %v2117_v46, %v2171_v23  ;;  %v6170_v22 = vld [vmem:[%s8324_s9 + $0x8] sm:$0xff]  }
 0x25e   : > { %v5669_v16 = vpop.f32.mrf.mxu0  ;;  %5856 = vmatprep.subr.bf16.mxu1 %v6161_v18 }
 0x25f   : > { %v2172_v37 = vmul.f32 0.2, %v2120_v1  ;;  %v5670_v7 = vadd.f32 %v5669_v16, %v5668_v62  ;;  %vm2156_vm10 = vcmp.gt.f32.partialorder %v2120_v1, 0.0  ;;  %5881 = vmatpush3.bf16.msra.mxu0 %v6165_v63 }
 0x260   : > { %v5671_v52 = vpop.f32.mrf.mxu0  ;;  %5882 = vmatprep.subr.bf16.mxu0 %v6166_v14 }
 0x261   : > { %v2125_v30 = vadd.f32 %v5670_v7, %v7389_v15  ;;  %v2188_v35 = vsel %vm2156_vm10, %v2120_v1, %v2172_v37  ;;  %5857 = vmatpush3.bf16.msra.mxu1 %v6161_v18 }
 0x262   : > { %v5672_v34 = vpop.f32.mrf.mxu0  ;;  %v2199_v39 = vpack.c.bf16 %v2188_v35, %v2187_v17  ;;  %5858 = vmatprep.subr.bf16.mxu1 %v6162_v5 }
 0x263   : > { %v5673_v13 = vadd.f32 %v5672_v34, %v5671_v52  ;;  %v2173_v50 = vmul.f32 0.2, %v2125_v30  ;;  %vm2157_vm11 = vcmp.gt.f32.partialorder %v2125_v30, 0.0  ;;  %5883 = vmatpush3.bf16.msra.mxu0 %v6166_v14 }
 0x264   : > { %v5674_v44 = vpop.f32.mrf.mxu0  ;;  %5838 = vmatprep.mubr.bf16.mxu1 %v2199_v39  ;;  %5884 = vmatprep.subr.bf16.mxu0 %v6167_v3 }
 0x265   : > { %v2128_v49 = vadd.f32 %v5673_v13, %v7389_v15  ;;  %v2189_v48 = vsel %vm2157_vm11, %v2125_v30, %v2173_v50  ;;  %5859 = vmatpush3.bf16.msra.mxu1 %v6162_v5 }
 0x266   : > { %v5675_v21 = vpop.f32.mrf.mxu0 }
 0x267   : > { %v2174_v55 = vmul.f32 0.2, %v2128_v49  ;;  %v5676_v47 = vadd.f32 %v5675_v21, %v5674_v44  ;;  %vm2158_vm12 = vcmp.gt.f32.partialorder %v2128_v49, 0.0  ;;  %5885 = vmatpush3.bf16.msra.mxu0 %v6167_v3 }
 0x268   : > { %v5677_v43 = vpop.f32.mrf.mxu0  ;;  %5886 = vmatprep.subr.bf16.mxu0 %v6168_v27 }
 0x269   : > { %v2133_v53 = vadd.f32 %v5676_v47, %v7389_v15  ;;  %v2190_v19 = vsel %vm2158_vm12, %v2128_v49, %v2174_v55 }
 0x26a   : > { %v5678_v4 = vpop.f32.mrf.mxu0  ;;  %v2200_v36 = vpack.c.bf16 %v2190_v19, %v2189_v48 }
 0x26b   : > { %v5679_v41 = vadd.f32 %v5678_v4, %v5677_v43  ;;  %v2175_v25 = vmul.f32 0.2, %v2133_v53  ;;  %vm2159_vm13 = vcmp.gt.f32.partialorder %v2133_v53, 0.0  ;;  %5887 = vmatpush3.bf16.msra.mxu0 %v6168_v27 }
 0x26c   : > { %v5680_v26 = vpop.f32.mrf.mxu0  ;;  %5839 = vmatmul.mubr.bf16.gmra.mxu1 %v2200_v36  ;;  %5888 = vmatprep.subr.bf16.mxu0 %v6169_v20 }
 0x26d   : > { %v2136_v45 = vadd.f32 %v5679_v41, %v7389_v15  ;;  %v2191_v38 = vsel %vm2159_vm13, %v2133_v53, %v2175_v25 }
 0x26e   : > { %v5681_v51 = vpop.f32.mrf.mxu0 }
 0x26f   : > { %v2176_v10 = vmul.f32 0.2, %v2136_v45  ;;  %v5682_v42 = vadd.f32 %v5681_v51, %v5680_v26  ;;  %vm2160_vm14 = vcmp.gt.f32.partialorder %v2136_v45, 0.0  ;;  %5889 = vmatpush3.bf16.msra.mxu0 %v6169_v20 }
 0x270   : > { %v5683_v11 = vpop.f32.mrf.mxu0  ;;  %5890 = vmatprep.subr.bf16.mxu0 %v6170_v22 }
 0x271   : > { %v2141_v60 = vadd.f32 %v5682_v42, %v7389_v15  ;;  %v2192_v2 = vsel %vm2160_vm14, %v2136_v45, %v2176_v10 }
 0x272   : > { %v5684_v28 = vpop.f32.mrf.mxu0  ;;  %v2201_v33 = vpack.c.bf16 %v2192_v2, %v2191_v38 }
 0x273   : > { %v5685_v56 = vadd.f32 %v5684_v28, %v5683_v11  ;;  %v2177_v8 = vmul.f32 0.2, %v2141_v60  ;;  %vm2161_vm15 = vcmp.gt.f32.partialorder %v2141_v60, 0.0  ;;  %5891 = vmatpush3.bf16.msra.mxu0 %v6170_v22 }
 0x274   : > { %5842 = vmatprep.mubr.bf16.mxu1 %v2201_v33 }
 0x275   : > { %v2144_v29 = vadd.f32 %v5685_v56, %v7389_v15  ;;  %v2193_v31 = vsel %vm2161_vm15, %v2141_v60, %v2177_v8  ;;  %v6163_v15 = vld [vmem:[%s8322_s7] sm:$0xff]  }
 0x276   : > { %5860 = vmatprep.subr.bf16.mxu1 %v6163_v15 }
 0x277   : > { %v2178_v57 = vmul.f32 0.2, %v2144_v29  ;;  %vm2162_vm0 = vcmp.gt.f32.partialorder %v2144_v29, 0.0  ;;  %5861 = vmatpush3.bf16.msra.mxu1 %v6163_v15 }
 0x279   : > { %v2194_v12 = vsel %vm2162_vm0, %v2144_v29, %v2178_v57 }
 0x27a   : > { %v2202_v0 = vpack.c.bf16 %v2194_v12, %v2193_v31 }
 0x27c   : > { %5843 = vmatmul.mubr.bf16.gmra.mxu1 %v2202_v0 }
 0x30c   : > { %v5832_v54 = vpop.f32.mrf.mxu1 }
 0x30d   : > { %v2317_v9 = vadd.f32 %v5832_v54, %v7452_v32 }
 0x30e   : > { %v2308_v61 = vpop.f32.mrf.mxu1 }
 0x30f   : > { %v2309_v46 = vadd.f32 %v7452_v32, %v2308_v61  ;;  %v2389_v1 = vmul.f32 0.2, %v2317_v9  ;;  %vm2373_vm3 = vcmp.gt.f32.partialorder %v2317_v9, 0.0 }
 0x310   : > { %v5833_v24 = vpop.f32.mrf.mxu1 }
 0x311   : > { %v2320_v59 = vadd.f32 %v5833_v24, %v7452_v32  ;;  %v2387_v58 = vmul.f32 0.2, %v2309_v46  ;;  %vm2371_vm2 = vcmp.gt.f32.partialorder %v2309_v46, 0.0  ;;  %v2405_v30 = vsel %vm2373_vm3, %v2317_v9, %v2389_v1  ;;  %v6173_v1 = vld [vmem:[%s8326_s11 + $0x30] sm:$0xff]  }
 0x312   : > { %v2311_v40 = vpop.f32.mrf.mxu1 }
 0x313   : > { %vm2374_vm1 = vcmp.gt.f32.partialorder %v2320_v59, 0.0  ;;  %v2390_v62 = vmul.f32 0.2, %v2320_v59  ;;  %v2312_v23 = vadd.f32 %v7452_v32, %v2311_v40  ;;  %v2403_v7 = vsel %vm2371_vm2, %v2309_v46, %v2387_v58 }
 0x315   : > { %vm2372_vm4 = vcmp.gt.f32.partialorder %v2312_v23, 0.0  ;;  %v2388_v16 = vmul.f32 0.2, %v2312_v23  ;;  %v2406_v37 = vsel %vm2374_vm1, %v2320_v59, %v2390_v62 }
 0x316   : > { %v2420_v35 = vpack.c.bf16 %v2406_v37, %v2405_v30  ;;  %v6175_v37 = vld [vmem:[%s8326_s11 + $0x20] sm:$0xff]  }
 0x317   : > { %v2404_v52 = vsel %vm2372_vm4, %v2312_v23, %v2388_v16  ;;  %v6171_v23 = vld [vmem:[%s8324_s9] sm:$0xff]   ;;  %v6174_v16 = vld [vmem:[%s8326_s11 + $0x28] sm:$0xff]  }
 0x318   : > { %v2419_v17 = vpack.c.bf16 %v2404_v52, %v2403_v7  ;;  %5892 = vmatprep.subr.bf16.mxu0 %v6171_v23  ;;  %v6176_v7 = vld [vmem:[%s8326_s11 + $0x18] sm:$0xff]   ;;  %v7491_v30 = vld [vmem:[%s8323_s8] ss:$0 sm:$0xff] }
 0x319   : > { %5893 = vmatpush3.bf16.msra.mxu0 %v6171_v23 }
 0x31a   : > { %5862 = vmatprep.mubr.bf16.mxu1 %v2419_v17 }
 0x31b   : > { %5863 = vmatmul.mubr.bf16.vlgmr.msra.gmra.mxu1 %v2420_v35 }
 0x31c   : > { %v5836_v34 = vpop.f32.mrf.mxu1 }
 0x31d   : > { %v2333_v44 = vadd.f32 %v5836_v34, %v7452_v32 }
 0x31e   : > { %v2324_v39 = vpop.f32.mrf.mxu1 }
 0x31f   : > { %v2325_v13 = vadd.f32 %v7452_v32, %v2324_v39  ;;  %v2393_v53 = vmul.f32 0.2, %v2333_v44  ;;  %vm2377_vm7 = vcmp.gt.f32.partialorder %v2333_v44, 0.0 }
 0x320   : > { %v5837_v50 = vpop.f32.mrf.mxu1 }
 0x321   : > { %v2336_v49 = vadd.f32 %v5837_v50, %v7452_v32  ;;  %v2391_v55 = vmul.f32 0.2, %v2325_v13  ;;  %vm2375_vm6 = vcmp.gt.f32.partialorder %v2325_v13, 0.0  ;;  %v2409_v26 = vsel %vm2377_vm7, %v2333_v44, %v2393_v53 }
 0x322   : > { %v2327_v21 = vpop.f32.mrf.mxu1 }
 0x323   : > { %vm2378_vm5 = vcmp.gt.f32.partialorder %v2336_v49, 0.0  ;;  %v2394_v47 = vmul.f32 0.2, %v2336_v49  ;;  %v2328_v43 = vadd.f32 %v7452_v32, %v2327_v21  ;;  %v2407_v4 = vsel %vm2375_vm6, %v2325_v13, %v2391_v55 }
 0x325   : > { %vm2376_vm8 = vcmp.gt.f32.partialorder %v2328_v43, 0.0  ;;  %v2392_v48 = vmul.f32 0.2, %v2328_v43  ;;  %v2410_v19 = vsel %vm2378_vm5, %v2336_v49, %v2394_v47 }
 0x326   : > { %v2422_v25 = vpack.c.bf16 %v2410_v19, %v2409_v26 }
 0x327   : > { %v2408_v36 = vsel %vm2376_vm8, %v2328_v43, %v2392_v48 }
 0x328   : > { %v2421_v41 = vpack.c.bf16 %v2408_v36, %v2407_v4 }
 0x32a   : > { %5866 = vmatprep.mubr.bf16.mxu1 %v2421_v41 }
 0x32b   : > { %5867 = vmatmul.mubr.bf16.gmra.mxu1 %v2422_v25 }
 0x32c   : > { %v5840_v45 = vpop.f32.mrf.mxu1 }
 0x32d   : > { %v2349_v42 = vadd.f32 %v5840_v45, %v7452_v32 }
 0x32e   : > { %v2340_v51 = vpop.f32.mrf.mxu1 }
 0x32f   : > { %v2341_v10 = vadd.f32 %v7452_v32, %v2340_v51  ;;  %v2397_v56 = vmul.f32 0.2, %v2349_v42  ;;  %vm2381_vm11 = vcmp.gt.f32.partialorder %v2349_v42, 0.0 }
 0x330   : > { %v5841_v11 = vpop.f32.mrf.mxu1 }
 0x331   : > { %v2352_v60 = vadd.f32 %v5841_v11, %v7452_v32  ;;  %v2395_v2 = vmul.f32 0.2, %v2341_v10  ;;  %vm2379_vm10 = vcmp.gt.f32.partialorder %v2341_v10, 0.0  ;;  %v2413_v0 = vsel %vm2381_vm11, %v2349_v42, %v2397_v56 }
 0x332   : > { %v2343_v38 = vpop.f32.mrf.mxu1 }
 0x333   : > { %vm2382_vm9 = vcmp.gt.f32.partialorder %v2352_v60, 0.0  ;;  %v2398_v28 = vmul.f32 0.2, %v2352_v60  ;;  %v2344_v33 = vadd.f32 %v7452_v32, %v2343_v38  ;;  %v2411_v57 = vsel %vm2379_vm10, %v2341_v10, %v2395_v2 }
 0x335   : > { %vm2380_vm12 = vcmp.gt.f32.partialorder %v2344_v33, 0.0  ;;  %v2396_v8 = vmul.f32 0.2, %v2344_v33  ;;  %v2414_v29 = vsel %vm2382_vm9, %v2352_v60, %v2398_v28 }
 0x336   : > { %v2424_v18 = vpack.c.bf16 %v2414_v29, %v2413_v0 }
 0x337   : > { %v2412_v31 = vsel %vm2380_vm12, %v2344_v33, %v2396_v8 }
 0x338   : > { %v2423_v12 = vpack.c.bf16 %v2412_v31, %v2411_v57 }
 0x33a   : > { %5870 = vmatprep.mubr.bf16.mxu1 %v2423_v12 }
 0x33b   : > { %5871 = vmatmul.mubr.bf16.gmra.mxu1 %v2424_v18 }
 0x33c   : > { %v5844_v5 = vpop.f32.mrf.mxu1 }
 0x33d   : > { %v2365_v63 = vadd.f32 %v5844_v5, %v7452_v32 }
 0x33e   : > { %v2356_v15 = vpop.f32.mrf.mxu1 }
 0x33f   : > { %v2357_v6 = vadd.f32 %v7452_v32, %v2356_v15  ;;  %v2401_v61 = vmul.f32 0.2, %v2365_v63  ;;  %vm2385_vm15 = vcmp.gt.f32.partialorder %v2365_v63, 0.0 }
 0x340   : > { %v5845_v14 = vpop.f32.mrf.mxu1 }
 0x341   : > { %v2368_v3 = vadd.f32 %v5845_v14, %v7452_v32  ;;  %v2399_v20 = vmul.f32 0.2, %v2357_v6  ;;  %vm2383_vm14 = vcmp.gt.f32.partialorder %v2357_v6, 0.0  ;;  %v2417_v58 = vsel %vm2385_vm15, %v2365_v63, %v2401_v61 }
 0x342   : > { %v2359_v27 = vpop.f32.mrf.mxu1 }
 0x343   : > { %vm2386_vm13 = vcmp.gt.f32.partialorder %v2368_v3, 0.0  ;;  %v2402_v22 = vmul.f32 0.2, %v2368_v3  ;;  %v2360_v54 = vadd.f32 %v7452_v32, %v2359_v27  ;;  %v2415_v24 = vsel %vm2383_vm14, %v2357_v6, %v2399_v20  ;;  %v6172_v32 = vld [vmem:[%s8326_s11 + $0x38] sm:$0xff]  }
 0x344   : > { %5910 = vmatprep.subr.bf16.mxu1 %v6172_v32 }
 0x345   : > { %vm2384_vm0 = vcmp.gt.f32.partialorder %v2360_v54, 0.0  ;;  %v2400_v46 = vmul.f32 0.2, %v2360_v54  ;;  %v2418_v9 = vsel %vm2386_vm13, %v2368_v3, %v2402_v22  ;;  %5911 = vmatpush3.bf16.msra.mxu1 %v6172_v32 }
 0x346   : > { %v2426_v62 = vpack.c.bf16 %v2418_v9, %v2417_v58  ;;  %5912 = vmatprep.subr.bf16.mxu1 %v6173_v1 }
 0x347   : > { %v2416_v59 = vsel %vm2384_vm0, %v2360_v54, %v2400_v46 }
 0x348   : > { %v2425_v40 = vpack.c.bf16 %v2416_v59, %v2415_v24 }
 0x349   : > { %5913 = vmatpush3.bf16.msra.mxu1 %v6173_v1 }
 0x34a   : > { %5874 = vmatprep.mubr.bf16.mxu1 %v2425_v40  ;;  %5914 = vmatprep.subr.bf16.mxu1 %v6174_v16 }
 0x34b   : > { %5875 = vmatmul.mubr.bf16.gmra.mxu1 %v2426_v62 }
 0x34d   : > { %5915 = vmatpush3.bf16.msra.mxu1 %v6174_v16 }
 0x34e   : > { %5916 = vmatprep.subr.bf16.mxu1 %v6175_v37 }
 0x351   : > { %5917 = vmatpush3.bf16.msra.mxu1 %v6175_v37 }
 0x352   : > { %5918 = vmatprep.subr.bf16.mxu1 %v6176_v7 }
 0x355   : > { %5919 = vmatpush3.bf16.msra.mxu1 %v6176_v7 }
 0x3db   : > { %v5864_v52 = vpop.f32.mrf.mxu1 }
 0x3dc   : > { %v2541_v34 = vadd.f32 %v5864_v52, %v7491_v30 }
 0x3dd   : > { %v2532_v17 = vpop.f32.mrf.mxu1 }
 0x3de   : > { %v2533_v35 = vadd.f32 %v7491_v30, %v2532_v17  ;;  %v2613_v55 = vmul.f32 0.2, %v2541_v34  ;;  %vm2597_vm3 = vcmp.gt.f32.partialorder %v2541_v34, 0.0 }
 0x3df   : > { %v5865_v39 = vpop.f32.mrf.mxu1 }
 0x3e0   : > { %v2544_v13 = vadd.f32 %v5865_v39, %v7491_v30  ;;  %v2611_v50 = vmul.f32 0.2, %v2533_v35  ;;  %vm2595_vm2 = vcmp.gt.f32.partialorder %v2533_v35, 0.0  ;;  %v2629_v19 = vsel %vm2597_vm3, %v2541_v34, %v2613_v55  ;;  %v6177_v55 = vld [vmem:[%s8326_s11 + $0x10] sm:$0xff]  }
 0x3e1   : > { %v2535_v44 = vpop.f32.mrf.mxu1  ;;  %5920 = vmatprep.subr.bf16.mxu1 %v6177_v55 }
 0x3e2   : > { %vm2598_vm1 = vcmp.gt.f32.partialorder %v2544_v13, 0.0  ;;  %v2614_v49 = vmul.f32 0.2, %v2544_v13  ;;  %v2536_v21 = vadd.f32 %v7491_v30, %v2535_v44  ;;  %v2627_v53 = vsel %vm2595_vm2, %v2533_v35, %v2611_v50  ;;  %5921 = vmatpush3.bf16.msra.mxu1 %v6177_v55 }
 0x3e4   : > { %vm2596_vm4 = vcmp.gt.f32.partialorder %v2536_v21, 0.0  ;;  %v2612_v47 = vmul.f32 0.2, %v2536_v21  ;;  %v2630_v43 = vsel %vm2598_vm1, %v2544_v13, %v2614_v49 }
 0x3e5   : > { %v2644_v36 = vpack.c.bf16 %v2630_v43, %v2629_v19  ;;  %v6180_v43 = vld [vmem:[%s8328_s13 + $0x70] ss:$8 sps:$4 sm:$0xff]   ;;  %v6183_v19 = vld [vmem:[%s8328_s13 + $0x60] ss:$8 sps:$4 sm:$0xff]  }
 0x3e6   : > { %v2628_v48 = vsel %vm2596_vm4, %v2536_v21, %v2612_v47  ;;  %v8367_v21 = vmov 0   ;;  %v6179_v47 = vld [vmem:[%s8326_s11] sm:$0xff]  }
 0x3e7   : > { %v2643_v4 = vpack.c.bf16 %v2628_v48, %v2627_v53  ;;  %v6182_v53 = vld [vmem:[%s8328_s13 + $0x74] ss:$8 sps:$4 sm:$0xff]   ;;  %v6185_v48 = vld [vmem:[%s8328_s13 + $0x64] ss:$8 sps:$4 sm:$0xff]  }
 0x3e8   : > { %3207 = vmatprep.subr.bf16.mxu0 %v6182_v53 }
 0x3e9   : > { %5894 = vmatprep.mubr.bf16.mxu0 %v2643_v4  ;;  %v6188_v4 = vld [vmem:[%s8328_s13 + $0x54] ss:$8 sps:$4 sm:$0xff]  }
 0x3ea   : > { %5895 = vmatmul.mubr.bf16.vlgmr.msra.gmra.mxu0 %v2644_v36  ;;  %v6186_v36 = vld [vmem:[%s8328_s13 + $0x50] ss:$8 sps:$4 sm:$0xff]  }
 0x3eb   : > { %v5868_v41 = vpop.f32.mrf.mxu1  ;;  %3208 = vmatpush1.bf16.msra.mxu0 %v6180_v43 }
 0x3ec   : > { %v2557_v45 = vadd.f32 %v5868_v41, %v7491_v30  ;;  %3209 = vmatprep.subr.bf16.mxu0 %v6185_v48  ;;  %v6191_v41 = vld [vmem:[%s8328_s13 + $0x44] ss:$8 sps:$4 sm:$0xff]  }
 0x3ed   : > { %v2548_v26 = vpop.f32.mrf.mxu1 }
 0x3ee   : > { %v2549_v25 = vadd.f32 %v7491_v30, %v2548_v26  ;;  %v2617_v2 = vmul.f32 0.2, %v2557_v45  ;;  %vm2601_vm7 = vcmp.gt.f32.partialorder %v2557_v45, 0.0  ;;  %v6189_v26 = vld [vmem:[%s8328_s13 + $0x40] ss:$8 sps:$4 sm:$0xff]  }
 0x3ef   : > { %v5869_v51 = vpop.f32.mrf.mxu1  ;;  %3210 = vmatpush1.bf16.msra.mxu0 %v6183_v19 }
 0x3f0   : > { %v2560_v10 = vadd.f32 %v5869_v51, %v7491_v30  ;;  %v2615_v11 = vmul.f32 0.2, %v2549_v25  ;;  %vm2599_vm6 = vcmp.gt.f32.partialorder %v2549_v25, 0.0  ;;  %v2633_v57 = vsel %vm2601_vm7, %v2557_v45, %v2617_v2  ;;  %3211 = vmatprep.subr.bf16.mxu0 %v6188_v4  ;;  %v6192_v45 = vld [vmem:[%s8328_s13 + $0x30] ss:$8 sps:$4 sm:$0xff]  }
 0x3f1   : > { %v2551_v42 = vpop.f32.mrf.mxu1 }
 0x3f2   : > { %vm2602_vm5 = vcmp.gt.f32.partialorder %v2560_v10, 0.0  ;;  %v2618_v60 = vmul.f32 0.2, %v2560_v10  ;;  %v2552_v38 = vadd.f32 %v7491_v30, %v2551_v42  ;;  %v2631_v56 = vsel %vm2599_vm6, %v2549_v25, %v2615_v11  ;;  %v6194_v25 = vld [vmem:[%s8328_s13 + $0x34] ss:$8 sps:$4 sm:$0xff]  }
 0x3f3   : > { %3212 = vmatpush1.bf16.msra.mxu0 %v6186_v36 }
 0x3f4   : > { %vm2600_vm8 = vcmp.gt.f32.partialorder %v2552_v38, 0.0  ;;  %v2616_v28 = vmul.f32 0.2, %v2552_v38  ;;  %v2634_v33 = vsel %vm2602_vm5, %v2560_v10, %v2618_v60  ;;  %3213 = vmatprep.subr.bf16.mxu0 %v6191_v41  ;;  %v7552_v10 = vld [vmem:[%s8325_s10] ss:$0 sm:$0xff] }
 0x3f5   : > { %v2646_v31 = vpack.c.bf16 %v2634_v33, %v2633_v57 }
 0x3f6   : > { %v2632_v8 = vsel %vm2600_vm8, %v2552_v38, %v2616_v28 }
 0x3f7   : > { %v2645_v29 = vpack.c.bf16 %v2632_v8, %v2631_v56  ;;  %3214 = vmatpush1.bf16.msra.mxu0 %v6189_v26 }
 0x3f8   : > { %3215 = vmatprep.subr.bf16.mxu0 %v6194_v25 }
 0x3f9   : > { %5898 = vmatprep.mubr.bf16.mxu0 %v2645_v29 }
 0x3fa   : > { %5899 = vmatmul.mubr.bf16.gmra.mxu0 %v2646_v31 }
 0x3fb   : > { %v5872_v12 = vpop.f32.mrf.mxu1  ;;  %3216 = vmatpush1.bf16.msra.mxu0 %v6192_v45 }
 0x3fc   : > { %v2573_v5 = vadd.f32 %v5872_v12, %v7491_v30 }
 0x3fd   : > { %v2564_v0 = vpop.f32.mrf.mxu1 }
 0x3fe   : > { %v2565_v18 = vadd.f32 %v7491_v30, %v2564_v0  ;;  %v2621_v20 = vmul.f32 0.2, %v2573_v5  ;;  %vm2605_vm11 = vcmp.gt.f32.partialorder %v2573_v5, 0.0 }
 0x3ff   : > { %v5873_v15 = vpop.f32.mrf.mxu1 }
 0x400   : > { %v2576_v6 = vadd.f32 %v5873_v15, %v7491_v30  ;;  %v2619_v14 = vmul.f32 0.2, %v2565_v18  ;;  %vm2603_vm10 = vcmp.gt.f32.partialorder %v2565_v18, 0.0  ;;  %v2637_v24 = vsel %vm2605_vm11, %v2573_v5, %v2621_v20 }
 0x401   : > { %v2567_v63 = vpop.f32.mrf.mxu1 }
 0x402   : > { %vm2606_vm9 = vcmp.gt.f32.partialorder %v2576_v6, 0.0  ;;  %v2622_v3 = vmul.f32 0.2, %v2576_v6  ;;  %v2568_v27 = vadd.f32 %v7491_v30, %v2567_v63  ;;  %v2635_v61 = vsel %vm2603_vm10, %v2565_v18, %v2619_v14 }
 0x404   : > { %vm2604_vm12 = vcmp.gt.f32.partialorder %v2568_v27, 0.0  ;;  %v2620_v22 = vmul.f32 0.2, %v2568_v27  ;;  %v2638_v54 = vsel %vm2606_vm9, %v2576_v6, %v2622_v3 }
 0x405   : > { %v2648_v59 = vpack.c.bf16 %v2638_v54, %v2637_v24 }
 0x406   : > { %v2636_v46 = vsel %vm2604_vm12, %v2568_v27, %v2620_v22 }
 0x407   : > { %v2647_v9 = vpack.c.bf16 %v2636_v46, %v2635_v61 }
 0x409   : > { %5902 = vmatprep.mubr.bf16.mxu0 %v2647_v9 }
 0x40a   : > { %5903 = vmatmul.mubr.bf16.gmra.mxu0 %v2648_v59 }
 0x40b   : > { %v5876_v40 = vpop.f32.mrf.mxu1 }
 0x40c   : > { %v2589_v23 = vadd.f32 %v5876_v40, %v7491_v30 }
 0x40d   : > { %v2580_v58 = vpop.f32.mrf.mxu1 }
 0x40e   : > { %v2581_v62 = vadd.f32 %v7491_v30, %v2580_v58  ;;  %v2625_v17 = vmul.f32 0.2, %v2589_v23  ;;  %vm2609_vm15 = vcmp.gt.f32.partialorder %v2589_v23, 0.0 }
 0x40f   : > { %v5877_v32 = vpop.f32.mrf.mxu1 }
 0x410   : > { %v2592_v1 = vadd.f32 %v5877_v32, %v7491_v30  ;;  %v2623_v37 = vmul.f32 0.2, %v2581_v62  ;;  %vm2607_vm14 = vcmp.gt.f32.partialorder %v2581_v62, 0.0  ;;  %v2641_v50 = vsel %vm2609_vm15, %v2589_v23, %v2625_v17 }
 0x411   : > { %v2583_v16 = vpop.f32.mrf.mxu1 }
 0x412   : > { %vm2610_vm13 = vcmp.gt.f32.partialorder %v2592_v1, 0.0  ;;  %v2626_v7 = vmul.f32 0.2, %v2592_v1  ;;  %v2584_v52 = vadd.f32 %v7491_v30, %v2583_v16  ;;  %v2639_v39 = vsel %vm2607_vm14, %v2581_v62, %v2623_v37  ;;  %v6178_v30 = vld [vmem:[%s8326_s11 + $0x8] sm:$0xff]  }
 0x413   : > { %5922 = vmatprep.subr.bf16.mxu1 %v6178_v30 }
 0x414   : > { %vm2608_vm0 = vcmp.gt.f32.partialorder %v2584_v52, 0.0  ;;  %v2624_v35 = vmul.f32 0.2, %v2584_v52  ;;  %v2642_v34 = vsel %vm2610_vm13, %v2592_v1, %v2626_v7  ;;  %5923 = vmatpush3.bf16.msra.mxu1 %v6178_v30 }
 0x415   : > { %v2650_v49 = vpack.c.bf16 %v2642_v34, %v2641_v50  ;;  %5924 = vmatprep.subr.bf16.mxu1 %v6179_v47 }
 0x416   : > { %v2640_v13 = vsel %vm2608_vm0, %v2584_v52, %v2624_v35 }
 0x417   : > { %v2649_v44 = vpack.c.bf16 %v2640_v13, %v2639_v39 }
 0x418   : > { %5925 = vmatpush3.bf16.msra.mxu1 %v6179_v47 }
 0x419   : > { %5906 = vmatprep.mubr.bf16.mxu0 %v2649_v44 }
 0x41a   : > { %5907 = vmatmul.mubr.bf16.gmra.mxu0 %v2650_v49 }
 0x41b   : > { %3239 = vmatprep.mubr.bf16.mxu0 %v8367_v21 }
 0x4aa   : > { %v5896_v51 = vpop.f32.mrf.mxu0 }
 0x4ab   : > { %v2765_v60 = vadd.f32 %v5896_v51, %v7552_v10 }
 0x4ac   : > { %v2756_v42 = vpop.f32.mrf.mxu0 }
 0x4ad   : > { %v2757_v11 = vadd.f32 %v7552_v10, %v2756_v42  ;;  %v2837_v29 = vmul.f32 0.2, %v2765_v60  ;;  %vm2821_vm3 = vcmp.gt.f32.partialorder %v2765_v60, 0.0 }
 0x4ae   : > { %v5897_v38 = vpop.f32.mrf.mxu0 }
 0x4af   : > { %v2768_v2 = vadd.f32 %v5897_v38, %v7552_v10  ;;  %v2835_v33 = vmul.f32 0.2, %v2757_v11  ;;  %vm2819_vm2 = vcmp.gt.f32.partialorder %v2757_v11, 0.0  ;;  %v2853_v18 = vsel %vm2821_vm3, %v2765_v60, %v2837_v29  ;;  %v6197_v29 = vld [vmem:[%s8328_s13 + $0x24] ss:$8 sps:$4 sm:$0xff]  }
 0x4b0   : > { %v2759_v28 = vpop.f32.mrf.mxu0  ;;  %3217 = vmatprep.subr.bf16.mxu0 %v6197_v29 }
 0x4b1   : > { %vm2822_vm1 = vcmp.gt.f32.partialorder %v2768_v2, 0.0  ;;  %v2838_v56 = vmul.f32 0.2, %v2768_v2  ;;  %v2760_v8 = vadd.f32 %v7552_v10, %v2759_v28  ;;  %v2851_v12 = vsel %vm2819_vm2, %v2757_v11, %v2835_v33 }
 0x4b3   : > { %vm2820_vm4 = vcmp.gt.f32.partialorder %v2760_v8, 0.0  ;;  %v2836_v57 = vmul.f32 0.2, %v2760_v8  ;;  %v2854_v31 = vsel %vm2822_vm1, %v2768_v2, %v2838_v56 }
 0x4b4   : > { %v2868_v15 = vpack.c.bf16 %v2854_v31, %v2853_v18  ;;  %v6198_v31 = vld [vmem:[%s8328_s13 + $0x10] ss:$8 sps:$4 sm:$0xff]   ;;  %v6204_v18 = vld [vmem:[%s8330_s15 + $0x188] ss:$28 sps:$4 sm:$0xff]  }
 0x4b5   : > { %v2852_v0 = vsel %vm2820_vm4, %v2760_v8, %v2836_v57  ;;  %v6200_v57 = vld [vmem:[%s8328_s13 + $0x14] ss:$8 sps:$4 sm:$0xff]  }
 0x4b6   : > { %v2867_v5 = vpack.c.bf16 %v2852_v0, %v2851_v12  ;;  %v6203_v12 = vld [vmem:[%s8328_s13 + $0x4] ss:$8 sps:$4 sm:$0xff]   ;;  %v6201_v0 = vld [vmem:[%s8328_s13] ss:$8 sps:$4 sm:$0xff]  }
 0x4b8   : > { %5926 = vmatprep.mubr.bf16.mxu1 %v2867_v5  ;;  %v6206_v5 = vld [vmem:[%s8330_s15 + $0x18c] ss:$28 sps:$4 sm:$0xff]  }
 0x4b9   : > { %5927 = vmatmul.mubr.bf16.vlgmr.msra.gmra.mxu1 %v2868_v15  ;;  %v6209_v15 = vld [vmem:[%s8330_s15 + $0x194] ss:$28 sps:$4 sm:$0xff]   ;;  %4173 = vmatprep.subr.bf16.mxu1 %v6206_v5 }
 0x4ba   : > { %v5900_v6 = vpop.f32.mrf.mxu0  ;;  %4174 = vmatpush1.bf16.msra.mxu1 %v6204_v18 }
 0x4bb   : > { %v2781_v3 = vadd.f32 %v5900_v6, %v7552_v10  ;;  %v6212_v6 = vld [vmem:[%s8330_s15 + $0x154] ss:$28 sps:$4 sm:$0xff]  }
 0x4bc   : > { %v2772_v63 = vpop.f32.mrf.mxu0  ;;  %4175 = vmatprep.subr.bf16.mxu1 %v6212_v6  ;;  %v6231_v6 = vld [vmem:[%s8330_s15 + $0xb0] ss:$28 sps:$4 sm:$0xff]  }
 0x4bd   : > { %v2773_v14 = vadd.f32 %v7552_v10, %v2772_v63  ;;  %v2841_v9 = vmul.f32 0.2, %v2781_v3  ;;  %vm2825_vm7 = vcmp.gt.f32.partialorder %v2781_v3, 0.0  ;;  %v6210_v63 = vld [vmem:[%s8330_s15 + $0x150] ss:$28 sps:$4 sm:$0xff]  }
 0x4be   : > { %v5901_v27 = vpop.f32.mrf.mxu0  ;;  %4176 = vmatpush1.bf16.msra.mxu1 %v6210_v63 }
 0x4bf   : > { %v2784_v20 = vadd.f32 %v5901_v27, %v7552_v10  ;;  %v2839_v54 = vmul.f32 0.2, %v2773_v14  ;;  %vm2823_vm6 = vcmp.gt.f32.partialorder %v2773_v14, 0.0  ;;  %v2857_v23 = vsel %vm2825_vm7, %v2781_v3, %v2841_v9  ;;  %v6216_v3 = vld [vmem:[%s8330_s15 + $0x118] ss:$28 sps:$4 sm:$0xff]  }
 0x4c0   : > { %v2775_v22 = vpop.f32.mrf.mxu0  ;;  %v6224_v27 = vld [vmem:[%s8330_s15 + $0xe4] ss:$28 sps:$4 sm:$0xff]   ;;  %v6242_v9 = vld [vmem:[%s8330_s15 + $0x3c] ss:$28 sps:$4 sm:$0xff]  }
 0x4c1   : > { %vm2826_vm5 = vcmp.gt.f32.partialorder %v2784_v20, 0.0  ;;  %v2842_v61 = vmul.f32 0.2, %v2784_v20  ;;  %v2776_v46 = vadd.f32 %v7552_v10, %v2775_v22  ;;  %v2855_v40 = vsel %vm2823_vm6, %v2773_v14, %v2839_v54  ;;  %v6218_v14 = vld [vmem:[%s8330_s15 + $0x11c] ss:$28 sps:$4 sm:$0xff]  }
 0x4c2   : > { %4177 = vmatprep.subr.bf16.mxu1 %v6218_v14  ;;  %v6230_v22 = vld [vmem:[%s8330_s15 + $0xac] ss:$28 sps:$4 sm:$0xff]   ;;  %v6239_v14 = vld [vmem:[%s8330_s15 + $0x7c] ss:$28 sps:$4 sm:$0xff]  }
 0x4c3   : > { %vm2824_vm8 = vcmp.gt.f32.partialorder %v2776_v46, 0.0  ;;  %v2840_v24 = vmul.f32 0.2, %v2776_v46  ;;  %v2858_v59 = vsel %vm2826_vm5, %v2784_v20, %v2842_v61  ;;  %4178 = vmatpush1.bf16.msra.mxu1 %v6216_v3  ;;  %v6222_v20 = vld [vmem:[%s8330_s15 + $0xe0] ss:$28 sps:$4 sm:$0xff]  }
 0x4c4   : > { %v2870_v32 = vpack.c.bf16 %v2858_v59, %v2857_v23  ;;  %4179 = vmatprep.subr.bf16.mxu1 %v6224_v27  ;;  %v6228_v54 = vld [vmem:[%s8330_s15 + $0xa8] ss:$28 sps:$4 sm:$0xff]   ;;  %v6236_v61 = vld [vmem:[%s8330_s15 + $0x74] ss:$28 sps:$4 sm:$0xff]  }
 0x4c5   : > { %v2856_v58 = vsel %vm2824_vm8, %v2776_v46, %v2840_v24  ;;  %v6234_v46 = vld [vmem:[%s8330_s15 + $0x70] ss:$28 sps:$4 sm:$0xff]   ;;  %v6240_v24 = vld [vmem:[%s8330_s15 + $0x38] ss:$28 sps:$4 sm:$0xff]   ;;  %v6248_v59 = vld [vmem:[%s8330_s15 + $0x4] ss:$28 sps:$4 sm:$0xff]  }
 0x4c6   : > { %v2869_v62 = vpack.c.bf16 %v2856_v58, %v2855_v40  ;;  %v6246_v40 = vld [vmem:[%s8330_s15] ss:$28 sps:$4 sm:$0xff]   ;;  %v6254_v58 = vld [vmem:[%s8330_s15 + $0x34c] ss:$28 sps:$4 sm:$0xff]   ;;  %v6260_v23 = vld [vmem:[%s8330_s15 + $0x314] ss:$28 sps:$4 sm:$0xff]  }
 0x4c7   : > { %4180 = vmatpush1.bf16.msra.mxu1 %v6222_v20  ;;  %v6237_v20 = vld [vmem:[%s8330_s15 + $0x78] ss:$28 sps:$4 sm:$0xff]  }
 0x4c8   : > { %5930 = vmatprep.mubr.bf16.mxu1 %v2869_v62  ;;  %4181 = vmatprep.subr.bf16.mxu1 %v6230_v22  ;;  %v6252_v62 = vld [vmem:[%s8330_s15 + $0x348] ss:$28 sps:$4 sm:$0xff]  }
 0x4c9   : > { %5931 = vmatmul.mubr.bf16.gmra.mxu1 %v2870_v32  ;;  %v6258_v32 = vld [vmem:[%s8330_s15 + $0x310] ss:$28 sps:$4 sm:$0xff]  }
 0x4ca   : > { %v5904_v1 = vpop.f32.mrf.mxu0 }
 0x4cb   : > { %v2797_v7 = vadd.f32 %v5904_v1, %v7552_v10  ;;  %4182 = vmatpush1.bf16.msra.mxu1 %v6228_v54  ;;  %v6266_v1 = vld [vmem:[%s8330_s15 + $0x2dc] ss:$28 sps:$4 sm:$0xff]   ;;  %v6245_v54 = vld [vmem:[%s8330_s15 + $0x44] ss:$28 sps:$4 sm:$0xff]  }
 0x4cc   : > { %v2788_v16 = vpop.f32.mrf.mxu0  ;;  %4183 = vmatprep.subr.bf16.mxu1 %v6236_v61 }
 0x4cd   : > { %v2789_v37 = vadd.f32 %v7552_v10, %v2788_v16  ;;  %v2845_v44 = vmul.f32 0.2, %v2797_v7  ;;  %vm2829_vm11 = vcmp.gt.f32.partialorder %v2797_v7, 0.0  ;;  %v6264_v16 = vld [vmem:[%s8330_s15 + $0x2d8] ss:$28 sps:$4 sm:$0xff]  }
 0x4ce   : > { %v5905_v52 = vpop.f32.mrf.mxu0 }
 0x4cf   : > { %v2800_v17 = vadd.f32 %v5905_v52, %v7552_v10  ;;  %v2843_v34 = vmul.f32 0.2, %v2789_v37  ;;  %vm2827_vm10 = vcmp.gt.f32.partialorder %v2789_v37, 0.0  ;;  %v2861_v47 = vsel %vm2829_vm11, %v2797_v7, %v2845_v44  ;;  %4184 = vmatpush1.bf16.msra.mxu1 %v6234_v46  ;;  %v6270_v7 = vld [vmem:[%s8330_s15 + $0x2a0] ss:$28 sps:$4 sm:$0xff]  }
 0x4d0   : > { %v2791_v35 = vpop.f32.mrf.mxu0  ;;  %4185 = vmatprep.subr.bf16.mxu1 %v6242_v9  ;;  %v6278_v52 = vld [vmem:[%s8330_s15 + $0x26c] ss:$28 sps:$4 sm:$0xff]  }
 0x4d1   : > { %vm2830_vm9 = vcmp.gt.f32.partialorder %v2800_v17, 0.0  ;;  %v2846_v39 = vmul.f32 0.2, %v2800_v17  ;;  %v2792_v13 = vadd.f32 %v7552_v10, %v2791_v35  ;;  %v2859_v55 = vsel %vm2827_vm10, %v2789_v37, %v2843_v34  ;;  %v6272_v37 = vld [vmem:[%s8330_s15 + $0x2a4] ss:$28 sps:$4 sm:$0xff]  }
 0x4d2   : > { %v7672_v34 = vld [vmem:[%s8327_s12] ss:$0 sm:$0xff] }
 0x4d3   : > { %vm2828_vm12 = vcmp.gt.f32.partialorder %v2792_v13, 0.0  ;;  %v2844_v50 = vmul.f32 0.2, %v2792_v13  ;;  %v2862_v49 = vsel %vm2830_vm9, %v2800_v17, %v2846_v39  ;;  %4186 = vmatpush1.bf16.msra.mxu1 %v6240_v24  ;;  %v6276_v17 = vld [vmem:[%s8330_s15 + $0x268] ss:$28 sps:$4 sm:$0xff]  }
 0x4d4   : > { %v2872_v53 = vpack.c.bf16 %v2862_v49, %v2861_v47  ;;  %4187 = vmatprep.subr.bf16.mxu1 %v6248_v59  ;;  %v6243_v59 = vld [vmem:[%s8330_s15 + $0x40] ss:$28 sps:$4 sm:$0xff]  }
 0x4d5   : > { %v2860_v30 = vsel %vm2828_vm12, %v2792_v13, %v2844_v50 }
 0x4d6   : > { %v2871_v43 = vpack.c.bf16 %v2860_v30, %v2859_v55 }
 0x4d7   : > { %4188 = vmatpush1.bf16.msra.mxu1 %v6246_v40 }
 0x4d8   : > { %5934 = vmatprep.mubr.bf16.mxu1 %v2871_v43  ;;  %4189 = vmatprep.subr.bf16.mxu1 %v6254_v58 }
 0x4d9   : > { %5935 = vmatmul.mubr.bf16.gmra.mxu1 %v2872_v53 }
 0x4da   : > { %v5908_v48 = vpop.f32.mrf.mxu0 }
 0x4db   : > { %v2813_v36 = vadd.f32 %v5908_v48, %v7552_v10  ;;  %4190 = vmatpush2.bf16.msra.mxu1 %v6252_v62  ;;  %v6251_v62 = vld [vmem:[%s8330_s15 + $0xc] ss:$28 sps:$4 sm:$0xff]  }
 0x4dc   : > { %v2804_v19 = vpop.f32.mrf.mxu0  ;;  %4191 = vmatprep.subr.bf16.mxu1 %v6260_v23 }
 0x4dd   : > { %v2805_v4 = vadd.f32 %v7552_v10, %v2804_v19  ;;  %v2849_v11 = vmul.f32 0.2, %v2813_v36  ;;  %vm2833_vm15 = vcmp.gt.f32.partialorder %v2813_v36, 0.0  ;;  %v6207_v19 = vld [vmem:[%s8330_s15 + $0x190] ss:$28 sps:$4 sm:$0xff]  }
 0x4de   : > { %v5909_v41 = vpop.f32.mrf.mxu0 }
 0x4df   : > { %v2816_v26 = vadd.f32 %v5909_v41, %v7552_v10  ;;  %v2847_v45 = vmul.f32 0.2, %v2805_v4  ;;  %vm2831_vm14 = vcmp.gt.f32.partialorder %v2805_v4, 0.0  ;;  %v2865_v33 = vsel %vm2833_vm15, %v2813_v36, %v2849_v11  ;;  %4192 = vmatpush2.bf16.msra.mxu1 %v6258_v32  ;;  %v6215_v36 = vld [vmem:[%s8330_s15 + $0x15c] ss:$28 sps:$4 sm:$0xff]  }
 0x4e0   : > { %v2807_v25 = vpop.f32.mrf.mxu0  ;;  %4193 = vmatprep.subr.bf16.mxu1 %v6266_v1 }
 0x4e1   : > { %vm2834_vm13 = vcmp.gt.f32.partialorder %v2816_v26, 0.0  ;;  %v2850_v51 = vmul.f32 0.2, %v2816_v26  ;;  %v2808_v42 = vadd.f32 %v7552_v10, %v2807_v25  ;;  %v2863_v2 = vsel %vm2831_vm14, %v2805_v4, %v2847_v45  ;;  %v6195_v10 = vld [vmem:[%s8328_s13 + $0x20] ss:$8 sps:$4 sm:$0xff]  }
 0x4e2   : > { %3218 = vmatpush1.bf16.msra.mxu0 %v6195_v10  ;;  %v6213_v25 = vld [vmem:[%s8330_s15 + $0x158] ss:$28 sps:$4 sm:$0xff]  }
 0x4e3   : > { %vm2832_vm0 = vcmp.gt.f32.partialorder %v2808_v42, 0.0  ;;  %v2848_v60 = vmul.f32 0.2, %v2808_v42  ;;  %v2866_v38 = vsel %vm2834_vm13, %v2816_v26, %v2850_v51  ;;  %3219 = vmatprep.subr.bf16.mxu0 %v6200_v57  ;;  %4194 = vmatpush2.bf16.msra.mxu1 %v6264_v16  ;;  %v6221_v51 = vld [vmem:[%s8330_s15 + $0x124] ss:$28 sps:$4 sm:$0xff]  }
 0x4e4   : > { %v2874_v8 = vpack.c.bf16 %v2866_v38, %v2865_v33  ;;  %4195 = vmatprep.subr.bf16.mxu1 %v6272_v37  ;;  %v6225_v57 = vld [vmem:[%s8330_s15 + $0xe8] ss:$28 sps:$4 sm:$0xff]   ;;  %v6257_v37 = vld [vmem:[%s8330_s15 + $0x354] ss:$28 sps:$4 sm:$0xff]  }
 0x4e5   : > { %v2864_v28 = vsel %vm2832_vm0, %v2808_v42, %v2848_v60  ;;  %v6249_v16 = vld [vmem:[%s8330_s15 + $0x8] ss:$28 sps:$4 sm:$0xff]  }
 0x4e6   : > { %v2873_v56 = vpack.c.bf16 %v2864_v28, %v2863_v2  ;;  %3220 = vmatpush1.bf16.msra.mxu0 %v6198_v31  ;;  %v6219_v2 = vld [vmem:[%s8330_s15 + $0x120] ss:$28 sps:$4 sm:$0xff]   ;;  %v6233_v31 = vld [vmem:[%s8330_s15 + $0xb4] ss:$28 sps:$4 sm:$0xff]  }
 0x4e7   : > { %3221 = vmatprep.subr.bf16.mxu0 %v6203_v12  ;;  %4196 = vmatpush2.bf16.msra.mxu1 %v6270_v7 }
 0x4e8   : > { %5938 = vmatprep.mubr.bf16.mxu1 %v2873_v56  ;;  %4197 = vmatprep.subr.bf16.mxu1 %v6278_v52  ;;  %v6227_v56 = vld [vmem:[%s8330_s15 + $0xec] ss:$28 sps:$4 sm:$0xff]  }
 0x4e9   : > { %5939 = vmatmul.mubr.bf16.gmra.mxu1 %v2874_v8 }
 0x4ea   : > { %3222 = vmatpush1.bf16.msra.mxu0 %v6201_v0 }
 0x4eb   : > { %4286 = vmatprep.subr.bf16.mxu0 %v6209_v15  ;;  %4198 = vmatpush2.bf16.msra.mxu1 %v6276_v17 }
 0x579   : > { %v5928_v35 = vpop.f32.mrf.mxu1 }
 0x57a   : > { %v2989_v43 = vadd.f32 %v5928_v35, %v7672_v34 }
 0x57b   : > { %v2980_v39 = vpop.f32.mrf.mxu1 }
 0x57c   : > { %v2981_v13 = vadd.f32 %v7672_v34, %v2980_v39  ;;  %v3061_v26 = vmul.f32 0.2, %v2989_v43  ;;  %vm3045_vm4 = vcmp.gt.f32.partialorder %v2989_v43, 0.0 }
 0x57d   : > { %v5929_v44 = vpop.f32.mrf.mxu1 }
 0x57e   : > { %v3059_v49 = vmul.f32 0.2, %v2981_v13  ;;  %vm3043_vm1 = vcmp.gt.f32.partialorder %v2981_v13, 0.0  ;;  %v2992_v30 = vadd.f32 %v5929_v44, %v7672_v34  ;;  %v3077_v38 = vsel %vm3045_vm4, %v2989_v43, %v3061_v26  ;;  %v6269_v43 = vld [vmem:[%s8330_s15 + $0x2e4] ss:$28 sps:$4 sm:$0xff]  }
 0x57f   : > { %v2983_v50 = vpop.f32.mrf.mxu1 }
 0x580   : > { %v2984_v55 = vadd.f32 %v7672_v34, %v2983_v50  ;;  %v3075_v53 = vsel %vm3043_vm1, %v2981_v13, %v3059_v49  ;;  %v3062_v41 = vmul.f32 0.2, %v2992_v30  ;;  %vm3046_vm3 = vcmp.gt.f32.partialorder %v2992_v30, 0.0  ;;  %v6255_v13 = vld [vmem:[%s8330_s15 + $0x350] ss:$28 sps:$4 sm:$0xff]  }
 0x581   : > { %v6263_v50 = vld [vmem:[%s8330_s15 + $0x31c] ss:$28 sps:$4 sm:$0xff]  }
 0x582   : > { %vm3044_vm2 = vcmp.gt.f32.partialorder %v2984_v55, 0.0  ;;  %v3060_v47 = vmul.f32 0.2, %v2984_v55  ;;  %v3078_v42 = vsel %vm3046_vm3, %v2992_v30, %v3062_v41  ;;  %v6261_v30 = vld [vmem:[%s8330_s15 + $0x318] ss:$28 sps:$4 sm:$0xff]  }
 0x583   : > { %v3092_v33 = vpack.c.bf16 %v3078_v42, %v3077_v38 }
 0x584   : > { %v3076_v48 = vsel %vm3044_vm2, %v2984_v55, %v3060_v47 }
 0x585   : > { %v3091_v4 = vpack.c.bf16 %v3076_v48, %v3075_v53 }
 0x587   : > { %3240 = vmatmul.mubr.bf16.vlgmr.msra.gmra.mxu0 %v3091_v4 }
 0x588   : > { %3249 = vmatprep.mubr.bf16.mxu0 %v8367_v21  ;;  %4287 = vmatpush1.bf16.msra.mxu0 %v6207_v19 }
 0x589   : > { %v5932_v45 = vpop.f32.mrf.mxu1  ;;  %4288 = vmatprep.subr.bf16.mxu0 %v6215_v36  ;;  %v6267_v36 = vld [vmem:[%s8330_s15 + $0x2e0] ss:$28 sps:$4 sm:$0xff]  }
 0x58a   : > { %v3005_v18 = vadd.f32 %v5932_v45, %v7672_v34 }
 0x58b   : > { %v2996_v11 = vpop.f32.mrf.mxu1 }
 0x58c   : > { %v2997_v60 = vadd.f32 %v7672_v34, %v2996_v11  ;;  %4289 = vmatpush1.bf16.msra.mxu0 %v6213_v25  ;;  %v3065_v27 = vmul.f32 0.2, %v3005_v18  ;;  %vm3049_vm8 = vcmp.gt.f32.partialorder %v3005_v18, 0.0  ;;  %v6275_v25 = vld [vmem:[%s8330_s15 + $0x2ac] ss:$28 sps:$4 sm:$0xff]  }
 0x58d   : > { %v5933_v28 = vpop.f32.mrf.mxu1  ;;  %4290 = vmatprep.subr.bf16.mxu0 %v6221_v51  ;;  %v6273_v11 = vld [vmem:[%s8330_s15 + $0x2a8] ss:$28 sps:$4 sm:$0xff]  }
 0x58e   : > { %v3063_v29 = vmul.f32 0.2, %v2997_v60  ;;  %vm3047_vm5 = vcmp.gt.f32.partialorder %v2997_v60, 0.0  ;;  %v3008_v12 = vadd.f32 %v5933_v28, %v7672_v34  ;;  %v3081_v9 = vsel %vm3049_vm8, %v3005_v18, %v3065_v27  ;;  %v6287_v18 = vld [vmem:[%s8330_s15 + $0x23c] ss:$28 sps:$4 sm:$0xff]  }
 0x58f   : > { %v2999_v8 = vpop.f32.mrf.mxu1  ;;  %3250 = vmatmul.mubr.bf16.gmra.mxu0 %v3092_v33  ;;  %v6299_v27 = vld [vmem:[%s8330_s15 + $0x1cc] ss:$28 sps:$4 sm:$0xff]  }
 0x590   : > { %v3000_v10 = vadd.f32 %v7672_v34, %v2999_v8  ;;  %3259 = vmatprep.mubr.bf16.mxu0 %v8367_v21  ;;  %4291 = vmatpush1.bf16.msra.mxu0 %v6219_v2  ;;  %v3079_v5 = vsel %vm3047_vm5, %v2997_v60, %v3063_v29  ;;  %v3066_v3 = vmul.f32 0.2, %v3008_v12  ;;  %vm3050_vm7 = vcmp.gt.f32.partialorder %v3008_v12, 0.0  ;;  %v6281_v60 = vld [vmem:[%s8330_s15 + $0x274] ss:$28 sps:$4 sm:$0xff]  }
 0x591   : > { %4292 = vmatprep.subr.bf16.mxu0 %v6227_v56  ;;  %v6279_v8 = vld [vmem:[%s8330_s15 + $0x270] ss:$28 sps:$4 sm:$0xff]  }
 0x592   : > { %vm3048_vm6 = vcmp.gt.f32.partialorder %v3000_v10, 0.0  ;;  %v3064_v0 = vmul.f32 0.2, %v3000_v10  ;;  %v3082_v61 = vsel %vm3050_vm7, %v3008_v12, %v3066_v3  ;;  %v6296_v3 = vld [vmem:[%s8330_s15 + $0x1c4] ss:$28 sps:$4 sm:$0xff]  }
 0x593   : > { %v3094_v40 = vpack.c.bf16 %v3082_v61, %v3081_v9  ;;  %v6303_v61 = vld [vmem:[%s8330_s15 + $0x360] ss:$28 sps:$4 sm:$0xff]   ;;  %v8368_v9 = vld [vmem:[#allocation5_spill] sm:$0xff] }
 0x594   : > { %v3080_v15 = vsel %vm3048_vm6, %v3000_v10, %v3064_v0  ;;  %4293 = vmatpush1.bf16.msra.mxu0 %v6225_v57  ;;  %v6284_v0 = vld [vmem:[%s8330_s15 + $0x234] ss:$28 sps:$4 sm:$0xff]  }
 0x595   : > { %v3093_v63 = vpack.c.bf16 %v3080_v15, %v3079_v5  ;;  %4294 = vmatprep.subr.bf16.mxu0 %v6233_v31  ;;  %v6282_v5 = vld [vmem:[%s8330_s15 + $0x230] ss:$28 sps:$4 sm:$0xff]   ;;  %4199 = vmatprep.subr.bf16.mxu1 %v6284_v0  ;;  %v6290_v15 = vld [vmem:[%s8330_s15 + $0x1fc] ss:$28 sps:$4 sm:$0xff]  }
 0x596   : > { %4200 = vmatpush2.bf16.msra.mxu1 %v6282_v5 }
 0x597   : > { %3260 = vmatmul.mubr.bf16.gmra.mxu0 %v3093_v63  ;;  %v6288_v63 = vld [vmem:[%s8330_s15 + $0x1f8] ss:$28 sps:$4 sm:$0xff]   ;;  %4201 = vmatprep.subr.bf16.mxu1 %v6290_v15  ;;  %v6320_v15 = vld [vmem:[%s8330_s15 + $0x130] ss:$28 sps:$4 sm:$0xff]  }
 0x598   : > { %3269 = vmatprep.mubr.bf16.mxu0 %v8367_v21  ;;  %4295 = vmatpush1.bf16.msra.mxu0 %v6231_v6  ;;  %v6293_v6 = vld [vmem:[%s8330_s15 + $0x204] ss:$28 sps:$4 sm:$0xff]  }
 0x599   : > { %v5936_v22 = vpop.f32.mrf.mxu1  ;;  %4296 = vmatprep.subr.bf16.mxu0 %v6239_v14  ;;  %v6291_v14 = vld [vmem:[%s8330_s15 + $0x200] ss:$28 sps:$4 sm:$0xff]  }
 0x59a   : > { %v3021_v17 = vadd.f32 %v5936_v22, %v7672_v34  ;;  %4202 = vmatpush2.bf16.msra.mxu1 %v6288_v63  ;;  %v6297_v22 = vld [vmem:[%s8330_s15 + $0x1c8] ss:$28 sps:$4 sm:$0xff]  }
 0x59b   : > { %v3012_v46 = vpop.f32.mrf.mxu1  ;;  %4203 = vmatprep.subr.bf16.mxu1 %v6296_v3  ;;  %v6327_v3 = vld [vmem:[%s8330_s15 + $0x2b8] ss:$28 sps:$4 sm:$0xff]  }
 0x59c   : > { %v3013_v24 = vadd.f32 %v7672_v34, %v3012_v46  ;;  %4297 = vmatpush1.bf16.msra.mxu0 %v6237_v20  ;;  %v3069_v55 = vmul.f32 0.2, %v3021_v17  ;;  %vm3053_vm12 = vcmp.gt.f32.partialorder %v3021_v17, 0.0  ;;  %v6294_v20 = vld [vmem:[%s8330_s15 + $0x1c0] ss:$28 sps:$4 sm:$0xff]  }
 0x59d   : > { %v5937_v58 = vpop.f32.mrf.mxu1  ;;  %4298 = vmatprep.subr.bf16.mxu0 %v6245_v54  ;;  %v6302_v54 = vld [vmem:[%s8330_s15 + $0x19c] ss:$28 sps:$4 sm:$0xff]   ;;  %v3115_v46 = vld [vmem:[%s8329_s14] sm:$0x3] }
 0x59e   : > { %v3067_v32 = vmul.f32 0.2, %v3013_v24  ;;  %vm3051_vm9 = vcmp.gt.f32.partialorder %v3013_v24, 0.0  ;;  %v3024_v7 = vadd.f32 %v5937_v58, %v7672_v34  ;;  %v3085_v19 = vsel %vm3053_vm12, %v3021_v17, %v3069_v55  ;;  %4204 = vmatpush2.bf16.msra.mxu1 %v6294_v20  ;;  %v6313_v20 = vld [vmem:[%s8330_s15 + $0xf0] ss:$28 sps:$4 sm:$0xff]  }
 0x59f   : > { %v3015_v23 = vpop.f32.mrf.mxu1  ;;  %3270 = vmatmul.mubr.bf16.gmra.mxu0 %v3094_v40  ;;  %4399 = vmatprep.subr.bf16.mxu1 %v6302_v54 }
 0x5a0   : > { %v3016_v1 = vadd.f32 %v7672_v34, %v3015_v23  ;;  %3279 = vmatprep.mubr.bf16.mxu0 %v8367_v21  ;;  %4299 = vmatpush1.bf16.msra.mxu0 %v6243_v59  ;;  %v3083_v35 = vsel %vm3051_vm9, %v3013_v24, %v3067_v32  ;;  %v3070_v49 = vmul.f32 0.2, %v3024_v7  ;;  %vm3054_vm11 = vcmp.gt.f32.partialorder %v3024_v7, 0.0  ;;  %v8369_v59 = vld [vmem:[#allocation4_spill] sm:$0xff] }
 0x5a1   : > { %4300 = vmatprep.subr.bf16.mxu0 %v6251_v62  ;;  %v7818_v24 = vrot.slane %v3115_v46, %v8368_v9  ;;  %v7821_v40 = vrot.slane %v3115_v46, %v8369_v59  ;;  %v6318_v46 = vld [vmem:[%s8330_s15 + $0xbc] ss:$28 sps:$4 sm:$0xff]  }
 0x5a2   : > { %vm3052_vm10 = vcmp.gt.f32.partialorder %v3016_v1, 0.0  ;;  %v3068_v52 = vmul.f32 0.2, %v3016_v1  ;;  %v3086_v53 = vsel %vm3054_vm11, %v3024_v7, %v3070_v49 }
 0x5a3   : > { %v3096_v41 = vpack.c.bf16 %v3086_v53, %v3085_v19  ;;  %v6300_v19 = vld [vmem:[%s8330_s15 + $0x198] ss:$28 sps:$4 sm:$0xff]  }
 0x5a4   : > { %v3084_v39 = vsel %vm3052_vm10, %v3016_v1, %v3068_v52  ;;  %4301 = vmatpush1.bf16.msra.mxu0 %v6249_v16 }
 0x5a5   : > { %v3095_v44 = vpack.c.bf16 %v3084_v39, %v3083_v35  ;;  %4302 = vmatprep.subr.bf16.mxu0 %v6257_v37 }
 0x5a7   : > { %3280 = vmatmul.mubr.bf16.gmra.mxu0 %v3095_v44 }
 0x5a8   : > { %3289 = vmatprep.mubr.bf16.mxu0 %v8367_v21  ;;  %4303 = vmatpush2.bf16.msra.mxu0 %v6255_v13 }
 0x5a9   : > { %v5940_v47 = vpop.f32.mrf.mxu1  ;;  %4304 = vmatprep.subr.bf16.mxu0 %v6263_v50 }
 0x5aa   : > { %v3037_v28 = vadd.f32 %v5940_v47, %v7672_v34 }
 0x5ab   : > { %v3028_v48 = vpop.f32.mrf.mxu1 }
 0x5ac   : > { %v3029_v4 = vadd.f32 %v7672_v34, %v3028_v48  ;;  %4305 = vmatpush2.bf16.msra.mxu0 %v6261_v30  ;;  %v3073_v57 = vmul.f32 0.2, %v3037_v28  ;;  %vm3057_vm0 = vcmp.gt.f32.partialorder %v3037_v28, 0.0 }
 0x5ad   : > { %v5941_v26 = vpop.f32.mrf.mxu1  ;;  %4306 = vmatprep.subr.bf16.mxu0 %v6269_v43 }
 0x5ae   : > { %v3071_v51 = vmul.f32 0.2, %v3029_v4  ;;  %vm3055_vm13 = vcmp.gt.f32.partialorder %v3029_v4, 0.0  ;;  %v3040_v38 = vadd.f32 %v5941_v26, %v7672_v34  ;;  %v3089_v12 = vsel %vm3057_vm0, %v3037_v28, %v3073_v57  ;;  %v6307_v26 = vld [vmem:[%s8330_s15 + $0x164] ss:$28 sps:$4 sm:$0xff]  }
 0x5af   : > { %v3031_v45 = vpop.f32.mrf.mxu1  ;;  %3290 = vmatmul.mubr.bf16.gmra.mxu0 %v3096_v41 }
 0x5b0   : > { %v3032_v42 = vadd.f32 %v7672_v34, %v3031_v45  ;;  %3299 = vmatprep.mubr.bf16.mxu0 %v8367_v21  ;;  %4307 = vmatpush2.bf16.msra.mxu0 %v6267_v36  ;;  %v3087_v33 = vsel %vm3055_vm13, %v3029_v4, %v3071_v51  ;;  %v3074_v10 = vmul.f32 0.2, %v3040_v38  ;;  %vm3058_vm15 = vcmp.gt.f32.partialorder %v3040_v38, 0.0  ;;  %v6304_v4 = vld [vmem:[%s8330_s15 + $0x1a0] ss:$28 sps:$4 sm:$0xff]  }
 0x5b1   : > { %4308 = vmatprep.subr.bf16.mxu0 %v6275_v25  ;;  %v6311_v25 = vld [vmem:[%s8330_s15 + $0x328] ss:$28 sps:$4 sm:$0xff]   ;;  %v6305_v51 = vld [vmem:[%s8330_s15 + $0x160] ss:$28 sps:$4 sm:$0xff]  }
 0x5b2   : > { %vm3056_vm14 = vcmp.gt.f32.partialorder %v3032_v42, 0.0  ;;  %v3072_v2 = vmul.f32 0.2, %v3032_v42  ;;  %v3090_v31 = vsel %vm3058_vm15, %v3040_v38, %v3074_v10  ;;  %v6310_v38 = vld [vmem:[%s8330_s15 + $0x12c] ss:$28 sps:$4 sm:$0xff]  }
 0x5b3   : > { %v3098_v34 = vpack.c.bf16 %v3090_v31, %v3089_v12 }
 0x5b4   : > { %v3088_v56 = vsel %vm3056_vm14, %v3032_v42, %v3072_v2  ;;  %4309 = vmatpush2.bf16.msra.mxu0 %v6273_v11 }
 0x5b5   : > { %v3097_v29 = vpack.c.bf16 %v3088_v56, %v3087_v33  ;;  %4310 = vmatprep.subr.bf16.mxu0 %v6281_v60  ;;  %v6312_v33 = vld [vmem:[%s8330_s15 + $0x168] ss:$28 sps:$4 sm:$0xff]  }
 0x5b7   : > { %3300 = vmatmul.mubr.bf16.gmra.mxu0 %v3097_v29 }
 0x5b8   : > { %3309 = vmatprep.mubr.bf16.mxu0 %v8367_v21  ;;  %4311 = vmatpush2.bf16.msra.mxu0 %v6279_v8  ;;  %v6285_v21 = vld [vmem:[%s8330_s15 + $0x238] ss:$28 sps:$4 sm:$0xff]   ;;  %v6319_v8 = vld [vmem:[%s8330_s15 + $0x2f0] ss:$28 sps:$4 sm:$0xff]  }
 0x5b9   : > { %4312 = vmatprep.subr.bf16.mxu0 %v6287_v18 }
 0x5bc   : > { %4313 = vmatpush2.bf16.msra.mxu0 %v6285_v21  ;;  %v6308_v21 = vld [vmem:[%s8330_s15 + $0x128] ss:$28 sps:$4 sm:$0xff]  }
 0x5bd   : > { %4314 = vmatprep.subr.bf16.mxu0 %v6293_v6 }
 0x5bf   : > { %3310 = vmatmul.mubr.bf16.gmra.mxu0 %v3098_v34 }
 0x5c0   : > { %4315 = vmatpush2.bf16.msra.mxu0 %v6291_v14  ;;  %v6315_v14 = vld [vmem:[%s8330_s15 + $0xf4] ss:$28 sps:$4 sm:$0xff]  }
 0x5c1   : > { %4316 = vmatprep.subr.bf16.mxu0 %v6299_v27 }
 0x5c4   : > { %4317 = vmatpush2.bf16.msra.mxu0 %v6297_v22 }
 0x5c5   : > { %5750 = vmatprep.subr.bf16.mxu0 %v6303_v61 }
 0x647   : > { %v3241_v58 = vpop.f32.mrf.mxu0 }
 0x648   : > { %v3242_v32 = vadd.f32 %v3241_v58, %v7821_v40 }
 0x649   : > { %v3243_v62 = vpop.f32.mrf.mxu0 }
 0x64a   : > { %v3244_v23 = vadd.f32 %v3243_v62, %v7818_v24  ;;  %v3352_v35 = vmul.f32 0.2, %v3242_v32  ;;  %vm3320_vm3 = vcmp.gt.f32.partialorder %v3242_v32, 0.0 }
 0x64b   : > { %v3245_v1 = vpop.f32.mrf.mxu0 }
 0x64c   : > { %v3246_v16 = vadd.f32 %v3245_v1, %v7821_v40  ;;  %v3353_v7 = vmul.f32 0.2, %v3244_v23  ;;  %vm3321_vm2 = vcmp.gt.f32.partialorder %v3244_v23, 0.0  ;;  %v3384_v47 = vsel %vm3320_vm3, %v3242_v32, %v3352_v35  ;;  %v6335_v1 = vld [vmem:[%s8330_s15 + $0x280] ss:$28 sps:$4 sm:$0xff]  }
 0x64d   : > { %v3247_v37 = vpop.f32.mrf.mxu0 }
 0x64e   : > { %vm3322_vm1 = vcmp.gt.f32.partialorder %v3246_v16, 0.0  ;;  %v3354_v52 = vmul.f32 0.2, %v3246_v16  ;;  %v3248_v17 = vadd.f32 %v3247_v37, %v7818_v24  ;;  %v3385_v49 = vsel %vm3321_vm2, %v3244_v23, %v3353_v7  ;;  %v6328_v23 = vld [vmem:[%s8330_s15 + $0xf8] ss:$28 sps:$4 sm:$0xff]  }
 0x64f   : > { %v3251_v39 = vpop.f32.mrf.mxu0 }
 0x650   : > { %vm3323_vm4 = vcmp.gt.f32.partialorder %v3248_v17, 0.0  ;;  %v3355_v13 = vmul.f32 0.2, %v3248_v17  ;;  %v3386_v44 = vsel %vm3322_vm1, %v3246_v16, %v3354_v52  ;;  %v3252_v53 = vadd.f32 %v3251_v39, %v7821_v40 }
 0x651   : > { %v3253_v50 = vpop.f32.mrf.mxu0  ;;  %v7837_v36 = vpack.c.bf16 %v3386_v44, %v3384_v47  ;;  %v6323_v47 = vld [vmem:[%s8330_s15 + $0x84] ss:$28 sps:$4 sm:$0xff]  }
 0x652   : > { %v3387_v55 = vsel %vm3323_vm4, %v3248_v17, %v3355_v13  ;;  %v3254_v30 = vadd.f32 %v3253_v50, %v7818_v24  ;;  %v3356_v2 = vmul.f32 0.2, %v3252_v53  ;;  %vm3324_vm7 = vcmp.gt.f32.partialorder %v3252_v53, 0.0  ;;  %v6316_v50 = vld [vmem:[%s8330_s15 + $0xb8] ss:$28 sps:$4 sm:$0xff]  }
 0x653   : > { %v7828_v43 = vpack.c.bf16 %v3387_v55, %v3385_v49  ;;  %v3255_v48 = vpop.f32.mrf.mxu0  ;;  %v6336_v49 = vld [vmem:[%s8330_s15 + $0xc0] ss:$28 sps:$4 sm:$0xff]  }
 0x654   : > { %v3256_v41 = vadd.f32 %v3255_v48, %v7821_v40  ;;  %v3357_v42 = vmul.f32 0.2, %v3254_v30  ;;  %vm3325_vm6 = vcmp.gt.f32.partialorder %v3254_v30, 0.0  ;;  %v3388_v34 = vsel %vm3324_vm7, %v3252_v53, %v3356_v2  ;;  %v6343_v53 = vld [vmem:[%s8330_s15 + $0x248] ss:$28 sps:$4 sm:$0xff]  }
 0x655   : > { %v3257_v45 = vpop.f32.mrf.mxu0  ;;  %4205 = vmatprep.mubr.bf16.mxu1 %v7828_v43  ;;  %4318 = vmatprep.mubr.bf16.mxu0 %v7828_v43 }
 0x656   : > { %vm3326_vm5 = vcmp.gt.f32.partialorder %v3256_v41, 0.0  ;;  %v3358_v11 = vmul.f32 0.2, %v3256_v41  ;;  %v3258_v60 = vadd.f32 %v3257_v45, %v7818_v24  ;;  %4206 = vmatmul.mubr.bf16.vlgmr.msra.gmra.mxu1 %v7837_v36  ;;  %4319 = vmatmul.mubr.bf16.vlgmr.msra.gmra.mxu0 %v7837_v36  ;;  %v3389_v57 = vsel %vm3325_vm6, %v3254_v30, %v3357_v42  ;;  %v6344_v42 = vld [vmem:[%s8330_s15 + $0x88] ss:$28 sps:$4 sm:$0xff]  }
 0x657   : > { %v3261_v28 = vpop.f32.mrf.mxu0  ;;  %4400 = vmatpush1.bf16.msra.mxu1 %v6300_v19  ;;  %5751 = vmatpush3.bf16.msra.mxu0 %v6304_v4  ;;  %v6321_v19 = vld [vmem:[%s8330_s15 + $0x80] ss:$28 sps:$4 sm:$0xff]  }
 0x658   : > { %vm3327_vm8 = vcmp.gt.f32.partialorder %v3258_v60, 0.0  ;;  %v3359_v56 = vmul.f32 0.2, %v3258_v60  ;;  %4401 = vmatprep.subr.bf16.mxu1 %v6307_v26  ;;  %5752 = vmatprep.subr.bf16.mxu0 %v6311_v25  ;;  %v3390_v29 = vsel %vm3326_vm5, %v3256_v41, %v3358_v11  ;;  %v3262_v18 = vadd.f32 %v3261_v28, %v7821_v40  ;;  %v6326_v25 = vld [vmem:[%s8330_s15 + $0x4c] ss:$28 sps:$4 sm:$0xff]  }
 0x659   : > { %v3263_v10 = vpop.f32.mrf.mxu0  ;;  %v7874_v6 = vpack.c.bf16 %v3390_v29, %v3388_v34 }
 0x65a   : > { %v3391_v31 = vsel %vm3327_vm8, %v3258_v60, %v3359_v56  ;;  %v3264_v12 = vadd.f32 %v3263_v10, %v7818_v24  ;;  %v3360_v58 = vmul.f32 0.2, %v3262_v18  ;;  %vm3328_vm11 = vcmp.gt.f32.partialorder %v3262_v18, 0.0  ;;  %v6351_v60 = vld [vmem:[%s8330_s15 + $0x210] ss:$28 sps:$4 sm:$0xff]  }
 0x65b   : > { %v7865_v0 = vpack.c.bf16 %v3391_v31, %v3389_v57  ;;  %v3265_v5 = vpop.f32.mrf.mxu0  ;;  %4402 = vmatpush1.bf16.msra.mxu1 %v6305_v51  ;;  %5753 = vmatpush3.bf16.msra.mxu0 %v6312_v33  ;;  %v6324_v31 = vld [vmem:[%s8330_s15 + $0x48] ss:$28 sps:$4 sm:$0xff]  }
 0x65c   : > { %v3266_v63 = vadd.f32 %v3265_v5, %v7821_v40  ;;  %4403 = vmatprep.subr.bf16.mxu1 %v6310_v38  ;;  %5754 = vmatprep.subr.bf16.mxu0 %v6319_v8  ;;  %v3361_v22 = vmul.f32 0.2, %v3264_v12  ;;  %vm3329_vm10 = vcmp.gt.f32.partialorder %v3264_v12, 0.0  ;;  %v3392_v35 = vsel %vm3328_vm11, %v3262_v18, %v3360_v58  ;;  %v6331_v5 = vld [vmem:[%s8330_s15 + $0x14] ss:$28 sps:$4 sm:$0xff]  }
 0x65d   : > { %v3267_v27 = vpop.f32.mrf.mxu0  ;;  %4215 = vmatprep.mubr.bf16.mxu1 %v7865_v0  ;;  %4328 = vmatprep.mubr.bf16.mxu0 %v7865_v0 }
 0x65e   : > { %vm3330_vm9 = vcmp.gt.f32.partialorder %v3266_v63, 0.0  ;;  %v3362_v54 = vmul.f32 0.2, %v3266_v63  ;;  %v3268_v61 = vadd.f32 %v3267_v27, %v7818_v24  ;;  %4216 = vmatmul.mubr.bf16.gmra.mxu1 %v7874_v6  ;;  %4329 = vmatmul.mubr.bf16.gmra.mxu0 %v7874_v6  ;;  %v3393_v7 = vsel %vm3329_vm10, %v3264_v12, %v3361_v22  ;;  %v6352_v12 = vld [vmem:[%s8330_s15 + $0x50] ss:$28 sps:$4 sm:$0xff]  }
 0x65f   : > { %v3271_v62 = vpop.f32.mrf.mxu0  ;;  %4404 = vmatpush1.bf16.msra.mxu1 %v6308_v21  ;;  %5755 = vmatpush3.bf16.msra.mxu0 %v6320_v15  ;;  %v6359_v21 = vld [vmem:[%s8330_s15 + $0x1d8] ss:$28 sps:$4 sm:$0xff]  }
 0x660   : > { %vm3331_vm12 = vcmp.gt.f32.partialorder %v3268_v61, 0.0  ;;  %v3363_v32 = vmul.f32 0.2, %v3268_v61  ;;  %4405 = vmatprep.subr.bf16.mxu1 %v6315_v14  ;;  %5756 = vmatprep.subr.bf16.mxu0 %v6327_v3  ;;  %v3394_v16 = vsel %vm3330_vm9, %v3266_v63, %v3362_v54  ;;  %v3272_v13 = vadd.f32 %v3271_v62, %v7821_v40  ;;  %v6329_v63 = vld [vmem:[%s8330_s15 + $0x10] ss:$28 sps:$4 sm:$0xff]  }
 0x661   : > { %v3273_v37 = vpop.f32.mrf.mxu0  ;;  %v7911_v55 = vpack.c.bf16 %v3394_v16, %v3392_v35  ;;  %v6360_v54 = vld [vmem:[%s8330_s15 + $0x18] ss:$28 sps:$4 sm:$0xff]  }
 0x662   : > { %v3395_v52 = vsel %vm3331_vm12, %v3268_v61, %v3363_v32  ;;  %v3274_v17 = vadd.f32 %v3273_v37, %v7818_v24  ;;  %v3364_v45 = vmul.f32 0.2, %v3272_v13  ;;  %vm3332_vm15 = vcmp.gt.f32.partialorder %v3272_v13, 0.0 }
 0x663   : > { %v7902_v39 = vpack.c.bf16 %v3395_v52, %v3393_v7  ;;  %v3275_v44 = vpop.f32.mrf.mxu0  ;;  %4406 = vmatpush1.bf16.msra.mxu1 %v6313_v20  ;;  %5757 = vmatpush3.bf16.msra.mxu0 %v6328_v23 }
 0x664   : > { %v3276_v30 = vadd.f32 %v3275_v44, %v7821_v40  ;;  %4407 = vmatprep.subr.bf16.mxu1 %v6318_v46  ;;  %5758 = vmatprep.subr.bf16.mxu0 %v6335_v1  ;;  %v3365_v4 = vmul.f32 0.2, %v3274_v17  ;;  %vm3333_vm14 = vcmp.gt.f32.partialorder %v3274_v17, 0.0  ;;  %v3396_v8 = vsel %vm3332_vm15, %v3272_v13, %v3364_v45  ;;  %v6334_v46 = vld [vmem:[%s8330_s15 + $0x35c] ss:$28 sps:$4 sm:$0xff]  }
 0x665   : > { %v3277_v48 = vpop.f32.mrf.mxu0  ;;  %4225 = vmatprep.mubr.bf16.mxu1 %v7902_v39  ;;  %4338 = vmatprep.mubr.bf16.mxu0 %v7902_v39  ;;  %v6339_v44 = vld [vmem:[%s8330_s15 + $0x324] ss:$28 sps:$4 sm:$0xff]  }
 0x666   : > { %vm3334_vm13 = vcmp.gt.f32.partialorder %v3276_v30, 0.0  ;;  %v3366_v41 = vmul.f32 0.2, %v3276_v30  ;;  %v3278_v26 = vadd.f32 %v3277_v48, %v7818_v24  ;;  %4226 = vmatmul.mubr.bf16.gmra.mxu1 %v7911_v55  ;;  %4339 = vmatmul.mubr.bf16.gmra.mxu0 %v7911_v55  ;;  %v3397_v28 = vsel %vm3333_vm14, %v3274_v17, %v3365_v4  ;;  %v6332_v17 = vld [vmem:[%s8330_s15 + $0x358] ss:$28 sps:$4 sm:$0xff]  }
 0x667   : > { %v3281_v51 = vpop.f32.mrf.mxu0  ;;  %4408 = vmatpush1.bf16.msra.mxu1 %v6316_v50  ;;  %5759 = vmatpush3.bf16.msra.mxu0 %v6336_v49 }
 0x668   : > { %vm3335_vm0 = vcmp.gt.f32.partialorder %v3278_v26, 0.0  ;;  %v3367_v11 = vmul.f32 0.2, %v3278_v26  ;;  %4409 = vmatprep.subr.bf16.mxu1 %v6323_v47  ;;  %5760 = vmatprep.subr.bf16.mxu0 %v6343_v53  ;;  %v3398_v38 = vsel %vm3334_vm13, %v3276_v30, %v3366_v41  ;;  %v3282_v10 = vadd.f32 %v3281_v51, %v7821_v40  ;;  %v6342_v41 = vld [vmem:[%s8330_s15 + $0x2ec] ss:$28 sps:$4 sm:$0xff]  }
 0x669   : > { %v3283_v2 = vpop.f32.mrf.mxu0  ;;  %v7948_v34 = vpack.c.bf16 %v3398_v38, %v3396_v8  ;;  %v6347_v8 = vld [vmem:[%s8330_s15 + $0x2b4] ss:$28 sps:$4 sm:$0xff]  }
 0x66a   : > { %v3399_v33 = vsel %vm3335_vm0, %v3278_v26, %v3367_v11  ;;  %v3284_v56 = vadd.f32 %v3283_v2, %v7818_v24  ;;  %v3368_v20 = vmul.f32 0.2, %v3282_v10  ;;  %vm3336_vm3 = vcmp.gt.f32.partialorder %v3282_v10, 0.0 }
 0x66b   : > { %v7939_v29 = vpack.c.bf16 %v3399_v33, %v3397_v28  ;;  %v3285_v57 = vpop.f32.mrf.mxu0  ;;  %4410 = vmatpush1.bf16.msra.mxu1 %v6321_v19  ;;  %5761 = vmatpush3.bf16.msra.mxu0 %v6344_v42  ;;  %v6337_v19 = vld [vmem:[%s8330_s15 + $0x320] ss:$28 sps:$4 sm:$0xff]   ;;  %v6340_v28 = vld [vmem:[%s8330_s15 + $0x2e8] ss:$28 sps:$4 sm:$0xff]  }
 0x66c   : > { %v3286_v18 = vadd.f32 %v3285_v57, %v7821_v40  ;;  %4411 = vmatprep.subr.bf16.mxu1 %v6326_v25  ;;  %5762 = vmatprep.subr.bf16.mxu0 %v6351_v60  ;;  %v3369_v14 = vmul.f32 0.2, %v3284_v56  ;;  %vm3337_vm2 = vcmp.gt.f32.partialorder %v3284_v56, 0.0  ;;  %v3400_v16 = vsel %vm3336_vm3, %v3282_v10, %v3368_v20 }
 0x66d   : > { %v3287_v15 = vpop.f32.mrf.mxu0  ;;  %4235 = vmatprep.mubr.bf16.mxu1 %v7939_v29  ;;  %4348 = vmatprep.mubr.bf16.mxu0 %v7939_v29 }
 0x66e   : > { %vm3338_vm1 = vcmp.gt.f32.partialorder %v3286_v18, 0.0  ;;  %v3370_v3 = vmul.f32 0.2, %v3286_v18  ;;  %v3288_v27 = vadd.f32 %v3287_v15, %v7818_v24  ;;  %4236 = vmatmul.mubr.bf16.gmra.mxu1 %v7948_v34  ;;  %4349 = vmatmul.mubr.bf16.gmra.mxu0 %v7948_v34  ;;  %v3401_v23 = vsel %vm3337_vm2, %v3284_v56, %v3369_v14 }
 0x66f   : > { %v3291_v22 = vpop.f32.mrf.mxu0  ;;  %4412 = vmatpush1.bf16.msra.mxu1 %v6324_v31  ;;  %5763 = vmatpush3.bf16.msra.mxu0 %v6352_v12 }
 0x670   : > { %vm3339_vm4 = vcmp.gt.f32.partialorder %v3288_v27, 0.0  ;;  %v3371_v61 = vmul.f32 0.2, %v3288_v27  ;;  %4413 = vmatprep.subr.bf16.mxu1 %v6331_v5  ;;  %5764 = vmatprep.subr.bf16.mxu0 %v6359_v21  ;;  %v3402_v58 = vsel %vm3338_vm1, %v3286_v18, %v3370_v3  ;;  %v3292_v7 = vadd.f32 %v3291_v22, %v7821_v40  ;;  %v6345_v21 = vld [vmem:[%s8330_s15 + $0x2b0] ss:$28 sps:$4 sm:$0xff]  }
 0x671   : > { %v3293_v62 = vpop.f32.mrf.mxu0  ;;  %v7979_v35 = vpack.c.bf16 %v3402_v58, %v3400_v16  ;;  %vm5076_vm1 = vcmask 125952  }
 0x672   : > { %v3403_v32 = vsel %vm3339_vm4, %v3288_v27, %v3371_v61  ;;  %v3294_v1 = vadd.f32 %v3293_v62, %v7818_v24  ;;  %v3372_v53 = vmul.f32 0.2, %v3292_v7  ;;  %vm3340_vm7 = vcmp.gt.f32.partialorder %v3292_v7, 0.0  ;;  %v6348_v62 = vld [vmem:[%s8330_s15 + $0x278] ss:$28 sps:$4 sm:$0xff]  }
 0x673   : > { %v7973_v37 = vpack.c.bf16 %v3403_v32, %v3401_v23  ;;  %v3295_v52 = vpop.f32.mrf.mxu0  ;;  %4414 = vmatpush1.bf16.msra.mxu1 %v6329_v63  ;;  %5765 = vmatpush3.bf16.msra.mxu0 %v6360_v54  ;;  %v6350_v63 = vld [vmem:[%s8330_s15 + $0x27c] ss:$28 sps:$4 sm:$0xff]  }
 0x674   : > { %v3296_v13 = vadd.f32 %v3295_v52, %v7821_v40  ;;  %4415 = vmatprep.subr.bf16.mxu1 %v6334_v46  ;;  %v3373_v49 = vmul.f32 0.2, %v3294_v1  ;;  %vm3341_vm6 = vcmp.gt.f32.partialorder %v3294_v1, 0.0  ;;  %v3404_v11 = vsel %vm3340_vm7, %v3292_v7, %v3372_v53 }
 0x675   : > { %v3297_v50 = vpop.f32.mrf.mxu0  ;;  %4245 = vmatprep.mubr.bf16.mxu1 %v7973_v37  ;;  %4358 = vmatprep.mubr.bf16.mxu0 %v7973_v37 }
 0x676   : > { %vm3342_vm5 = vcmp.gt.f32.partialorder %v3296_v13, 0.0  ;;  %v3374_v30 = vmul.f32 0.2, %v3296_v13  ;;  %v3298_v47 = vadd.f32 %v3297_v50, %v7818_v24  ;;  %4246 = vmatmul.mubr.bf16.gmra.mxu1 %v7979_v35  ;;  %4359 = vmatmul.mubr.bf16.gmra.mxu0 %v7979_v35  ;;  %v3405_v45 = vsel %vm3341_vm6, %v3294_v1, %v3373_v49  ;;  %v6355_v1 = vld [vmem:[%s8330_s15 + $0x244] ss:$28 sps:$4 sm:$0xff]  }
 0x677   : > { %v3301_v48 = vpop.f32.mrf.mxu0  ;;  %4416 = vmatpush2.bf16.msra.mxu1 %v6332_v17  ;;  %v6358_v50 = vld [vmem:[%s8330_s15 + $0x20c] ss:$28 sps:$4 sm:$0xff]  }
 0x678   : > { %vm3343_vm8 = vcmp.gt.f32.partialorder %v3298_v47, 0.0  ;;  %v3375_v4 = vmul.f32 0.2, %v3298_v47  ;;  %4417 = vmatprep.subr.bf16.mxu1 %v6339_v44  ;;  %v3406_v26 = vsel %vm3342_vm5, %v3296_v13, %v3374_v30  ;;  %v3302_v38 = vadd.f32 %v3301_v48, %v7821_v40  ;;  %v6353_v13 = vld [vmem:[%s8330_s15 + $0x240] ss:$28 sps:$4 sm:$0xff]  }
 0x679   : > { %v3303_v25 = vpop.f32.mrf.mxu0  ;;  %v8003_v33 = vpack.c.bf16 %v3406_v26, %v3404_v11  ;;  %v6356_v48 = vld [vmem:[%s8330_s15 + $0x208] ss:$28 sps:$4 sm:$0xff]  }
 0x67a   : > { %v3407_v51 = vsel %vm3343_vm8, %v3298_v47, %v3375_v4  ;;  %v3304_v42 = vadd.f32 %v3303_v25, %v7818_v24  ;;  %v3376_v18 = vmul.f32 0.2, %v3302_v38  ;;  %vm3344_vm11 = vcmp.gt.f32.partialorder %v3302_v38, 0.0  ;;  %v6363_v4 = vld [vmem:[%s8330_s15 + $0x1d4] ss:$28 sps:$4 sm:$0xff]  }
 0x67b   : > { %v7997_v60 = vpack.c.bf16 %v3407_v51, %v3405_v45  ;;  %v3305_v2 = vpop.f32.mrf.mxu0  ;;  %4418 = vmatpush2.bf16.msra.mxu1 %v6337_v19 }
 0x67c   : > { %v3306_v56 = vadd.f32 %v3305_v2, %v7821_v40  ;;  %4419 = vmatprep.subr.bf16.mxu1 %v6342_v41  ;;  %v3377_v57 = vmul.f32 0.2, %v3304_v42  ;;  %vm3345_vm10 = vcmp.gt.f32.partialorder %v3304_v42, 0.0  ;;  %v3408_v54 = vsel %vm3344_vm11, %v3302_v38, %v3376_v18  ;;  %v6361_v41 = vld [vmem:[%s8330_s15 + $0x1d0] ss:$28 sps:$4 sm:$0xff]  }
 0x67d   : > { %v3307_v10 = vpop.f32.mrf.mxu0  ;;  %4255 = vmatprep.mubr.bf16.mxu1 %v7997_v60  ;;  %4368 = vmatprep.mubr.bf16.mxu0 %v7997_v60 }
 0x67e   : > { %vm3346_vm9 = vcmp.gt.f32.partialorder %v3306_v56, 0.0  ;;  %v3378_v31 = vmul.f32 0.2, %v3306_v56  ;;  %v3308_v12 = vadd.f32 %v3307_v10, %v7818_v24  ;;  %4256 = vmatmul.mubr.bf16.gmra.mxu1 %v8003_v33  ;;  %4369 = vmatmul.mubr.bf16.gmra.mxu0 %v8003_v33  ;;  %v3409_v27 = vsel %vm3345_vm10, %v3304_v42, %v3377_v57 }
 0x67f   : > { %v3311_v5 = vpop.f32.mrf.mxu0  ;;  %4420 = vmatpush2.bf16.msra.mxu1 %v6340_v28 }
 0x680   : > { %vm3347_vm12 = vcmp.gt.f32.partialorder %v3308_v12, 0.0  ;;  %v3379_v15 = vmul.f32 0.2, %v3308_v12  ;;  %4421 = vmatprep.subr.bf16.mxu1 %v6347_v8  ;;  %v3410_v14 = vsel %vm3346_vm9, %v3306_v56, %v3378_v31  ;;  %v3312_v46 = vadd.f32 %v3311_v5, %v7821_v40 }
 0x681   : > { %v3313_v3 = vpop.f32.mrf.mxu0  ;;  %v8027_v23 = vpack.c.bf16 %v3410_v14, %v3408_v54 }
 0x682   : > { %v3411_v20 = vsel %vm3347_vm12, %v3308_v12, %v3379_v15  ;;  %v3314_v22 = vadd.f32 %v3313_v3, %v7818_v24  ;;  %vm3348_vm15 = vcmp.gt.f32.partialorder %v3312_v46, 0.0 }
 0x683   : > { %v8021_v61 = vpack.c.bf16 %v3411_v20, %v3409_v27  ;;  %v3315_v58 = vpop.f32.mrf.mxu0  ;;  %4422 = vmatpush2.bf16.msra.mxu1 %v6345_v21 }
 0x684   : > { %v3316_v32 = vadd.f32 %v3315_v58, %v7821_v40  ;;  %4423 = vmatprep.subr.bf16.mxu1 %v6350_v63  ;;  %v3381_v7 = vmul.f32 0.2, %v3314_v22  ;;  %v3380_v40 = vmul.f32 0.2, %v3312_v46  ;;  %vm3349_vm14 = vcmp.gt.f32.partialorder %v3314_v22, 0.0 }
 0x685   : > { %v3317_v16 = vpop.f32.mrf.mxu0  ;;  %4265 = vmatprep.mubr.bf16.mxu1 %v8021_v61  ;;  %4378 = vmatprep.mubr.bf16.mxu0 %v8021_v61 }
 0x686   : > { %vm3350_vm13 = vcmp.gt.f32.partialorder %v3316_v32, 0.0  ;;  %v3382_v52 = vmul.f32 0.2, %v3316_v32  ;;  %v3318_v17 = vadd.f32 %v3317_v16, %v7818_v24  ;;  %4266 = vmatmul.mubr.bf16.gmra.mxu1 %v8027_v23  ;;  %4379 = vmatmul.mubr.bf16.gmra.mxu0 %v8027_v23  ;;  %v3413_v49 = vsel %vm3349_vm14, %v3314_v22, %v3381_v7 }
 0x687   : > { %4424 = vmatpush2.bf16.msra.mxu1 %v6348_v62  ;;  %v3412_v47 = vsel %vm3348_vm15, %v3312_v46, %v3380_v40 }
 0x688   : > { %vm3351_vm0 = vcmp.gt.f32.partialorder %v3318_v17, 0.0  ;;  %v3383_v44 = vmul.f32 0.2, %v3318_v17  ;;  %4425 = vmatprep.subr.bf16.mxu1 %v6355_v1  ;;  %v3414_v24 = vsel %vm3350_vm13, %v3316_v32, %v3382_v52 }
 0x689   : > { %v3430_v19 = vpack.c.bf16 %v3414_v24, %v3412_v47 }
 0x68a   : > { %v3415_v30 = vsel %vm3351_vm0, %v3318_v17, %v3383_v44 }
 0x68b   : > { %v3431_v53 = vpack.c.bf16 %v3415_v30, %v3413_v49  ;;  %4426 = vmatpush2.bf16.msra.mxu1 %v6353_v13 }
 0x68c   : > { %4427 = vmatprep.subr.bf16.mxu1 %v6358_v50 }
 0x68d   : > { %4275 = vmatprep.mubr.bf16.mxu1 %v3431_v53  ;;  %4388 = vmatprep.mubr.bf16.mxu0 %v3431_v53 }
 0x68e   : > { %4276 = vmatmul.mubr.bf16.gmra.mxu1 %v3430_v19  ;;  %4389 = vmatmul.mubr.bf16.gmra.mxu0 %v3430_v19 }
 0x68f   : > { %4428 = vmatpush2.bf16.msra.mxu1 %v6356_v48  ;;  %4431 = vmatprep.mubr.bf16.mxu1 %v7828_v43 }
 0x690   : > { %4544 = vmatprep.mubr.bf16.mxu0 %v7828_v43  ;;  %4429 = vmatprep.subr.bf16.mxu1 %v6363_v4  ;;  %v8370_v43 = vld [vmem:[#allocation3_spill] sm:$0xff] }
 0x693   : > { %4430 = vmatpush2.bf16.msra.mxu1 %v6361_v41 }
 0x696   : > { %4432 = vmatmul.mubr.bf16.vlgmr.msra.gmra.mxu1 %v7837_v36  ;;  %4545 = vmatmul.mubr.bf16.vlgmr.msra.gmra.mxu0 %v7837_v36  ;;  %v3572_v36 = vsub.s32 2, %v8370_v43 }
 0x697   : > { %4441 = vmatprep.mubr.bf16.mxu1 %v7865_v0  ;;  %4552 = vmatprep.mubr.bf16.mxu0 %v7865_v0  ;;  %v8085_v0 = vld [vmem:[%s8331_s16] sm:$0x7f] }
 0x69e   : > { %4442 = vmatmul.mubr.bf16.gmra.mxu1 %v7874_v6  ;;  %4553 = vmatmul.mubr.bf16.gmra.mxu0 %v7874_v6  ;;  %v3576_v6 = vsub.s32 3, %v8370_v43 }
 0x69f   : > { %4451 = vmatprep.mubr.bf16.mxu1 %v7902_v39  ;;  %4560 = vmatprep.mubr.bf16.mxu0 %v7902_v39  ;;  %v8090_v39 = vrot.slane %v8085_v0, %v8369_v59 }
 0x6a6   : > { %4452 = vmatmul.mubr.bf16.gmra.mxu1 %v7911_v55  ;;  %4561 = vmatmul.mubr.bf16.gmra.mxu0 %v7911_v55  ;;  %v8093_v55 = vrot.slane %v8085_v0, %v3572_v36 }
 0x6a7   : > { %4461 = vmatprep.mubr.bf16.mxu1 %v7939_v29  ;;  %4568 = vmatprep.mubr.bf16.mxu0 %v7939_v29  ;;  %v8097_v29 = vrot.slane %v8085_v0, %v8368_v9 }
 0x6ae   : > { %4462 = vmatmul.mubr.bf16.gmra.mxu1 %v7948_v34  ;;  %4569 = vmatmul.mubr.bf16.gmra.mxu0 %v7948_v34  ;;  %v8100_v34 = vrot.slane %v8085_v0, %v3576_v6 }
 0x6af   : > { %4471 = vmatprep.mubr.bf16.mxu1 %v7973_v37  ;;  %4576 = vmatprep.mubr.bf16.mxu0 %v7973_v37 }
 0x6b6   : > { %4472 = vmatmul.mubr.bf16.gmra.mxu1 %v7979_v35  ;;  %4577 = vmatmul.mubr.bf16.gmra.mxu0 %v7979_v35 }
 0x6b7   : > { %4481 = vmatprep.mubr.bf16.mxu1 %v7997_v60  ;;  %4584 = vmatprep.mubr.bf16.mxu0 %v7997_v60 }
 0x6be   : > { %4482 = vmatmul.mubr.bf16.gmra.mxu1 %v8003_v33  ;;  %4585 = vmatmul.mubr.bf16.gmra.mxu0 %v8003_v33 }
 0x6bf   : > { %4491 = vmatprep.mubr.bf16.mxu1 %v8021_v61  ;;  %4592 = vmatprep.mubr.bf16.mxu0 %v8021_v61 }
 0x6c6   : > { %4492 = vmatmul.mubr.bf16.gmra.mxu1 %v8027_v23  ;;  %4593 = vmatmul.mubr.bf16.gmra.mxu0 %v8027_v23 }
 0x6c7   : > { %4501 = vmatprep.mubr.bf16.mxu1 %v3431_v53  ;;  %4600 = vmatprep.mubr.bf16.mxu0 %v3431_v53 }
 0x6ce   : > { %4502 = vmatmul.mubr.bf16.gmra.mxu1 %v3430_v19  ;;  %4601 = vmatmul.mubr.bf16.gmra.mxu0 %v3430_v19 }
 0x716   : > { %v4207_v37 = vpop.f32.mrf.mxu1  ;;  %v4320_v35 = vpop.f32.mrf.mxu0 }
 0x717   : > { %v4208_v26 = vadd.f32 %v4207_v37, %v8090_v39  ;;  %v4321_v25 = vadd.f32 %v4320_v35, %v8093_v55 }
 0x718   : > { %v4209_v45 = vpop.f32.mrf.mxu1  ;;  %v4322_v51 = vpop.f32.mrf.mxu0 }
 0x719   : > { %6364 = vtanh.f32 %v4208_v26  ;;  %v4210_v59 = vadd.f32 %v4209_v45, %v8097_v29  ;;  %v4323_v42 = vadd.f32 %v4322_v51, %v8100_v34 }
 0x71a   : > { %6366 = vtanh.f32 %v4321_v25  ;;  %v4211_v11 = vpop.f32.mrf.mxu1  ;;  %v4324_v9 = vpop.f32.mrf.mxu0 }
 0x71b   : > { %6368 = vtanh.f32 %v4210_v59  ;;  %v4212_v60 = vadd.f32 %v4211_v11, %v8090_v39  ;;  %v4325_v38 = vadd.f32 %v4324_v9, %v8093_v55 }
 0x71c   : > { %6370 = vtanh.f32 %v4323_v42  ;;  %v4213_v2 = vpop.f32.mrf.mxu1  ;;  %v4326_v28 = vpop.f32.mrf.mxu0 }
 0x71d   : > { %6372 = vtanh.f32 %v4212_v60  ;;  %v4214_v33 = vadd.f32 %v4213_v2, %v8097_v29  ;;  %v4327_v56 = vadd.f32 %v4326_v28, %v8100_v34 }
 0x71e   : > { %6374 = vtanh.f32 %v4325_v38  ;;  %v4217_v8 = vpop.f32.mrf.mxu1  ;;  %v4330_v10 = vpop.f32.mrf.mxu0 }
 0x71f   : > { %6376 = vtanh.f32 %v4214_v33  ;;  %v4218_v57 = vadd.f32 %v4217_v8, %v8090_v39  ;;  %v4331_v31 = vadd.f32 %v4330_v10, %v8093_v55 }
 0x720   : > { %6378 = vtanh.f32 %v4327_v56  ;;  %v4219_v12 = vpop.f32.mrf.mxu1  ;;  %v4332_v18 = vpop.f32.mrf.mxu0 }
 0x721   : > { %6380 = vtanh.f32 %v4218_v57  ;;  %v4220_v5 = vadd.f32 %v4219_v12, %v8097_v29  ;;  %v4333_v21 = vadd.f32 %v4332_v18, %v8100_v34 }
 0x722   : > { %6382 = vtanh.f32 %v4331_v31  ;;  %v4221_v15 = vpop.f32.mrf.mxu1  ;;  %v4334_v63 = vpop.f32.mrf.mxu0 }
 0x723   : > { %6384 = vtanh.f32 %v4220_v5  ;;  %v4222_v14 = vadd.f32 %v4221_v15, %v8090_v39  ;;  %v4335_v3 = vadd.f32 %v4334_v63, %v8093_v55 }
 0x724   : > { %6386 = vtanh.f32 %v4333_v21  ;;  %v4223_v27 = vpop.f32.mrf.mxu1  ;;  %v4336_v20 = vpop.f32.mrf.mxu0 }
 0x725   : > { %6388 = vtanh.f32 %v4222_v14  ;;  %v4224_v22 = vadd.f32 %v4223_v27, %v8097_v29  ;;  %v4337_v54 = vadd.f32 %v4336_v20, %v8100_v34 }
 0x726   : > { %v6365_v61 = vpop.eup %6364  ;;  %6390 = vtanh.f32 %v4335_v3  ;;  %v4227_v46 = vpop.f32.mrf.mxu1 }
 0x727   : > { %v4340_v58 = vpop.f32.mrf.mxu0  ;;  %v6367_v62 = vpop.eup %6366  ;;  %6392 = vtanh.f32 %v4224_v22  ;;  %v4228_v23 = vadd.f32 %v4227_v46, %v8090_v39 }
 0x728   : > { %v4341_v32 = vadd.f32 %v4340_v58, %v8093_v55  ;;  %v6369_v1 = vpop.eup %6368  ;;  %6394 = vtanh.f32 %v4337_v54  ;;  %v4229_v16 = vpop.f32.mrf.mxu1 }
 0x729   : > { %v4342_v7 = vpop.f32.mrf.mxu0  ;;  %v6371_v52 = vpop.eup %6370  ;;  %v5558_v17 = vpack.c.bf16 %v6369_v1, %v6365_v61  ;;  %6396 = vtanh.f32 %v4228_v23  ;;  %v4230_v40 = vadd.f32 %v4229_v16, %v8097_v29 }
 0x72a   : > { %v4343_v13 = vadd.f32 %v4342_v7, %v8100_v34  ;;  %v6373_v44 = vpop.eup %6372  ;;  %v5559_v50 = vpack.c.bf16 %v6371_v52, %v6367_v62  ;;  %6398 = vtanh.f32 %v4341_v32  ;;  %v4231_v24 = vpop.f32.mrf.mxu1 }
 0x72b   : > { %v4344_v49 = vpop.f32.mrf.mxu0  ;;  %v6375_v30 = vpop.eup %6374  ;;  %5073 = vst [vmem:[%s8124_s0] sm:$0xff] %v5558_v17  ;;  %6400 = vtanh.f32 %v4230_v40  ;;  %v4232_v47 = vadd.f32 %v4231_v24, %v8090_v39 }
 0x72c   : > { %v4345_v53 = vadd.f32 %v4344_v49, %v8093_v55  ;;  %v6377_v48 = vpop.eup %6376  ;;  %5074 = vst [vmem:[%s8124_s0 + $0x8] sm:$0xff] %v5559_v50  ;;  %6402 = vtanh.f32 %v4343_v13  ;;  %v4233_v19 = vpop.f32.mrf.mxu1 }
 0x72d   : > { %v4346_v4 = vpop.f32.mrf.mxu0  ;;  %v6379_v41 = vpop.eup %6378  ;;  %v5562_v36 = vpack.c.bf16 %v6377_v48, %v6373_v44  ;;  %6404 = vtanh.f32 %v4232_v47  ;;  %v4234_v6 = vadd.f32 %v4233_v19, %v8097_v29 }
 0x72e   : > { %v4347_v37 = vadd.f32 %v4346_v4, %v8100_v34  ;;  %v6381_v35 = vpop.eup %6380  ;;  %v5563_v26 = vpack.c.bf16 %v6379_v41, %v6375_v30  ;;  %6406 = vtanh.f32 %v4345_v53  ;;  %v4237_v25 = vpop.f32.mrf.mxu1 }
 0x72f   : > { %v4350_v45 = vpop.f32.mrf.mxu0  ;;  %v6383_v51 = vpop.eup %6382  ;;  %5078 = vst [vmem:[%s8124_s0 + $0x1c] sm:$0xff] %v5562_v36  ;;  %6408 = vtanh.f32 %v4234_v6  ;;  %v4238_v59 = vadd.f32 %v4237_v25, %v8090_v39 }
 0x730   : > { %v4351_v42 = vadd.f32 %v4350_v45, %v8093_v55  ;;  %v6385_v11 = vpop.eup %6384  ;;  %5079 = vst [vmem:[%s8124_s0 + $0x24] sm:$0xff] %v5563_v26  ;;  %6410 = vtanh.f32 %v4347_v37  ;;  %v4239_v9 = vpop.f32.mrf.mxu1 }
 0x731   : > { %v4352_v60 = vpop.f32.mrf.mxu0  ;;  %v6387_v38 = vpop.eup %6386  ;;  %v5566_v2 = vpack.c.bf16 %v6385_v11, %v6381_v35  ;;  %6412 = vtanh.f32 %v4238_v59  ;;  %v4240_v28 = vadd.f32 %v4239_v9, %v8097_v29 }
 0x732   : > { %v4353_v33 = vadd.f32 %v4352_v60, %v8100_v34  ;;  %v6389_v56 = vpop.eup %6388  ;;  %v5567_v8 = vpack.c.bf16 %v6387_v38, %v6383_v51  ;;  %6414 = vtanh.f32 %v4351_v42  ;;  %v4241_v10 = vpop.f32.mrf.mxu1 }
 0x733   : > { %v4354_v57 = vpop.f32.mrf.mxu0  ;;  %v6391_v31 = vpop.eup %6390  ;;  %5082 = vst [vmem:[%s8124_s0 + $0x38] sm:$0xff] %v5566_v2  ;;  %6416 = vtanh.f32 %v4240_v28  ;;  %v4242_v12 = vadd.f32 %v4241_v10, %v8090_v39 }
 0x734   : > { %v4355_v18 = vadd.f32 %v4354_v57, %v8093_v55  ;;  %v6393_v5 = vpop.eup %6392  ;;  %5083 = vst [vmem:[%s8124_s0 + $0x40] sm:$0xff] %v5567_v8  ;;  %6418 = vtanh.f32 %v4353_v33  ;;  %v4243_v21 = vpop.f32.mrf.mxu1 }
 0x735   : > { %v4356_v15 = vpop.f32.mrf.mxu0  ;;  %v6395_v63 = vpop.eup %6394  ;;  %v5570_v14 = vpack.c.bf16 %v6393_v5, %v6389_v56  ;;  %6420 = vtanh.f32 %v4242_v12  ;;  %v4244_v3 = vadd.f32 %v4243_v21, %v8097_v29 }
 0x736   : > { %v4357_v27 = vadd.f32 %v4356_v15, %v8100_v34  ;;  %v6397_v20 = vpop.eup %6396  ;;  %v5571_v22 = vpack.c.bf16 %v6395_v63, %v6391_v31  ;;  %6422 = vtanh.f32 %v4355_v18  ;;  %v4247_v54 = vpop.f32.mrf.mxu1 }
 0x737   : > { %v4360_v61 = vpop.f32.mrf.mxu0  ;;  %v6399_v46 = vpop.eup %6398  ;;  %5086 = vst [vmem:[%s8124_s0 + $0x54] sm:$0xff] %v5570_v14  ;;  %6424 = vtanh.f32 %v4244_v3  ;;  %v4248_v58 = vadd.f32 %v4247_v54, %v8090_v39 }
 0x738   : > { %v4361_v62 = vadd.f32 %v4360_v61, %v8093_v55  ;;  %v6401_v23 = vpop.eup %6400  ;;  %5087 = vst [vmem:[%s8124_s0 + $0x5c] sm:$0xff] %v5571_v22  ;;  %6426 = vtanh.f32 %v4357_v27  ;;  %v4249_v32 = vpop.f32.mrf.mxu1 }
 0x739   : > { %v4362_v1 = vpop.f32.mrf.mxu0  ;;  %v6403_v16 = vpop.eup %6402  ;;  %v5574_v7 = vpack.c.bf16 %v6401_v23, %v6397_v20  ;;  %6428 = vtanh.f32 %v4248_v58  ;;  %v4250_v52 = vadd.f32 %v4249_v32, %v8097_v29 }
 0x73a   : > { %v4363_v17 = vadd.f32 %v4362_v1, %v8100_v34  ;;  %v6405_v40 = vpop.eup %6404  ;;  %v5575_v13 = vpack.c.bf16 %v6403_v16, %v6399_v46  ;;  %6430 = vtanh.f32 %v4361_v62  ;;  %v4251_v44 = vpop.f32.mrf.mxu1 }
 0x73b   : > { %v4364_v50 = vpop.f32.mrf.mxu0  ;;  %v6407_v24 = vpop.eup %6406  ;;  %5090 = vst [vmem:[%s8124_s0 + $0x70] sm:$0xff] %v5574_v7  ;;  %6432 = vtanh.f32 %v4250_v52  ;;  %v4252_v49 = vadd.f32 %v4251_v44, %v8090_v39 }
 0x73c   : > { %v4365_v30 = vadd.f32 %v4364_v50, %v8093_v55  ;;  %v6409_v47 = vpop.eup %6408  ;;  %5091 = vst [vmem:[%s8124_s0 + $0x78] sm:$0xff] %v5575_v13  ;;  %6434 = vtanh.f32 %v4363_v17  ;;  %v4253_v53 = vpop.f32.mrf.mxu1 }
 0x73d   : > { %v4366_v48 = vpop.f32.mrf.mxu0  ;;  %v6411_v19 = vpop.eup %6410  ;;  %v5578_v4 = vpack.c.bf16 %v6409_v47, %v6405_v40  ;;  %6436 = vtanh.f32 %v4252_v49  ;;  %v4254_v41 = vadd.f32 %v4253_v53, %v8097_v29 }
 0x73e   : > { %v4367_v36 = vadd.f32 %v4366_v48, %v8100_v34  ;;  %v6413_v6 = vpop.eup %6412  ;;  %v5579_v37 = vpack.c.bf16 %v6411_v19, %v6407_v24  ;;  %6438 = vtanh.f32 %v4365_v30  ;;  %v4257_v35 = vpop.f32.mrf.mxu1 }
 0x73f   : > { %v4370_v26 = vpop.f32.mrf.mxu0  ;;  %v6415_v25 = vpop.eup %6414  ;;  %5094 = vst [vmem:[%s8124_s0 + $0x8c] sm:$0xff] %v5578_v4  ;;  %6440 = vtanh.f32 %v4254_v41  ;;  %v4258_v45 = vadd.f32 %v4257_v35, %v8090_v39  ;;  %v3580_v35 = vsub.s32 4, %v8370_v43 }
 0x740   : > { %v4371_v51 = vadd.f32 %v4370_v26, %v8093_v55  ;;  %v6417_v59 = vpop.eup %6416  ;;  %5095 = vst [vmem:[%s8124_s0 + $0x94] sm:$0xff] %v5579_v37  ;;  %6442 = vtanh.f32 %v4367_v36  ;;  %v4259_v42 = vpop.f32.mrf.mxu1 }
 0x741   : > { %v4372_v11 = vpop.f32.mrf.mxu0  ;;  %v6419_v9 = vpop.eup %6418  ;;  %v5582_v60 = vpack.c.bf16 %v6417_v59, %v6413_v6  ;;  %6444 = vtanh.f32 %v4258_v45  ;;  %v4260_v38 = vadd.f32 %v4259_v42, %v8097_v29 }
 0x742   : > { %v4373_v2 = vadd.f32 %v4372_v11, %v8100_v34  ;;  %v6421_v28 = vpop.eup %6420  ;;  %v5583_v33 = vpack.c.bf16 %v6419_v9, %v6415_v25  ;;  %6446 = vtanh.f32 %v4371_v51  ;;  %v4261_v56 = vpop.f32.mrf.mxu1  ;;  %v3584_v11 = vsub.s32 5, %v8370_v43 }
 0x743   : > { %v4374_v8 = vpop.f32.mrf.mxu0  ;;  %v6423_v10 = vpop.eup %6422  ;;  %5098 = vst [vmem:[%s8124_s0 + $0xa8] sm:$0xff] %v5582_v60  ;;  %6448 = vtanh.f32 %v4260_v38  ;;  %v4262_v57 = vadd.f32 %v4261_v56, %v8090_v39 }
 0x744   : > { %v4375_v31 = vadd.f32 %v4374_v8, %v8093_v55  ;;  %v6425_v12 = vpop.eup %6424  ;;  %5099 = vst [vmem:[%s8124_s0 + $0xb0] sm:$0xff] %v5583_v33  ;;  %6450 = vtanh.f32 %v4373_v2  ;;  %v4263_v18 = vpop.f32.mrf.mxu1 }
 0x745   : > { %v4376_v5 = vpop.f32.mrf.mxu0  ;;  %v6427_v21 = vpop.eup %6426  ;;  %v5586_v15 = vpack.c.bf16 %v6425_v12, %v6421_v28  ;;  %6452 = vtanh.f32 %v4262_v57  ;;  %v4264_v63 = vadd.f32 %v4263_v18, %v8097_v29  ;;  %v3588_v18 = vsub.s32 6, %v8370_v43 }
 0x746   : > { %v4377_v14 = vadd.f32 %v4376_v5, %v8100_v34  ;;  %v6429_v3 = vpop.eup %6428  ;;  %v5587_v27 = vpack.c.bf16 %v6427_v21, %v6423_v10  ;;  %6454 = vtanh.f32 %v4375_v31  ;;  %v4267_v20 = vpop.f32.mrf.mxu1  ;;  %v8191_v10 = vrot.slane %v8085_v0, %v3580_v35 }
 0x747   : > { %v4380_v22 = vpop.f32.mrf.mxu0  ;;  %v6431_v54 = vpop.eup %6430  ;;  %5102 = vst [vmem:[%s8124_s0 + $0xc4] sm:$0xff] %v5586_v15  ;;  %6456 = vtanh.f32 %v4264_v63  ;;  %v4268_v61 = vadd.f32 %v4267_v20, %v8090_v39  ;;  %v8199_v63 = vrot.slane %v8085_v0, %v3584_v11 }
 0x748   : > { %v4381_v46 = vadd.f32 %v4380_v22, %v8093_v55  ;;  %v6433_v58 = vpop.eup %6432  ;;  %5103 = vst [vmem:[%s8124_s0 + $0xcc] sm:$0xff] %v5587_v27  ;;  %6458 = vtanh.f32 %v4377_v14  ;;  %v4269_v62 = vpop.f32.mrf.mxu1 }
 0x749   : > { %v4382_v23 = vpop.f32.mrf.mxu0  ;;  %v6435_v32 = vpop.eup %6434  ;;  %v5590_v1 = vpack.c.bf16 %v6433_v58, %v6429_v3  ;;  %6460 = vtanh.f32 %v4268_v61  ;;  %v4270_v16 = vadd.f32 %v4269_v62, %v8097_v29 }
 0x74a   : > { %v4383_v7 = vadd.f32 %v4382_v23, %v8100_v34  ;;  %v6437_v52 = vpop.eup %6436  ;;  %v5591_v17 = vpack.c.bf16 %v6435_v32, %v6431_v54  ;;  %6462 = vtanh.f32 %v4381_v46  ;;  %v4271_v40 = vpop.f32.mrf.mxu1  ;;  %v8206_v46 = vrot.slane %v8085_v0, %v3588_v18 }
 0x74b   : > { %v4384_v13 = vpop.f32.mrf.mxu0  ;;  %v6439_v44 = vpop.eup %6438  ;;  %5106 = vst [vmem:[%s8124_s0 + $0xe0] sm:$0xff] %v5590_v1  ;;  %6464 = vtanh.f32 %v4270_v16  ;;  %v4272_v50 = vadd.f32 %v4271_v40, %v8090_v39 }
 0x74c   : > { %v4385_v24 = vadd.f32 %v4384_v13, %v8093_v55  ;;  %v6441_v49 = vpop.eup %6440  ;;  %5107 = vst [vmem:[%s8124_s0 + $0xe8] sm:$0xff] %v5591_v17  ;;  %6466 = vtanh.f32 %v4383_v7  ;;  %v4273_v30 = vpop.f32.mrf.mxu1 }
 0x74d   : > { %v4386_v47 = vpop.f32.mrf.mxu0  ;;  %v6443_v53 = vpop.eup %6442  ;;  %v5594_v48 = vpack.c.bf16 %v6441_v49, %v6437_v52  ;;  %6468 = vtanh.f32 %v4272_v50  ;;  %v4274_v19 = vadd.f32 %v4273_v30, %v8097_v29 }
 0x74e   : > { %v4387_v4 = vadd.f32 %v4386_v47, %v8100_v34  ;;  %v6445_v41 = vpop.eup %6444  ;;  %v5595_v36 = vpack.c.bf16 %v6443_v53, %v6439_v44  ;;  %6470 = vtanh.f32 %v4385_v24  ;;  %v4277_v6 = vpop.f32.mrf.mxu1 }
 0x74f   : > { %v4390_v37 = vpop.f32.mrf.mxu0  ;;  %v6447_v26 = vpop.eup %6446  ;;  %5110 = vst [vmem:[%s8124_s0 + $0xfc] sm:$0xff] %v5594_v48  ;;  %6472 = vtanh.f32 %v4274_v19  ;;  %v4278_v25 = vadd.f32 %v4277_v6, %v8090_v39 }
 0x750   : > { %v4391_v45 = vadd.f32 %v4390_v37, %v8093_v55  ;;  %v6449_v51 = vpop.eup %6448  ;;  %5111 = vst [vmem:[%s8124_s0 + $0x104] sm:$0xff] %v5595_v36  ;;  %6474 = vtanh.f32 %v4387_v4  ;;  %v4279_v59 = vpop.f32.mrf.mxu1 }
 0x751   : > { %v4392_v42 = vpop.f32.mrf.mxu0  ;;  %v6451_v9 = vpop.eup %6450  ;;  %v5598_v60 = vpack.c.bf16 %v6449_v51, %v6445_v41  ;;  %6476 = vtanh.f32 %v4278_v25  ;;  %v4280_v38 = vadd.f32 %v4279_v59, %v8097_v29 }
 0x752   : > { %v4393_v2 = vadd.f32 %v4392_v42, %v8100_v34  ;;  %v6453_v28 = vpop.eup %6452  ;;  %v5599_v33 = vpack.c.bf16 %v6451_v9, %v6447_v26  ;;  %6478 = vtanh.f32 %v4391_v45  ;;  %v4281_v56 = vpop.f32.mrf.mxu1 }
 0x753   : > { %v4394_v8 = vpop.f32.mrf.mxu0  ;;  %v6455_v57 = vpop.eup %6454  ;;  %5114 = vst [vmem:[%s8124_s0 + $0x118] sm:$0xff] %v5598_v60  ;;  %6480 = vtanh.f32 %v4280_v38  ;;  %v4282_v31 = vadd.f32 %v4281_v56, %v8090_v39 }
 0x754   : > { %v4395_v12 = vadd.f32 %v4394_v8, %v8093_v55  ;;  %v6457_v5 = vpop.eup %6456  ;;  %5115 = vst [vmem:[%s8124_s0 + $0x120] sm:$0xff] %v5599_v33  ;;  %6482 = vtanh.f32 %v4393_v2  ;;  %v4283_v21 = vpop.f32.mrf.mxu1 }
 0x755   : > { %v4396_v15 = vpop.f32.mrf.mxu0  ;;  %v6459_v14 = vpop.eup %6458  ;;  %v5602_v3 = vpack.c.bf16 %v6457_v5, %v6453_v28  ;;  %6484 = vtanh.f32 %v4282_v31  ;;  %v4284_v27 = vadd.f32 %v4283_v21, %v8097_v29 }
 0x756   : > { %v4397_v39 = vadd.f32 %v4396_v15, %v8100_v34  ;;  %v6461_v55 = vpop.eup %6460  ;;  %v5603_v20 = vpack.c.bf16 %v6459_v14, %v6455_v57  ;;  %6486 = vtanh.f32 %v4395_v12  ;;  %v4433_v43 = vpop.f32.mrf.mxu1 }
 0x757   : > { %v5766_v22 = vpop.f32.mrf.mxu0  ;;  %v6463_v54 = vpop.eup %6462  ;;  %5118 = vst [vmem:[%s8124_s0 + $0x134] sm:$0xff] %v5602_v3  ;;  %6488 = vtanh.f32 %v4284_v27  ;;  %v4434_v61 = vadd.f32 %v4433_v43, %v8191_v10 }
 0x758   : > { %v6465_v58 = vpop.eup %6464  ;;  %5119 = vst [vmem:[%s8124_s0 + $0x13c] sm:$0xff] %v5603_v20  ;;  %6490 = vtanh.f32 %v4397_v39  ;;  %v4435_v29 = vpop.f32.mrf.mxu1 }
 0x759   : > { %v5767_v62 = vpop.f32.mrf.mxu0  ;;  %v6467_v34 = vpop.eup %6466  ;;  %v5606_v23 = vpack.c.bf16 %v6465_v58, %v6461_v55  ;;  %v4436_v32 = vadd.f32 %v4435_v29, %v8199_v63  ;;  %6492 = vtanh.f32 %v4434_v61 }
 0x75a   : > { %v5768_v1 = vadd.f32 %v5767_v62, %v5766_v22  ;;  %v6469_v16 = vpop.eup %6468  ;;  %v5607_v7 = vpack.c.bf16 %v6467_v34, %v6463_v54  ;;  %v4437_v52 = vpop.f32.mrf.mxu1 }
 0x75b   : > { %v5769_v17 = vpop.f32.mrf.mxu0  ;;  %v6471_v40 = vpop.eup %6470  ;;  %5122 = vst [vmem:[%s8124_s0 + $0x150] sm:$0xff] %v5606_v23  ;;  %6494 = vtanh.f32 %v4436_v32  ;;  %v4438_v13 = vadd.f32 %v4437_v52, %v8191_v10 }
 0x75c   : > { %v4547_v0 = vadd.f32 %v5768_v1, %v8206_v46  ;;  %v6473_v44 = vpop.eup %6472  ;;  %5123 = vst [vmem:[%s8124_s0 + $0x158] sm:$0xff] %v5607_v7  ;;  %v4439_v50 = vpop.f32.mrf.mxu1 }
 0x75d   : > { %v5770_v24 = vpop.f32.mrf.mxu0  ;;  %v6475_v49 = vpop.eup %6474  ;;  %v5610_v30 = vpack.c.bf16 %v6473_v44, %v6469_v16  ;;  %v4440_v47 = vadd.f32 %v4439_v50, %v8199_v63 }
 0x75e   : > { %6496 = vtanh.f32 %v4547_v0  ;;  %v5771_v53 = vadd.f32 %v5770_v24, %v5769_v17  ;;  %v6477_v48 = vpop.eup %6476  ;;  %v5611_v19 = vpack.c.bf16 %v6475_v49, %v6471_v40  ;;  %v4443_v4 = vpop.f32.mrf.mxu1 }
 0x75f   : > { %6498 = vtanh.f32 %v4438_v13  ;;  %v5772_v41 = vpop.f32.mrf.mxu0  ;;  %v6479_v36 = vpop.eup %6478  ;;  %5126 = vst [vmem:[%s8124_s0 + $0x16c] sm:$0xff] %v5610_v30  ;;  %v4444_v37 = vadd.f32 %v4443_v4, %v8191_v10 }
 0x760   : > { %6500 = vtanh.f32 %v4440_v47  ;;  %v4550_v6 = vadd.f32 %v5771_v53, %v8206_v46  ;;  %v6481_v35 = vpop.eup %6480  ;;  %5127 = vst [vmem:[%s8124_s0 + $0x174] sm:$0xff] %v5611_v19  ;;  %v4445_v26 = vpop.f32.mrf.mxu1 }
 0x761   : > { %v5773_v25 = vpop.f32.mrf.mxu0  ;;  %v6483_v45 = vpop.eup %6482  ;;  %v5614_v51 = vpack.c.bf16 %v6481_v35, %v6477_v48  ;;  %v4446_v59 = vadd.f32 %v4445_v26, %v8199_v63 }
 0x762   : > { %6502 = vtanh.f32 %v4550_v6  ;;  %v5774_v42 = vadd.f32 %v5773_v25, %v5772_v41  ;;  %v6485_v11 = vpop.eup %6484  ;;  %v5615_v9 = vpack.c.bf16 %v6483_v45, %v6479_v36  ;;  %v4447_v60 = vpop.f32.mrf.mxu1 }
 0x763   : > { %6504 = vtanh.f32 %v4444_v37  ;;  %v5775_v38 = vpop.f32.mrf.mxu0  ;;  %v6487_v2 = vpop.eup %6486  ;;  %5130 = vst [vmem:[%s8124_s0 + $0x188] sm:$0xff] %v5614_v51  ;;  %v4448_v33 = vadd.f32 %v4447_v60, %v8191_v10 }
 0x764   : > { %6506 = vtanh.f32 %v4446_v59  ;;  %v4555_v28 = vadd.f32 %v5774_v42, %v8206_v46  ;;  %v6489_v56 = vpop.eup %6488  ;;  %5131 = vst [vmem:[%s8124_s0 + $0x190] sm:$0xff] %v5615_v9  ;;  %v4449_v8 = vpop.f32.mrf.mxu1 }
 0x765   : > { %v5776_v57 = vpop.f32.mrf.mxu0  ;;  %v6491_v31 = vpop.eup %6490  ;;  %v5618_v12 = vpack.c.bf16 %v6489_v56, %v6485_v11  ;;  %v4450_v18 = vadd.f32 %v4449_v8, %v8199_v63 }
 0x766   : > { %6508 = vtanh.f32 %v4555_v28  ;;  %v5777_v5 = vadd.f32 %v5776_v57, %v5775_v38  ;;  %v5619_v21 = vpack.c.bf16 %v6491_v31, %v6487_v2  ;;  %v4453_v15 = vpop.f32.mrf.mxu1  ;;  %v6493_v3 = vpop.eup %6492 }
 0x767   : > { %6510 = vtanh.f32 %v4448_v33  ;;  %v5778_v14 = vpop.f32.mrf.mxu0  ;;  %5134 = vst [vmem:[%s8124_s0 + $0x1a4] sm:$0xff] %v5618_v12  ;;  %v4454_v39 = vadd.f32 %v4453_v15, %v8191_v10 }
 0x768   : > { %6512 = vtanh.f32 %v4450_v18  ;;  %v4558_v27 = vadd.f32 %v5777_v5, %v8206_v46  ;;  %v6495_v55 = vpop.eup %6494  ;;  %5135 = vst [vmem:[%s8124_s0 + $0x1ac] sm:$0xff] %v5619_v21  ;;  %v4455_v20 = vpop.f32.mrf.mxu1 }
 0x769   : > { %v5779_v43 = vpop.f32.mrf.mxu0  ;;  %v5560_v22 = vpack.c.bf16 %v6495_v55, %v6493_v3  ;;  %v4456_v54 = vadd.f32 %v4455_v20, %v8199_v63 }
 0x76a   : > { %6514 = vtanh.f32 %v4558_v27  ;;  %v5780_v61 = vadd.f32 %v5779_v43, %v5778_v14  ;;  %v4457_v29 = vpop.f32.mrf.mxu1 }
 0x76b   : > { %v6497_v58 = vpop.eup %6496  ;;  %6516 = vtanh.f32 %v4454_v39  ;;  %v5781_v62 = vpop.f32.mrf.mxu0  ;;  %5075 = vst [vmem:[%s8124_s0 + $0x10] sm:$0xff] %v5560_v22  ;;  %v4458_v1 = vadd.f32 %v4457_v29, %v8191_v10 }
 0x76c   : > { %v6499_v34 = vpop.eup %6498  ;;  %v5561_v23 = vpack.c.bf16 %v6497_v58, %v6497_v58  ;;  %6518 = vtanh.f32 %v4456_v54  ;;  %v4563_v32 = vadd.f32 %v5780_v61, %v8206_v46  ;;  %v4459_v7 = vpop.f32.mrf.mxu1 }
 0x76d   : > { %v6501_v16 = vpop.eup %6500  ;;  %v5782_v52 = vpop.f32.mrf.mxu0  ;;  %v4460_v40 = vadd.f32 %v4459_v7, %v8199_v63 }
 0x76e   : > { %5077 = vst.msk [vmem:[%s8124_s0 + $0x18] sm:$0xf] %vm5076_vm1, %v5561_v23  ;;  %v5564_v17 = vpack.c.bf16 %v6501_v16, %v6499_v34  ;;  %6520 = vtanh.f32 %v4563_v32  ;;  %v5783_v0 = vadd.f32 %v5782_v52, %v5781_v62  ;;  %v4463_v44 = vpop.f32.mrf.mxu1 }
 0x76f   : > { %v6503_v13 = vpop.eup %6502  ;;  %6522 = vtanh.f32 %v4458_v1  ;;  %v5784_v50 = vpop.f32.mrf.mxu0  ;;  %v4464_v47 = vadd.f32 %v4463_v44, %v8191_v10 }
 0x770   : > { %v6505_v24 = vpop.eup %6504  ;;  %5080 = vst [vmem:[%s8124_s0 + $0x2c] sm:$0xff] %v5564_v17  ;;  %v5565_v49 = vpack.c.bf16 %v6503_v13, %v6503_v13  ;;  %6524 = vtanh.f32 %v4460_v40  ;;  %v4566_v30 = vadd.f32 %v5783_v0, %v8206_v46  ;;  %v4465_v48 = vpop.f32.mrf.mxu1 }
 0x771   : > { %v6507_v53 = vpop.eup %6506  ;;  %v5785_v19 = vpop.f32.mrf.mxu0  ;;  %v4466_v41 = vadd.f32 %v4465_v48, %v8199_v63 }
 0x772   : > { %5081 = vst.msk [vmem:[%s8124_s0 + $0x34] sm:$0xf] %vm5076_vm1, %v5565_v49  ;;  %v5568_v4 = vpack.c.bf16 %v6507_v53, %v6505_v24  ;;  %6526 = vtanh.f32 %v4566_v30  ;;  %v5786_v36 = vadd.f32 %v5785_v19, %v5784_v50  ;;  %v4467_v37 = vpop.f32.mrf.mxu1 }
 0x773   : > { %v6509_v6 = vpop.eup %6508  ;;  %6528 = vtanh.f32 %v4464_v47  ;;  %v5787_v35 = vpop.f32.mrf.mxu0  ;;  %v4468_v51 = vadd.f32 %v4467_v37, %v8191_v10 }
 0x774   : > { %v6511_v26 = vpop.eup %6510  ;;  %5084 = vst [vmem:[%s8124_s0 + $0x48] sm:$0xff] %v5568_v4  ;;  %v5569_v25 = vpack.c.bf16 %v6509_v6, %v6509_v6  ;;  %6530 = vtanh.f32 %v4466_v41  ;;  %v4571_v45 = vadd.f32 %v5786_v36, %v8206_v46  ;;  %v4469_v42 = vpop.f32.mrf.mxu1 }
 0x775   : > { %v6513_v59 = vpop.eup %6512  ;;  %v5788_v11 = vpop.f32.mrf.mxu0  ;;  %v4470_v60 = vadd.f32 %v4469_v42, %v8199_v63 }
 0x776   : > { %5085 = vst.msk [vmem:[%s8124_s0 + $0x50] sm:$0xf] %vm5076_vm1, %v5569_v25  ;;  %v5572_v9 = vpack.c.bf16 %v6513_v59, %v6511_v26  ;;  %6532 = vtanh.f32 %v4571_v45  ;;  %v5789_v38 = vadd.f32 %v5788_v11, %v5787_v35  ;;  %v4473_v28 = vpop.f32.mrf.mxu1 }
 0x777   : > { %v6515_v2 = vpop.eup %6514  ;;  %6534 = vtanh.f32 %v4468_v51  ;;  %v5790_v33 = vpop.f32.mrf.mxu0  ;;  %v4474_v31 = vadd.f32 %v4473_v28, %v8191_v10 }
 0x778   : > { %v6517_v56 = vpop.eup %6516  ;;  %5088 = vst [vmem:[%s8124_s0 + $0x64] sm:$0xff] %v5572_v9  ;;  %v5573_v8 = vpack.c.bf16 %v6515_v2, %v6515_v2  ;;  %6536 = vtanh.f32 %v4470_v60  ;;  %v4574_v57 = vadd.f32 %v5789_v38, %v8206_v46  ;;  %v4475_v18 = vpop.f32.mrf.mxu1 }
 0x779   : > { %v6519_v12 = vpop.eup %6518  ;;  %v5791_v5 = vpop.f32.mrf.mxu0  ;;  %v4476_v15 = vadd.f32 %v4475_v18, %v8199_v63 }
 0x77a   : > { %5089 = vst.msk [vmem:[%s8124_s0 + $0x6c] sm:$0xf] %vm5076_vm1, %v5573_v8  ;;  %v5576_v21 = vpack.c.bf16 %v6519_v12, %v6517_v56  ;;  %6538 = vtanh.f32 %v4574_v57  ;;  %v5792_v14 = vadd.f32 %v5791_v5, %v5790_v33  ;;  %v4477_v27 = vpop.f32.mrf.mxu1 }
 0x77b   : > { %v6521_v3 = vpop.eup %6520  ;;  %6540 = vtanh.f32 %v4474_v31  ;;  %v5793_v39 = vpop.f32.mrf.mxu0  ;;  %v4478_v22 = vadd.f32 %v4477_v27, %v8191_v10 }
 0x77c   : > { %v6523_v55 = vpop.eup %6522  ;;  %5092 = vst [vmem:[%s8124_s0 + $0x80] sm:$0xff] %v5576_v21  ;;  %v5577_v20 = vpack.c.bf16 %v6521_v3, %v6521_v3  ;;  %6542 = vtanh.f32 %v4476_v15  ;;  %v4579_v43 = vadd.f32 %v5792_v14, %v8206_v46  ;;  %v4479_v61 = vpop.f32.mrf.mxu1 }
 0x77d   : > { %v6525_v54 = vpop.eup %6524  ;;  %v5794_v58 = vpop.f32.mrf.mxu0  ;;  %v4480_v62 = vadd.f32 %v4479_v61, %v8199_v63 }
 0x77e   : > { %5093 = vst.msk [vmem:[%s8124_s0 + $0x88] sm:$0xf] %vm5076_vm1, %v5577_v20  ;;  %v5580_v29 = vpack.c.bf16 %v6525_v54, %v6523_v55  ;;  %6544 = vtanh.f32 %v4579_v43  ;;  %v5795_v34 = vadd.f32 %v5794_v58, %v5793_v39  ;;  %v4483_v32 = vpop.f32.mrf.mxu1 }
 0x77f   : > { %v6527_v23 = vpop.eup %6526  ;;  %6546 = vtanh.f32 %v4478_v22  ;;  %v5796_v1 = vpop.f32.mrf.mxu0  ;;  %v4484_v17 = vadd.f32 %v4483_v32, %v8191_v10 }
 0x780   : > { %v6529_v16 = vpop.eup %6528  ;;  %5096 = vst [vmem:[%s8124_s0 + $0x9c] sm:$0xff] %v5580_v29  ;;  %v5581_v7 = vpack.c.bf16 %v6527_v23, %v6527_v23  ;;  %6548 = vtanh.f32 %v4480_v62  ;;  %v4582_v52 = vadd.f32 %v5795_v34, %v8206_v46  ;;  %v4485_v0 = vpop.f32.mrf.mxu1 }
 0x781   : > { %v6531_v40 = vpop.eup %6530  ;;  %v5797_v13 = vpop.f32.mrf.mxu0  ;;  %v4486_v50 = vadd.f32 %v4485_v0, %v8199_v63 }
 0x782   : > { %5097 = vst.msk [vmem:[%s8124_s0 + $0xa4] sm:$0xf] %vm5076_vm1, %v5581_v7  ;;  %v5584_v44 = vpack.c.bf16 %v6531_v40, %v6529_v16  ;;  %6550 = vtanh.f32 %v4582_v52  ;;  %v5798_v24 = vadd.f32 %v5797_v13, %v5796_v1  ;;  %v4487_v30 = vpop.f32.mrf.mxu1 }
 0x783   : > { %v6533_v49 = vpop.eup %6532  ;;  %6552 = vtanh.f32 %v4484_v17  ;;  %v5799_v47 = vpop.f32.mrf.mxu0  ;;  %v4488_v4 = vadd.f32 %v4487_v30, %v8191_v10 }
 0x784   : > { %v6535_v53 = vpop.eup %6534  ;;  %5100 = vst [vmem:[%s8124_s0 + $0xb8] sm:$0xff] %v5584_v44  ;;  %v5585_v48 = vpack.c.bf16 %v6533_v49, %v6533_v49  ;;  %6554 = vtanh.f32 %v4486_v50  ;;  %v4587_v19 = vadd.f32 %v5798_v24, %v8206_v46  ;;  %v4489_v36 = vpop.f32.mrf.mxu1 }
 0x785   : > { %v6537_v41 = vpop.eup %6536  ;;  %v5800_v6 = vpop.f32.mrf.mxu0  ;;  %v4490_v35 = vadd.f32 %v4489_v36, %v8199_v63 }
 0x786   : > { %5101 = vst.msk [vmem:[%s8124_s0 + $0xc0] sm:$0xf] %vm5076_vm1, %v5585_v48  ;;  %v5588_v37 = vpack.c.bf16 %v6537_v41, %v6535_v53  ;;  %6556 = vtanh.f32 %v4587_v19  ;;  %v5801_v26 = vadd.f32 %v5800_v6, %v5799_v47  ;;  %v4493_v45 = vpop.f32.mrf.mxu1 }
 0x787   : > { %v6539_v25 = vpop.eup %6538  ;;  %6558 = vtanh.f32 %v4488_v4  ;;  %v5802_v51 = vpop.f32.mrf.mxu0  ;;  %v4494_v9 = vadd.f32 %v4493_v45, %v8191_v10 }
 0x788   : > { %v6541_v59 = vpop.eup %6540  ;;  %5104 = vst [vmem:[%s8124_s0 + $0xd4] sm:$0xff] %v5588_v37  ;;  %v5589_v42 = vpack.c.bf16 %v6539_v25, %v6539_v25  ;;  %6560 = vtanh.f32 %v4490_v35  ;;  %v4590_v11 = vadd.f32 %v5801_v26, %v8206_v46  ;;  %v4495_v38 = vpop.f32.mrf.mxu1 }
 0x789   : > { %v6543_v60 = vpop.eup %6542  ;;  %v5803_v2 = vpop.f32.mrf.mxu0  ;;  %v4496_v33 = vadd.f32 %v4495_v38, %v8199_v63 }
 0x78a   : > { %5105 = vst.msk [vmem:[%s8124_s0 + $0xdc] sm:$0xf] %vm5076_vm1, %v5589_v42  ;;  %v5592_v28 = vpack.c.bf16 %v6543_v60, %v6541_v59  ;;  %6562 = vtanh.f32 %v4590_v11  ;;  %v5804_v56 = vadd.f32 %v5803_v2, %v5802_v51  ;;  %v4497_v57 = vpop.f32.mrf.mxu1 }
 0x78b   : > { %v6545_v8 = vpop.eup %6544  ;;  %6564 = vtanh.f32 %v4494_v9  ;;  %v5805_v31 = vpop.f32.mrf.mxu0  ;;  %v4498_v21 = vadd.f32 %v4497_v57, %v8191_v10 }
 0x78c   : > { %v6547_v12 = vpop.eup %6546  ;;  %5108 = vst [vmem:[%s8124_s0 + $0xf0] sm:$0xff] %v5592_v28  ;;  %v5593_v18 = vpack.c.bf16 %v6545_v8, %v6545_v8  ;;  %6566 = vtanh.f32 %v4496_v33  ;;  %v4595_v5 = vadd.f32 %v5804_v56, %v8206_v46  ;;  %v4499_v14 = vpop.f32.mrf.mxu1 }
 0x78d   : > { %v6549_v15 = vpop.eup %6548  ;;  %v5806_v3 = vpop.f32.mrf.mxu0  ;;  %v4500_v39 = vadd.f32 %v4499_v14, %v8199_v63 }
 0x78e   : > { %5109 = vst.msk [vmem:[%s8124_s0 + $0xf8] sm:$0xf] %vm5076_vm1, %v5593_v18  ;;  %v5596_v27 = vpack.c.bf16 %v6549_v15, %v6547_v12  ;;  %6568 = vtanh.f32 %v4595_v5  ;;  %v5807_v55 = vadd.f32 %v5806_v3, %v5805_v31  ;;  %v4503_v43 = vpop.f32.mrf.mxu1 }
 0x78f   : > { %v6551_v20 = vpop.eup %6550  ;;  %6570 = vtanh.f32 %v4498_v21  ;;  %v5808_v22 = vpop.f32.mrf.mxu0  ;;  %v4504_v29 = vadd.f32 %v4503_v43, %v8191_v10 }
 0x790   : > { %v6553_v54 = vpop.eup %6552  ;;  %5112 = vst [vmem:[%s8124_s0 + $0x10c] sm:$0xff] %v5596_v27  ;;  %v5597_v61 = vpack.c.bf16 %v6551_v20, %v6551_v20  ;;  %6572 = vtanh.f32 %v4500_v39  ;;  %v4598_v58 = vadd.f32 %v5807_v55, %v8206_v46  ;;  %v4505_v34 = vpop.f32.mrf.mxu1 }
 0x791   : > { %v6555_v62 = vpop.eup %6554  ;;  %v5809_v23 = vpop.f32.mrf.mxu0  ;;  %v4506_v1 = vadd.f32 %v4505_v34, %v8199_v63 }
 0x792   : > { %5113 = vst.msk [vmem:[%s8124_s0 + $0x114] sm:$0xf] %vm5076_vm1, %v5597_v61  ;;  %v5600_v32 = vpack.c.bf16 %v6555_v62, %v6553_v54  ;;  %6574 = vtanh.f32 %v4598_v58  ;;  %v5810_v16 = vadd.f32 %v5809_v23, %v5808_v22  ;;  %v4507_v52 = vpop.f32.mrf.mxu1 }
 0x793   : > { %v6557_v7 = vpop.eup %6556  ;;  %6576 = vtanh.f32 %v4504_v29  ;;  %v5811_v17 = vpop.f32.mrf.mxu0  ;;  %v4508_v44 = vadd.f32 %v4507_v52, %v8191_v10 }
 0x794   : > { %v6559_v40 = vpop.eup %6558  ;;  %5116 = vst [vmem:[%s8124_s0 + $0x128] sm:$0xff] %v5600_v32  ;;  %v5601_v0 = vpack.c.bf16 %v6557_v7, %v6557_v7  ;;  %6578 = vtanh.f32 %v4506_v1  ;;  %v4603_v13 = vadd.f32 %v5810_v16, %v8206_v46  ;;  %v4509_v24 = vpop.f32.mrf.mxu1 }
 0x795   : > { %v6561_v50 = vpop.eup %6560  ;;  %v5812_v49 = vpop.f32.mrf.mxu0  ;;  %v4510_v47 = vadd.f32 %v4509_v24, %v8199_v63 }
 0x796   : > { %5117 = vst.msk [vmem:[%s8124_s0 + $0x130] sm:$0xf] %vm5076_vm1, %v5601_v0  ;;  %v5604_v30 = vpack.c.bf16 %v6561_v50, %v6559_v40  ;;  %6580 = vtanh.f32 %v4603_v13  ;;  %v5813_v53 = vadd.f32 %v5812_v49, %v5811_v17 }
 0x797   : > { %v6563_v48 = vpop.eup %6562  ;;  %6582 = vtanh.f32 %v4508_v44 }
 0x798   : > { %v6565_v19 = vpop.eup %6564  ;;  %5120 = vst [vmem:[%s8124_s0 + $0x144] sm:$0xff] %v5604_v30  ;;  %v5605_v4 = vpack.c.bf16 %v6563_v48, %v6563_v48  ;;  %6584 = vtanh.f32 %v4510_v47  ;;  %v4606_v10 = vadd.f32 %v5813_v53, %v8206_v46 }
 0x799   : > { %v6567_v41 = vpop.eup %6566 }
 0x79a   : > { %5121 = vst.msk [vmem:[%s8124_s0 + $0x14c] sm:$0xf] %vm5076_vm1, %v5605_v4  ;;  %v5608_v36 = vpack.c.bf16 %v6567_v41, %v6565_v19  ;;  %6586 = vtanh.f32 %v4606_v10 }
 0x79b   : > { %v6569_v6 = vpop.eup %6568 }
 0x79c   : > { %v6571_v63 = vpop.eup %6570  ;;  %5124 = vst [vmem:[%s8124_s0 + $0x160] sm:$0xff] %v5608_v36  ;;  %v5609_v37 = vpack.c.bf16 %v6569_v6, %v6569_v6 }
 0x79d   : > { %v6573_v35 = vpop.eup %6572 }
 0x79e   : > { %5125 = vst.msk [vmem:[%s8124_s0 + $0x168] sm:$0xf] %vm5076_vm1, %v5609_v37  ;;  %v5612_v26 = vpack.c.bf16 %v6573_v35, %v6571_v63 }
 0x79f   : > { %v6575_v25 = vpop.eup %6574 }
 0x7a0   : > { %v6577_v45 = vpop.eup %6576  ;;  %5128 = vst [vmem:[%s8124_s0 + $0x17c] sm:$0xff] %v5612_v26  ;;  %v5613_v46 = vpack.c.bf16 %v6575_v25, %v6575_v25 }
 0x7a1   : > { %v6579_v51 = vpop.eup %6578 }
 0x7a2   : > { %5129 = vst.msk [vmem:[%s8124_s0 + $0x184] sm:$0xf] %vm5076_vm1, %v5613_v46  ;;  %v5616_v59 = vpack.c.bf16 %v6579_v51, %v6577_v45 }
 0x7a3   : > { %v6581_v42 = vpop.eup %6580 }
 0x7a4   : > { %v6583_v11 = vpop.eup %6582  ;;  %5132 = vst [vmem:[%s8124_s0 + $0x198] sm:$0xff] %v5616_v59  ;;  %v5617_v9 = vpack.c.bf16 %v6581_v42, %v6581_v42 }
 0x7a5   : > { %v6585_v60 = vpop.eup %6584 }
 0x7a6   : > { %5133 = vst.msk [vmem:[%s8124_s0 + $0x1a0] sm:$0xf] %vm5076_vm1, %v5617_v9  ;;  %v5620_v38 = vpack.c.bf16 %v6585_v60, %v6583_v11 }
 0x7a7   : > { %v6587_v2 = vpop.eup %6586 }
 0x7a8   : > { %5136 = vst [vmem:[%s8124_s0 + $0x1b4] sm:$0xff] %v5620_v38  ;;  %v5621_v28 = vpack.c.bf16 %v6587_v2, %v6587_v2 }
 0x7aa   : > { %5137 = vst.msk [vmem:[%s8124_s0 + $0x1bc] sm:$0xf] %vm5076_vm1, %v5621_v28 }
 0x7ab PF: > { %s8371_s30 = sld [smem:[#allocation2_spill]] }
 0x7b1   : > { %s27_s24 = sadd.s32 1, %s8371_s30  }
 0x7b2   : > { %p24_p4 = scmp.ge.s32.totalorder %s27_s24, 6  }
 0x7b4   :  { %26 = sbr.rel (!%p24_p4) target bundleno = 3 (0x3), region = 118 }

</bundles_post_ra>
